<compile_context>
chip_gen: v5e
topology: v5e:2x2
jax: 0.10.0
libtpu: 0.0.40
codegen_flags: <defaults>
</compile_context>

<pallas_src>
import functools
import math

import jax
import jax.numpy as jnp
from jax import lax
from jax.experimental import pallas as pl
from jax.experimental.pallas import tpu as pltpu

EPS = 1e-6            # nn.LayerNorm(eps=1e-6) as in the reference layers
NEG_INF = -1e30       # stands in for float('-inf') masked_fill
VMEM_LIMIT = 64 * 1024 * 1024


# ----------------------------------------------------------------------------
# Helpers
# ----------------------------------------------------------------------------
def _tile(dim, target, base):
    """Largest multiple of `base` that divides `dim` and is <= target, else dim."""
    if dim <= target:
        return dim
    t = (target // base) * base
    while t >= base:
        if dim % t == 0:
            return t
        t -= base
    return dim


def _ln(x, g, b):
    """f32 LayerNorm used inside kernels."""
    mu = jnp.mean(x, axis=-1, keepdims=True)
    var = jnp.mean(jnp.square(x - mu), axis=-1, keepdims=True)
    return (x - mu) * lax.rsqrt(var + EPS) * g + b


# ----------------------------------------------------------------------------
# General tiled linear:  y = x @ W (+ bias) (+ residual)   [bf16 in / bf16 out]
# ----------------------------------------------------------------------------
def _linear_kernel(*refs, has_bias, has_res):
    x_ref, w_ref = refs[0], refs[1]
    idx = 2
    b_ref = r_ref = None
    if has_bias:
        b_ref = refs[idx]
        idx += 1
    if has_res:
        r_ref = refs[idx]
        idx += 1
    o_ref, acc_ref = refs[idx], refs[idx + 1]

    @pl.when(pl.program_id(2) == 0)
    def _():
        acc_ref[...] = jnp.zeros_like(acc_ref)

    acc_ref[...] += jnp.dot(x_ref[...], w_ref[...],
                            preferred_element_type=jnp.float32)

    @pl.when(pl.program_id(2) == pl.num_programs(2) - 1)
    def _():
        y = acc_ref[...]
        if has_bias:
            y = y + b_ref[...]
        if has_res:
            y = y + r_ref[...].astype(jnp.float32)
        o_ref[...] = y.astype(o_ref.dtype)


def pallas_linear(x, w, b=None, residual=None, tm=256, tn=512, tk=512,
                  out_dtype=jnp.bfloat16):
    x = x.astype(jnp.bfloat16)
    w = w.astype(jnp.bfloat16)
    M, K = x.shape
    N = w.shape[1]
    tm = _tile(M, tm, 8)
    tn = _tile(N, tn, 128)
    tk = _tile(K, tk, 128)
    grid = (M // tm, N // tn, K // tk)

    in_specs = [pl.BlockSpec((tm, tk), lambda i, j, k: (i, k)),
                pl.BlockSpec((tk, tn), lambda i, j, k: (k, j))]
    args = [x, w]
    has_bias = b is not None
    if has_bias:
        in_specs.append(pl.BlockSpec((1, tn), lambda i, j, k: (0, j)))
        args.append(b.reshape(1, N).astype(jnp.float32))
    has_res = residual is not None
    if has_res:
        in_specs.append(pl.BlockSpec((tm, tn), lambda i, j, k: (i, j)))
        args.append(residual.astype(jnp.bfloat16))

    kernel = functools.partial(_linear_kernel, has_bias=has_bias,
                               has_res=has_res)
    return pl.pallas_call(
        kernel,
        out_shape=jax.ShapeDtypeStruct((M, N), out_dtype),
        grid=grid,
        in_specs=in_specs,
        out_specs=pl.BlockSpec((tm, tn), lambda i, j, k: (i, j)),
        scratch_shapes=[pltpu.VMEM((tm, tn), jnp.float32)],
        compiler_params=pltpu.CompilerParams(
            dimension_semantics=("parallel", "parallel", "arbitrary"),
            vmem_limit_bytes=VMEM_LIMIT),
    )(*args)


# ----------------------------------------------------------------------------
# Row-tiled LayerNorm (bf16 in / bf16 out, f32 math)
# ----------------------------------------------------------------------------
def _layernorm_kernel(x_ref, g_ref, b_ref, o_ref):
    x = x_ref[...].astype(jnp.float32)
    o_ref[...] = _ln(x, g_ref[...], b_ref[...]).astype(o_ref.dtype)


def pallas_layernorm(x, gamma, beta, tm=512):
    x = x.astype(jnp.bfloat16)
    M, D = x.shape
    tm = _tile(M, tm, 8)
    return pl.pallas_call(
        _layernorm_kernel,
        out_shape=jax.ShapeDtypeStruct((M, D), jnp.bfloat16),
        grid=(M // tm,),
        in_specs=[pl.BlockSpec((tm, D), lambda i: (i, 0)),
                  pl.BlockSpec((1, D), lambda i: (0, 0)),
                  pl.BlockSpec((1, D), lambda i: (0, 0))],
        out_specs=pl.BlockSpec((tm, D), lambda i: (i, 0)),
        compiler_params=pltpu.CompilerParams(
            dimension_semantics=("parallel",),
            vmem_limit_bytes=VMEM_LIMIT),
    )(x, gamma.reshape(1, D).astype(jnp.float32),
      beta.reshape(1, D).astype(jnp.float32))


# ----------------------------------------------------------------------------
# Fused LayerNorm + packed QKV projection (two outputs: scaled Q, packed KV)
# ----------------------------------------------------------------------------
def _ln_qkv_kernel(x_ref, g_ref, bln_ref, w_ref, b_ref, q_ref, kv_ref, *,
                   scale, d_model):
    x = x_ref[...].astype(jnp.float32)
    xn = _ln(x, g_ref[...], bln_ref[...])
    y = jnp.dot(xn.astype(jnp.bfloat16), w_ref[...],
                preferred_element_type=jnp.float32) + b_ref[...]
    # 1/sqrt(dk) folded into Q here (removes per-head scale in attention).
    q_ref[...] = (y[:, :d_model] * scale).astype(q_ref.dtype)
    kv_ref[...] = y[:, d_model:].astype(kv_ref.dtype)


def pallas_ln_qkv(x, ln_g, ln_b, w, b, scale, tm=256):
    x = x.astype(jnp.bfloat16)
    M, D = x.shape
    N = w.shape[1]                       # 3*D
    tm = _tile(M, tm, 8)
    q, kv = pl.pallas_call(
        functools.partial(_ln_qkv_kernel, scale=scale, d_model=D),
        out_shape=(jax.ShapeDtypeStruct((M, D), jnp.bfloat16),
                   jax.ShapeDtypeStruct((M, N - D), jnp.bfloat16)),
        grid=(M // tm,),
        in_specs=[pl.BlockSpec((tm, D), lambda i: (i, 0)),
                  pl.BlockSpec((1, D), lambda i: (0, 0)),
                  pl.BlockSpec((1, D), lambda i: (0, 0)),
                  pl.BlockSpec((D, N), lambda i: (0, 0)),
                  pl.BlockSpec((1, N), lambda i: (0, 0))],
        out_specs=(pl.BlockSpec((tm, D), lambda i: (i, 0)),
                   pl.BlockSpec((tm, N - D), lambda i: (i, 0))),
        compiler_params=pltpu.CompilerParams(
            dimension_semantics=("parallel",),
            vmem_limit_bytes=VMEM_LIMIT),
    )(x, ln_g.reshape(1, D).astype(jnp.float32),
      ln_b.reshape(1, D).astype(jnp.float32),
      w.astype(jnp.bfloat16), b.reshape(1, N).astype(jnp.float32))
    return q, kv


# ----------------------------------------------------------------------------
# Fused LayerNorm + single linear (cross-attention Q path, scale folded in)
# ----------------------------------------------------------------------------
def _ln_linear_kernel(x_ref, g_ref, bln_ref, w_ref, b_ref, o_ref, *, scale):
    x = x_ref[...].astype(jnp.float32)
    xn = _ln(x, g_ref[...], bln_ref[...])
    y = jnp.dot(xn.astype(jnp.bfloat16), w_ref[...],
                preferred_element_type=jnp.float32) + b_ref[...]
    o_ref[...] = (y * scale).astype(o_ref.dtype)


def pallas_ln_linear(x, ln_g, ln_b, w, b, scale=1.0, tm=256):
    x = x.astype(jnp.bfloat16)
    M, D = x.shape
    N = w.shape[1]
    tm = _tile(M, tm, 8)
    return pl.pallas_call(
        functools.partial(_ln_linear_kernel, scale=scale),
        out_shape=jax.ShapeDtypeStruct((M, N), jnp.bfloat16),
        grid=(M // tm,),
        in_specs=[pl.BlockSpec((tm, D), lambda i: (i, 0)),
                  pl.BlockSpec((1, D), lambda i: (0, 0)),
                  pl.BlockSpec((1, D), lambda i: (0, 0)),
                  pl.BlockSpec((D, N), lambda i: (0, 0)),
                  pl.BlockSpec((1, N), lambda i: (0, 0))],
        out_specs=pl.BlockSpec((tm, N), lambda i: (i, 0)),
        compiler_params=pltpu.CompilerParams(
            dimension_semantics=("parallel",),
            vmem_limit_bytes=VMEM_LIMIT),
    )(x, ln_g.reshape(1, D).astype(jnp.float32),
      ln_b.reshape(1, D).astype(jnp.float32),
      w.astype(jnp.bfloat16), b.reshape(1, N).astype(jnp.float32))


# ----------------------------------------------------------------------------
# Fused position-wise FFN with FF-dim tiling:
#   out = x + W2(ReLU(W1(LN(x)) + b1)) + b2
# ----------------------------------------------------------------------------
def _ffn_kernel(x_ref, g_ref, bln_ref, w1_ref, b1_ref, w2_ref, b2_ref, o_ref,
                xn_ref, acc_ref):
    f = pl.program_id(1)

    @pl.when(f == 0)
    def _():
        x = x_ref[...].astype(jnp.float32)
        xn_ref[...] = _ln(x, g_ref[...], bln_ref[...]).astype(jnp.bfloat16)
        acc_ref[...] = jnp.zeros_like(acc_ref)

    h = jnp.dot(xn_ref[...], w1_ref[...],
                preferred_element_type=jnp.float32) + b1_ref[...]
    h = jnp.maximum(h, 0.0)
    acc_ref[...] += jnp.dot(h.astype(jnp.bfloat16), w2_ref[...],
                            preferred_element_type=jnp.float32)

    @pl.when(f == pl.num_programs(1) - 1)
    def _():
        y = acc_ref[...] + b2_ref[...] + x_ref[...].astype(jnp.float32)
        o_ref[...] = y.astype(o_ref.dtype)


def pallas_ffn(x, p, tm=256, tf=512):
    x = x.astype(jnp.bfloat16)
    M, D = x.shape
    FF = p["w1"].shape[1]
    tm = _tile(M, tm, 8)
    tf = _tile(FF, tf, 128)
    return pl.pallas_call(
        _ffn_kernel,
        out_shape=jax.ShapeDtypeStruct((M, D), jnp.bfloat16),
        grid=(M // tm, FF // tf),
        in_specs=[pl.BlockSpec((tm, D), lambda i, f: (i, 0)),
                  pl.BlockSpec((1, D), lambda i, f: (0, 0)),
                  pl.BlockSpec((1, D), lambda i, f: (0, 0)),
                  pl.BlockSpec((D, tf), lambda i, f: (0, f)),
                  pl.BlockSpec((1, tf), lambda i, f: (0, f)),
                  pl.BlockSpec((tf, D), lambda i, f: (f, 0)),
                  pl.BlockSpec((1, D), lambda i, f: (0, 0))],
        out_specs=pl.BlockSpec((tm, D), lambda i, f: (i, 0)),
        scratch_shapes=[pltpu.VMEM((tm, D), jnp.bfloat16),
                        pltpu.VMEM((tm, D), jnp.float32)],
        compiler_params=pltpu.CompilerParams(
            dimension_semantics=("parallel", "arbitrary"),
            vmem_limit_bytes=VMEM_LIMIT),
    )(x, p["ln_g"].reshape(1, D).astype(jnp.float32),
      p["ln_b"].reshape(1, D).astype(jnp.float32),
      p["w1"].astype(jnp.bfloat16),
      p["b1"].reshape(1, FF).astype(jnp.float32),
      p["w2"].astype(jnp.bfloat16),
      p["b2"].reshape(1, D).astype(jnp.float32))


# ----------------------------------------------------------------------------
# Attention, q-tiled (grid=(B, Tq//tq)), mask built in-kernel from lengths,
# single lane-dense output store per grid step.  Q is pre-scaled by 1/sqrt(dk).
# ----------------------------------------------------------------------------
def _attention_kernel(len_ref, q_ref, kv_ref, o_ref, *, num_heads, causal):
    tq = o_ref.shape[1]
    D = o_ref.shape[2]
    Tk = kv_ref.shape[1]
    dk = D // num_heads
    b = pl.program_id(0)
    qi = pl.program_id(1)

    klen = len_ref[b]
    kpos = lax.broadcasted_iota(jnp.int32, (tq, Tk), 1)
    valid = kpos < klen
    if causal:
        qpos = qi * tq + lax.broadcasted_iota(jnp.int32, (tq, Tk), 0)
        valid = jnp.logical_and(valid, kpos <= qpos)
    bias = jnp.where(valid, 0.0, NEG_INF)          # additive mask, built once

    q = q_ref[0]            # (tq, D)  bf16, already scaled
    kv = kv_ref[0]          # (Tk, 2D) bf16
    outs = []
    for h in range(num_heads):
        qh = q[:, h * dk:(h + 1) * dk]
        kh = kv[:, h * dk:(h + 1) * dk]
        vh = kv[:, D + h * dk:D + (h + 1) * dk]
        s = lax.dot_general(qh, kh, (((1,), (1,)), ((), ())),
                            preferred_element_type=jnp.float32)
        s = s + bias
        s = s - jnp.max(s, axis=-1, keepdims=True)
        p = jnp.exp(s)
        p = p * pl.reciprocal(jnp.sum(p, axis=-1, keepdims=True), approx=True)
        outs.append(jnp.dot(p.astype(jnp.bfloat16), vh,
                            preferred_element_type=jnp.float32))
    # single lane-dense store of all heads
    o_ref[0] = jnp.concatenate(outs, axis=-1).astype(o_ref.dtype)


def pallas_attention(q, kv, lengths, num_heads, causal, tq=128):
    q = q.astype(jnp.bfloat16)
    kv = kv.astype(jnp.bfloat16)
    B, Tq, D = q.shape
    Tk, D2 = kv.shape[1], kv.shape[2]
    tq = _tile(Tq, tq, 8)
    return pl.pallas_call(
        functools.partial(_attention_kernel, num_heads=num_heads,
                          causal=causal),
        out_shape=jax.ShapeDtypeStruct((B, Tq, D), jnp.bfloat16),
        grid_spec=pltpu.PrefetchScalarGridSpec(
            num_scalar_prefetch=1,
            grid=(B, Tq // tq),
            in_specs=[pl.BlockSpec((1, tq, D), lambda b, i, lens: (b, i, 0)),
                      pl.BlockSpec((1, Tk, D2), lambda b, i, lens: (b, 0, 0))],
            out_specs=pl.BlockSpec((1, tq, D), lambda b, i, lens: (b, i, 0))),
        compiler_params=pltpu.CompilerParams(
            dimension_semantics=("parallel", "parallel"),
            vmem_limit_bytes=VMEM_LIMIT),
    )(lengths.astype(jnp.int32), q, kv)


# ----------------------------------------------------------------------------
# Fused final decoder LayerNorm + tied output projection
#   logits = LN(x) @ emb_tgt^T     (emb pre-transposed once to bf16 (D, V))
# ----------------------------------------------------------------------------
def _ln_proj_kernel(x_ref, g_ref, b_ref, wt_ref, o_ref):
    x = x_ref[...].astype(jnp.float32)
    xn = _ln(x, g_ref[...], b_ref[...])
    o_ref[...] = jnp.dot(xn.astype(jnp.bfloat16), wt_ref[...],
                         preferred_element_type=jnp.float32)


def pallas_ln_tied_proj(x, ln_g, ln_b, emb, tm=512, tv=512):
    x = x.astype(jnp.bfloat16)
    M, D = x.shape
    V = emb.shape[0]
    wt = emb.astype(jnp.bfloat16).T        # one-time (V, D) -> (D, V)
    tm = _tile(M, tm, 8)
    tv = _tile(V, tv, 128)
    return pl.pallas_call(
        _ln_proj_kernel,
        out_shape=jax.ShapeDtypeStruct((M, V), jnp.float32),
        grid=(M // tm, V // tv),
        in_specs=[pl.BlockSpec((tm, D), lambda i, j: (i, 0)),
                  pl.BlockSpec((1, D), lambda i, j: (0, 0)),
                  pl.BlockSpec((1, D), lambda i, j: (0, 0)),
                  pl.BlockSpec((D, tv), lambda i, j: (0, j))],
        out_specs=pl.BlockSpec((tm, tv), lambda i, j: (i, j)),
        compiler_params=pltpu.CompilerParams(
            dimension_semantics=("parallel", "parallel"),
            vmem_limit_bytes=VMEM_LIMIT),
    )(x, ln_g.reshape(1, D).astype(jnp.float32),
      ln_b.reshape(1, D).astype(jnp.float32), wt)


# ----------------------------------------------------------------------------
# Model building blocks (JAX orchestration over Pallas kernels)
# ----------------------------------------------------------------------------
def positional_encoding(length, dim):
    position = jnp.arange(length, dtype=jnp.float32)[:, None]
    div_term = jnp.exp(jnp.arange(0, dim, 2, dtype=jnp.float32)
                       * -(math.log(10000.0) / dim))
    pe = jnp.zeros((length, dim), jnp.float32)
    pe = pe.at[:, 0::2].set(jnp.sin(position * div_term))
    pe = pe.at[:, 1::2].set(jnp.cos(position * div_term))
    return pe


def encoder_layer(p, x, x_len, num_heads):
    B, S, D = x.shape
    scale = 1.0 / math.sqrt(D // num_heads)
    x2 = x.reshape(B * S, D)
    # pre-norm self-attention: fused LN + packed QKV projection (Q pre-scaled)
    q, kv = pallas_ln_qkv(x2, p["att_ln_g"], p["att_ln_b"],
                          p["att"]["wqkv"], p["att"]["bqkv"], scale)
    ctx = pallas_attention(q.reshape(B, S, D), kv.reshape(B, S, 2 * D),
                           x_len, num_heads, causal=False)
    h = pallas_linear(ctx.reshape(B * S, D), p["att"]["wo"], p["att"]["bo"],
                      residual=x2)
    # pre-norm FFN with residual, FF-tiled, fully fused
    return pallas_ffn(h, p["ff"]).reshape(B, S, D)


def decoder_layer(p, x, memory, x_len, y_len, num_heads):
    B, T, D = x.shape
    S = memory.shape[1]
    scale = 1.0 / math.sqrt(D // num_heads)
    x2 = x.reshape(B * T, D)

    # masked self-attention (pre-norm, fused LN+QKV, Q pre-scaled)
    q, kv = pallas_ln_qkv(x2, p["x_ln_g"], p["x_ln_b"],
                          p["self_att"]["wqkv"], p["self_att"]["bqkv"], scale)
    ctx = pallas_attention(q.reshape(B, T, D), kv.reshape(B, T, 2 * D),
                           y_len, num_heads, causal=True)
    h1 = pallas_linear(ctx.reshape(B * T, D), p["self_att"]["wo"],
                       p["self_att"]["bo"], residual=x2)

    # cross-attention over encoder memory (LN on query path only)
    q2 = pallas_ln_linear(h1, p["dec_ln_g"], p["dec_ln_b"],
                          p["src_att"]["wq"], p["src_att"]["bq"], scale=scale)
    kv2 = pallas_linear(memory.reshape(B * S, D), p["src_att"]["wkv"],
                        p["src_att"]["bkv"])
    ctx2 = pallas_attention(q2.reshape(B, T, D), kv2.reshape(B, S, 2 * D),
                            x_len, num_heads, causal=False)
    h2 = pallas_linear(ctx2.reshape(B * T, D), p["src_att"]["wo"],
                       p["src_att"]["bo"], residual=h1)

    # pre-norm FFN with residual, FF-tiled, fully fused
    return pallas_ffn(h2, p["ff"]).reshape(B, T, D)


def encode(params, x_ids, x_len, num_heads):
    B, S = x_ids.shape
    D = params["emb_src"].shape[1]
    emb = params["emb_src"][x_ids] * math.sqrt(D)          # Embed(scale=True)
    h = (emb + positional_encoding(S, D)[None]).astype(jnp.bfloat16)
    for lp in params["enc_layers"]:
        h = encoder_layer(lp, h, x_len, num_heads)
    memory = pallas_layernorm(h.reshape(B * S, D),
                              params["enc_ln_g"],
                              params["enc_ln_b"]).reshape(B, S, D)
    return memory


def decode(params, y_ids, memory, x_len, y_len, num_heads):
    B, T = y_ids.shape
    D = params["emb_tgt"].shape[1]
    V = params["emb_tgt"].shape[0]
    emb = params["emb_tgt"][y_ids] * math.sqrt(D)
    h = (emb + positional_encoding(T, D)[None]).astype(jnp.bfloat16)
    for lp in params["dec_layers"]:
        h = decoder_layer(lp, h, memory, x_len, y_len, num_heads)
    # final LN fused into the tied vocab projection (logits f32)
    logits = pallas_ln_tied_proj(h.reshape(B * T, D),
                                 params["dec_ln_g"], params["dec_ln_b"],
                                 params["emb_tgt"])
    return logits.reshape(B, T, V)


def seq2seq_transformer_forward(params, x, y, x_len, y_len, num_heads):
    enc, dec = {}, {}
    memory = encode(params, x, x_len, num_heads)
    enc["memory"] = memory
    dec["logits"] = decode(params, y, memory, x_len, y_len, num_heads)
    return enc, dec

# TODO(synk): translate()/beam() (autoregressive greedy & beam search loops)
# are inference-time drivers around decode(); not part of forward(), omitted.


# ----------------------------------------------------------------------------
# Deterministic parameter init (matmul weights stored in bfloat16)
# ----------------------------------------------------------------------------
def init_params(key, src_vocab, trg_vocab, D, FF, L):
    keys = iter(jax.random.split(key, 2 + 16 * L + 4))
    nxt = lambda: next(keys)
    dense = lambda shape: (0.02 * jax.random.normal(nxt(), shape)
                           ).astype(jnp.bfloat16)
    emb_init = lambda shape: (0.02 * jax.random.normal(nxt(), shape)
                              ).astype(jnp.float32)
    zeros = lambda n: jnp.zeros((n,), jnp.float32)
    ones = lambda n: jnp.ones((n,), jnp.float32)

    def self_att():
        return {"wqkv": dense((D, 3 * D)), "bqkv": zeros(3 * D),
                "wo": dense((D, D)), "bo": zeros(D)}

    def cross_att():
        return {"wq": dense((D, D)), "bq": zeros(D),
                "wkv": dense((D, 2 * D)), "bkv": zeros(2 * D),
                "wo": dense((D, D)), "bo": zeros(D)}

    def ff():
        return {"ln_g": ones(D), "ln_b": zeros(D),
                "w1": dense((D, FF)), "b1": zeros(FF),
                "w2": dense((FF, D)), "b2": zeros(D)}

    params = {
        # padding_idx=0 rows zeroed (as PyTorch does at init)
        "emb_src": emb_init((src_vocab, D)).at[0].set(0.0),
        "emb_tgt": emb_init((trg_vocab, D)).at[0].set(0.0),
    }
    params["enc_layers"] = [{"att_ln_g": ones(D), "att_ln_b": zeros(D),
                             "att": self_att(), "ff": ff()}
                            for _ in range(L)]
    params["enc_ln_g"], params["enc_ln_b"] = ones(D), zeros(D)
    params["dec_layers"] = [{"x_ln_g": ones(D), "x_ln_b": zeros(D),
                             "dec_ln_g": ones(D), "dec_ln_b": zeros(D),
                             "self_att": self_att(), "src_att": cross_att(),
                             "ff": ff()}
                            for _ in range(L)]
    params["dec_ln_g"], params["dec_ln_b"] = ones(D), zeros(D)
    # output_layer weight is tied to emb_tgt (tie_projections=True)
    return params


# ----------------------------------------------------------------------------
# Example run
# ----------------------------------------------------------------------------
if __name__ == "__main__":
    B, S, T = 2, 8, 8
    SRC_VOCAB, TRG_VOCAB = 50, 60
    EMB, NHEAD, NHID, NLAYERS = 32, 4, 64, 2

    root = jax.random.PRNGKey(0)
    kp, kx, ky = jax.random.split(root, 3)
    params = init_params(kp, SRC_VOCAB, TRG_VOCAB, EMB, NHID, NLAYERS)

    x = jax.random.randint(kx, (B, S), 1, SRC_VOCAB, dtype=jnp.int32)
    y = jax.random.randint(ky, (B, T), 1, TRG_VOCAB, dtype=jnp.int32)
    x_len = jnp.array([S, 5], dtype=jnp.int32)
    y_len = jnp.array([7, T], dtype=jnp.int32)

    fwd = jax.jit(functools.partial(seq2seq_transformer_forward,
                                    num_heads=NHEAD))
    enc, dec = fwd(params, x, y, x_len, y_len)
    jax.block_until_ready(dec["logits"])
    jax.block_until_ready(enc["memory"])
    assert enc["memory"].shape == (B, S, EMB)
    assert dec["logits"].shape == (B, T, TRG_VOCAB)
    assert bool(jnp.all(jnp.isfinite(dec["logits"])))
    assert bool(jnp.all(jnp.isfinite(enc["memory"].astype(jnp.float32))))
    print("KERNEL_OK")
</pallas_src>

<mosaic_0001>
module attributes {stable_mosaic.version = 11 : i64} {
  func.func @_attention_kernel(%arg0: i32, %arg1: i32, %arg2: memref<2xi32, #tpu.memory_space<smem>>, %arg3: memref<1x8x32xbf16, #tpu.memory_space<vmem>>, %arg4: memref<1x8x64xbf16, #tpu.memory_space<vmem>>, %arg5: memref<1x8x32xbf16, #tpu.memory_space<vmem>>) attributes {dimension_semantics = [#tpu.dimension_semantics<parallel>, #tpu.dimension_semantics<parallel>], iteration_bounds = array<i64: 2, 1>, scalar_prefetch = 1 : i64, scratch_operands = 0 : i64, tpu.core_type = #tpu.core_type<tc>, window_params = [{transform_indices = @transform_0, window_bounds = array<i64: 1, 8, 32>}, {transform_indices = @transform_1, window_bounds = array<i64: 1, 8, 64>}, {transform_indices = @transform_2, window_bounds = array<i64: 1, 8, 32>}]} {
    %0 = arith.index_cast %arg0 : i32 to index
    %1 = memref.load %arg2[%0] : memref<2xi32, #tpu.memory_space<smem>>
    %2 = tpu.iota {dimensions = array<i32: 1>} : vector<8x8xi32>
    %3 = vector.broadcast %1 : i32 to vector<8x8xi32>
    %4 = arith.cmpi slt, %2, %3 : vector<8x8xi32>
    %cst = arith.constant 0.000000e+00 : f32
    %cst_0 = arith.constant -1.000000e+30 : f32
    %5 = vector.broadcast %cst : f32 to vector<8x8xf32>
    %6 = vector.broadcast %cst_0 : f32 to vector<8x8xf32>
    %7 = arith.select %4, %5, %6 : vector<8x8xi1>, vector<8x8xf32>
    %c0 = arith.constant 0 : index
    %c0_1 = arith.constant 0 : index
    %c0_2 = arith.constant 0 : index
    %8 = vector.load %arg3[%c0, %c0_1, %c0_2] : memref<1x8x32xbf16, #tpu.memory_space<vmem>>, vector<1x8x32xbf16>
    %9 = vector.shape_cast %8 : vector<1x8x32xbf16> to vector<8x32xbf16>
    %c0_3 = arith.constant 0 : index
    %c0_4 = arith.constant 0 : index
    %c0_5 = arith.constant 0 : index
    %10 = vector.load %arg4[%c0_3, %c0_4, %c0_5] : memref<1x8x64xbf16, #tpu.memory_space<vmem>>, vector<1x8x64xbf16>
    %11 = vector.shape_cast %10 : vector<1x8x64xbf16> to vector<8x64xbf16>
    %12 = vector.extract_strided_slice %9 {offsets = [0, 0], sizes = [8, 8], strides = [1, 1]} : vector<8x32xbf16> to vector<8x8xbf16>
    %13 = vector.extract_strided_slice %11 {offsets = [0, 0], sizes = [8, 8], strides = [1, 1]} : vector<8x64xbf16> to vector<8x8xbf16>
    %14 = vector.extract_strided_slice %11 {offsets = [0, 32], sizes = [8, 8], strides = [1, 1]} : vector<8x64xbf16> to vector<8x8xbf16>
    %cst_6 = arith.constant dense<0.000000e+00> : vector<8x8xf32>
    %15 = tpu.matmul %12, %13, %cst_6 {dimension_numbers = #tpu.dot_dimension_numbers<[1], [1], [0], [0], [0, 0, 1, 0], [], []>} : vector<8x8xbf16>, vector<8x8xbf16>, vector<8x8xf32> -> vector<8x8xf32>
    %16 = arith.addf %15, %7 : vector<8x8xf32>
    %cst_7 = arith.constant dense<0xFF800000> : vector<8xf32>
    %17 = vector.multi_reduction <maximumf>, %16, %cst_7 [1] : vector<8x8xf32> to vector<8xf32>
    %18 = vector.shape_cast %17 : vector<8xf32> to vector<8x1xf32>
    %19 = vector.broadcast %18 : vector<8x1xf32> to vector<8x8xf32>
    %20 = arith.subf %16, %19 : vector<8x8xf32>
    %21 = math.exp %20 : vector<8x8xf32>
    %cst_8 = arith.constant dense<0.000000e+00> : vector<8xf32>
    %22 = vector.multi_reduction <add>, %21, %cst_8 [1] : vector<8x8xf32> to vector<8xf32>
    %23 = vector.shape_cast %22 : vector<8xf32> to vector<8x1xf32>
    %24 = tpu.reciprocal %23 {approx = true} : vector<8x1xf32> -> vector<8x1xf32>
    %25 = vector.broadcast %24 : vector<8x1xf32> to vector<8x8xf32>
    %26 = arith.mulf %21, %25 : vector<8x8xf32>
    %27 = arith.truncf %26 : vector<8x8xf32> to vector<8x8xbf16>
    %cst_9 = arith.constant dense<0.000000e+00> : vector<8x8xf32>
    %28 = tpu.matmul %27, %14, %cst_9 {dimension_numbers = #tpu.dot_dimension_numbers<[1], [0], [0], [1], [0, 0, 1, 1], [], []>} : vector<8x8xbf16>, vector<8x8xbf16>, vector<8x8xf32> -> vector<8x8xf32>
    %29 = vector.extract_strided_slice %9 {offsets = [0, 8], sizes = [8, 8], strides = [1, 1]} : vector<8x32xbf16> to vector<8x8xbf16>
    %30 = vector.extract_strided_slice %11 {offsets = [0, 8], sizes = [8, 8], strides = [1, 1]} : vector<8x64xbf16> to vector<8x8xbf16>
    %31 = vector.extract_strided_slice %11 {offsets = [0, 40], sizes = [8, 8], strides = [1, 1]} : vector<8x64xbf16> to vector<8x8xbf16>
    %cst_10 = arith.constant dense<0.000000e+00> : vector<8x8xf32>
    %32 = tpu.matmul %29, %30, %cst_10 {dimension_numbers = #tpu.dot_dimension_numbers<[1], [1], [0], [0], [0, 0, 1, 0], [], []>} : vector<8x8xbf16>, vector<8x8xbf16>, vector<8x8xf32> -> vector<8x8xf32>
    %33 = arith.addf %32, %7 : vector<8x8xf32>
    %cst_11 = arith.constant dense<0xFF800000> : vector<8xf32>
    %34 = vector.multi_reduction <maximumf>, %33, %cst_11 [1] : vector<8x8xf32> to vector<8xf32>
    %35 = vector.shape_cast %34 : vector<8xf32> to vector<8x1xf32>
    %36 = vector.broadcast %35 : vector<8x1xf32> to vector<8x8xf32>
    %37 = arith.subf %33, %36 : vector<8x8xf32>
    %38 = math.exp %37 : vector<8x8xf32>
    %cst_12 = arith.constant dense<0.000000e+00> : vector<8xf32>
    %39 = vector.multi_reduction <add>, %38, %cst_12 [1] : vector<8x8xf32> to vector<8xf32>
    %40 = vector.shape_cast %39 : vector<8xf32> to vector<8x1xf32>
    %41 = tpu.reciprocal %40 {approx = true} : vector<8x1xf32> -> vector<8x1xf32>
    %42 = vector.broadcast %41 : vector<8x1xf32> to vector<8x8xf32>
    %43 = arith.mulf %38, %42 : vector<8x8xf32>
    %44 = arith.truncf %43 : vector<8x8xf32> to vector<8x8xbf16>
    %cst_13 = arith.constant dense<0.000000e+00> : vector<8x8xf32>
    %45 = tpu.matmul %44, %31, %cst_13 {dimension_numbers = #tpu.dot_dimension_numbers<[1], [0], [0], [1], [0, 0, 1, 1], [], []>} : vector<8x8xbf16>, vector<8x8xbf16>, vector<8x8xf32> -> vector<8x8xf32>
    %46 = vector.extract_strided_slice %9 {offsets = [0, 16], sizes = [8, 8], strides = [1, 1]} : vector<8x32xbf16> to vector<8x8xbf16>
    %47 = vector.extract_strided_slice %11 {offsets = [0, 16], sizes = [8, 8], strides = [1, 1]} : vector<8x64xbf16> to vector<8x8xbf16>
    %48 = vector.extract_strided_slice %11 {offsets = [0, 48], sizes = [8, 8], strides = [1, 1]} : vector<8x64xbf16> to vector<8x8xbf16>
    %cst_14 = arith.constant dense<0.000000e+00> : vector<8x8xf32>
    %49 = tpu.matmul %46, %47, %cst_14 {dimension_numbers = #tpu.dot_dimension_numbers<[1], [1], [0], [0], [0, 0, 1, 0], [], []>} : vector<8x8xbf16>, vector<8x8xbf16>, vector<8x8xf32> -> vector<8x8xf32>
    %50 = arith.addf %49, %7 : vector<8x8xf32>
    %cst_15 = arith.constant dense<0xFF800000> : vector<8xf32>
    %51 = vector.multi_reduction <maximumf>, %50, %cst_15 [1] : vector<8x8xf32> to vector<8xf32>
    %52 = vector.shape_cast %51 : vector<8xf32> to vector<8x1xf32>
    %53 = vector.broadcast %52 : vector<8x1xf32> to vector<8x8xf32>
    %54 = arith.subf %50, %53 : vector<8x8xf32>
    %55 = math.exp %54 : vector<8x8xf32>
    %cst_16 = arith.constant dense<0.000000e+00> : vector<8xf32>
    %56 = vector.multi_reduction <add>, %55, %cst_16 [1] : vector<8x8xf32> to vector<8xf32>
    %57 = vector.shape_cast %56 : vector<8xf32> to vector<8x1xf32>
    %58 = tpu.reciprocal %57 {approx = true} : vector<8x1xf32> -> vector<8x1xf32>
    %59 = vector.broadcast %58 : vector<8x1xf32> to vector<8x8xf32>
    %60 = arith.mulf %55, %59 : vector<8x8xf32>
    %61 = arith.truncf %60 : vector<8x8xf32> to vector<8x8xbf16>
    %cst_17 = arith.constant dense<0.000000e+00> : vector<8x8xf32>
    %62 = tpu.matmul %61, %48, %cst_17 {dimension_numbers = #tpu.dot_dimension_numbers<[1], [0], [0], [1], [0, 0, 1, 1], [], []>} : vector<8x8xbf16>, vector<8x8xbf16>, vector<8x8xf32> -> vector<8x8xf32>
    %63 = vector.extract_strided_slice %9 {offsets = [0, 24], sizes = [8, 8], strides = [1, 1]} : vector<8x32xbf16> to vector<8x8xbf16>
    %64 = vector.extract_strided_slice %11 {offsets = [0, 24], sizes = [8, 8], strides = [1, 1]} : vector<8x64xbf16> to vector<8x8xbf16>
    %65 = vector.extract_strided_slice %11 {offsets = [0, 56], sizes = [8, 8], strides = [1, 1]} : vector<8x64xbf16> to vector<8x8xbf16>
    %cst_18 = arith.constant dense<0.000000e+00> : vector<8x8xf32>
    %66 = tpu.matmul %63, %64, %cst_18 {dimension_numbers = #tpu.dot_dimension_numbers<[1], [1], [0], [0], [0, 0, 1, 0], [], []>} : vector<8x8xbf16>, vector<8x8xbf16>, vector<8x8xf32> -> vector<8x8xf32>
    %67 = arith.addf %66, %7 : vector<8x8xf32>
    %cst_19 = arith.constant dense<0xFF800000> : vector<8xf32>
    %68 = vector.multi_reduction <maximumf>, %67, %cst_19 [1] : vector<8x8xf32> to vector<8xf32>
    %69 = vector.shape_cast %68 : vector<8xf32> to vector<8x1xf32>
    %70 = vector.broadcast %69 : vector<8x1xf32> to vector<8x8xf32>
    %71 = arith.subf %67, %70 : vector<8x8xf32>
    %72 = math.exp %71 : vector<8x8xf32>
    %cst_20 = arith.constant dense<0.000000e+00> : vector<8xf32>
    %73 = vector.multi_reduction <add>, %72, %cst_20 [1] : vector<8x8xf32> to vector<8xf32>
    %74 = vector.shape_cast %73 : vector<8xf32> to vector<8x1xf32>
    %75 = tpu.reciprocal %74 {approx = true} : vector<8x1xf32> -> vector<8x1xf32>
    %76 = vector.broadcast %75 : vector<8x1xf32> to vector<8x8xf32>
    %77 = arith.mulf %72, %76 : vector<8x8xf32>
    %78 = arith.truncf %77 : vector<8x8xf32> to vector<8x8xbf16>
    %cst_21 = arith.constant dense<0.000000e+00> : vector<8x8xf32>
    %79 = tpu.matmul %78, %65, %cst_21 {dimension_numbers = #tpu.dot_dimension_numbers<[1], [0], [0], [1], [0, 0, 1, 1], [], []>} : vector<8x8xbf16>, vector<8x8xbf16>, vector<8x8xf32> -> vector<8x8xf32>
    %80 = tpu.concatenate %28, %45, %62, %79 in 1 : vector<8x8xf32>, vector<8x8xf32>, vector<8x8xf32>, vector<8x8xf32> -> vector<8x32xf32>
    %81 = arith.truncf %80 : vector<8x32xf32> to vector<8x32xbf16>
    %c0_22 = arith.constant 0 : index
    %c0_23 = arith.constant 0 : index
    %c0_24 = arith.constant 0 : index
    %82 = vector.load %arg5[%c0_22, %c0_23, %c0_24] : memref<1x8x32xbf16, #tpu.memory_space<vmem>>, vector<1x8x32xbf16>
    %83 = vector.shape_cast %82 : vector<1x8x32xbf16> to vector<8x32xbf16>
    %84 = vector.shape_cast %81 : vector<8x32xbf16> to vector<1x8x32xbf16>
    tpu.vector_store %arg5[%c0_22, %c0_23, %c0_24], %84 {strides = array<i32>} : memref<1x8x32xbf16, #tpu.memory_space<vmem>>, vector<1x8x32xbf16>,
    return
  }
  func.func @transform_0(%arg0: i32, %arg1: i32, %arg2: memref<2xi32, #tpu.memory_space<smem>>) -> (i32, i32, i32) {
    %c0_i32 = arith.constant 0 : i32
    %c0_i32_0 = arith.constant 0 : i32
    return %arg0, %arg1, %c0_i32 : i32, i32, i32
  }
  func.func @transform_1(%arg0: i32, %arg1: i32, %arg2: memref<2xi32, #tpu.memory_space<smem>>) -> (i32, i32, i32) {
    %c0_i32 = arith.constant 0 : i32
    %c0_i32_0 = arith.constant 0 : i32
    %c0_i32_1 = arith.constant 0 : i32
    return %arg0, %c0_i32, %c0_i32_0 : i32, i32, i32
  }
  func.func @transform_2(%arg0: i32, %arg1: i32, %arg2: memref<2xi32, #tpu.memory_space<smem>>) -> (i32, i32, i32) {
    %c0_i32 = arith.constant 0 : i32
    %c0_i32_0 = arith.constant 0 : i32
    return %arg0, %arg1, %c0_i32 : i32, i32, i32
  }
}

module attributes {stable_mosaic.version = 11 : i64} {
  func.func @_ln_qkv_kernel(%arg0: i32, %arg1: memref<16x32xbf16, #tpu.memory_space<vmem>>, %arg2: memref<1x32xf32, #tpu.memory_space<vmem>>, %arg3: memref<1x32xf32, #tpu.memory_space<vmem>>, %arg4: memref<32x96xbf16, #tpu.memory_space<vmem>>, %arg5: memref<1x96xf32, #tpu.memory_space<vmem>>, %arg6: memref<16x32xbf16, #tpu.memory_space<vmem>>, %arg7: memref<16x64xbf16, #tpu.memory_space<vmem>>) attributes {dimension_semantics = [#tpu.dimension_semantics<parallel>], iteration_bounds = array<i64: 1>, scalar_prefetch = 0 : i64, scratch_operands = 0 : i64, tpu.core_type = #tpu.core_type<tc>, window_params = [{transform_indices = @transform_0, window_bounds = array<i64: 16, 32>}, {pipeline_mode = #tpu.pipeline_mode<synchronous>, transform_indices = @transform_1, window_bounds = array<i64: 1, 32>}, {pipeline_mode = #tpu.pipeline_mode<synchronous>, transform_indices = @transform_2, window_bounds = array<i64: 1, 32>}, {pipeline_mode = #tpu.pipeline_mode<synchronous>, transform_indices = @transform_3, window_bounds = array<i64: 32, 96>}, {pipeline_mode = #tpu.pipeline_mode<synchronous>, transform_indices = @transform_4, window_bounds = array<i64: 1, 96>}, {transform_indices = @transform_5, window_bounds = array<i64: 16, 32>}, {transform_indices = @transform_6, window_bounds = array<i64: 16, 64>}]} {
    %c0 = arith.constant 0 : index
    %c0_0 = arith.constant 0 : index
    %0 = vector.load %arg1[%c0, %c0_0] : memref<16x32xbf16, #tpu.memory_space<vmem>>, vector<16x32xbf16>
    %1 = arith.extf %0 : vector<16x32xbf16> to vector<16x32xf32>
    %c0_1 = arith.constant 0 : index
    %c0_2 = arith.constant 0 : index
    %2 = vector.load %arg2[%c0_1, %c0_2] : memref<1x32xf32, #tpu.memory_space<vmem>>, vector<1x32xf32>
    %c0_3 = arith.constant 0 : index
    %c0_4 = arith.constant 0 : index
    %3 = vector.load %arg3[%c0_3, %c0_4] : memref<1x32xf32, #tpu.memory_space<vmem>>, vector<1x32xf32>
    %cst = arith.constant dense<0.000000e+00> : vector<16xf32>
    %4 = vector.multi_reduction <add>, %1, %cst [1] : vector<16x32xf32> to vector<16xf32>
    %5 = vector.shape_cast %4 : vector<16xf32> to vector<16x1xf32>
    %cst_5 = arith.constant 3.200000e+01 : f32
    %6 = vector.broadcast %cst_5 : f32 to vector<16x1xf32>
    %7 = arith.divf %5, %6 : vector<16x1xf32>
    %8 = vector.broadcast %7 : vector<16x1xf32> to vector<16x32xf32>
    %9 = arith.subf %1, %8 : vector<16x32xf32>
    %10 = arith.mulf %9, %9 : vector<16x32xf32>
    %cst_6 = arith.constant dense<0.000000e+00> : vector<16xf32>
    %11 = vector.multi_reduction <add>, %10, %cst_6 [1] : vector<16x32xf32> to vector<16xf32>
    %12 = vector.shape_cast %11 : vector<16xf32> to vector<16x1xf32>
    %cst_7 = arith.constant 3.200000e+01 : f32
    %13 = vector.broadcast %cst_7 : f32 to vector<16x1xf32>
    %14 = arith.divf %12, %13 : vector<16x1xf32>
    %15 = vector.broadcast %7 : vector<16x1xf32> to vector<16x32xf32>
    %16 = arith.subf %1, %15 : vector<16x32xf32>
    %cst_8 = arith.constant 9.99999997E-7 : f32
    %17 = vector.broadcast %cst_8 : f32 to vector<16x1xf32>
    %18 = arith.addf %14, %17 : vector<16x1xf32>
    %19 = math.rsqrt %18 : vector<16x1xf32>
    %20 = vector.broadcast %19 : vector<16x1xf32> to vector<16x32xf32>
    %21 = arith.mulf %16, %20 : vector<16x32xf32>
    %22 = vector.broadcast %2 : vector<1x32xf32> to vector<16x32xf32>
    %23 = arith.mulf %21, %22 : vector<16x32xf32>
    %24 = vector.broadcast %3 : vector<1x32xf32> to vector<16x32xf32>
    %25 = arith.addf %23, %24 : vector<16x32xf32>
    %26 = arith.truncf %25 : vector<16x32xf32> to vector<16x32xbf16>
    %c0_9 = arith.constant 0 : index
    %c0_10 = arith.constant 0 : index
    %27 = vector.load %arg4[%c0_9, %c0_10] : memref<32x96xbf16, #tpu.memory_space<vmem>>, vector<32x96xbf16>
    %cst_11 = arith.constant dense<0.000000e+00> : vector<16x96xf32>
    %28 = tpu.matmul %26, %27, %cst_11 {dimension_numbers = #tpu.dot_dimension_numbers<[1], [0], [0], [1], [0, 0, 1, 1], [], []>} : vector<16x32xbf16>, vector<32x96xbf16>, vector<16x96xf32> -> vector<16x96xf32>
    %c0_12 = arith.constant 0 : index
    %c0_13 = arith.constant 0 : index
    %29 = vector.load %arg5[%c0_12, %c0_13] : memref<1x96xf32, #tpu.memory_space<vmem>>, vector<1x96xf32>
    %30 = vector.broadcast %29 : vector<1x96xf32> to vector<16x96xf32>
    %31 = arith.addf %28, %30 : vector<16x96xf32>
    %32 = vector.extract_strided_slice %31 {offsets = [0, 0], sizes = [16, 32], strides = [1, 1]} : vector<16x96xf32> to vector<16x32xf32>
    %cst_14 = arith.constant 0.353553385 : f32
    %33 = vector.broadcast %cst_14 : f32 to vector<16x32xf32>
    %34 = arith.mulf %32, %33 : vector<16x32xf32>
    %35 = arith.truncf %34 : vector<16x32xf32> to vector<16x32xbf16>
    %c0_15 = arith.constant 0 : index
    %c0_16 = arith.constant 0 : index
    %36 = vector.load %arg6[%c0_15, %c0_16] : memref<16x32xbf16, #tpu.memory_space<vmem>>, vector<16x32xbf16>
    tpu.vector_store %arg6[%c0_15, %c0_16], %35 {strides = array<i32>} : memref<16x32xbf16, #tpu.memory_space<vmem>>, vector<16x32xbf16>,
    %37 = vector.extract_strided_slice %31 {offsets = [0, 32], sizes = [16, 64], strides = [1, 1]} : vector<16x96xf32> to vector<16x64xf32>
    %38 = arith.truncf %37 : vector<16x64xf32> to vector<16x64xbf16>
    %c0_17 = arith.constant 0 : index
    %c0_18 = arith.constant 0 : index
    %39 = vector.load %arg7[%c0_17, %c0_18] : memref<16x64xbf16, #tpu.memory_space<vmem>>, vector<16x64xbf16>
    tpu.vector_store %arg7[%c0_17, %c0_18], %38 {strides = array<i32>} : memref<16x64xbf16, #tpu.memory_space<vmem>>, vector<16x64xbf16>,
    return
  }
  func.func @transform_0(%arg0: i32) -> (i32, i32) {
    %c0_i32 = arith.constant 0 : i32
    %c0_i32_0 = arith.constant 0 : i32
    return %arg0, %c0_i32 : i32, i32
  }
  func.func @transform_1(%arg0: i32) -> (i32, i32) {
    %c0_i32 = arith.constant 0 : i32
    %c0_i32_0 = arith.constant 0 : i32
    %c0_i32_1 = arith.constant 0 : i32
    return %c0_i32, %c0_i32_0 : i32, i32
  }
  func.func @transform_2(%arg0: i32) -> (i32, i32) {
    %c0_i32 = arith.constant 0 : i32
    %c0_i32_0 = arith.constant 0 : i32
    %c0_i32_1 = arith.constant 0 : i32
    return %c0_i32, %c0_i32_0 : i32, i32
  }
  func.func @transform_3(%arg0: i32) -> (i32, i32) {
    %c0_i32 = arith.constant 0 : i32
    %c0_i32_0 = arith.constant 0 : i32
    %c0_i32_1 = arith.constant 0 : i32
    return %c0_i32, %c0_i32_0 : i32, i32
  }
  func.func @transform_4(%arg0: i32) -> (i32, i32) {
    %c0_i32 = arith.constant 0 : i32
    %c0_i32_0 = arith.constant 0 : i32
    %c0_i32_1 = arith.constant 0 : i32
    return %c0_i32, %c0_i32_0 : i32, i32
  }
  func.func @transform_5(%arg0: i32) -> (i32, i32) {
    %c0_i32 = arith.constant 0 : i32
    %c0_i32_0 = arith.constant 0 : i32
    return %arg0, %c0_i32 : i32, i32
  }
  func.func @transform_6(%arg0: i32) -> (i32, i32) {
    %c0_i32 = arith.constant 0 : i32
    %c0_i32_0 = arith.constant 0 : i32
    return %arg0, %c0_i32 : i32, i32
  }
}

module attributes {stable_mosaic.version = 11 : i64} {
  func.func @_linear_kernel(%arg0: i32, %arg1: i32, %arg2: i32, %arg3: memref<16x32xbf16, #tpu.memory_space<vmem>>, %arg4: memref<32x32xbf16, #tpu.memory_space<vmem>>, %arg5: memref<1x32xf32, #tpu.memory_space<vmem>>, %arg6: memref<16x32xbf16, #tpu.memory_space<vmem>>, %arg7: memref<16x32xbf16, #tpu.memory_space<vmem>>, %arg8: memref<16x32xf32, #tpu.memory_space<vmem>>) attributes {dimension_semantics = [#tpu.dimension_semantics<parallel>, #tpu.dimension_semantics<parallel>, #tpu.dimension_semantics<arbitrary>], iteration_bounds = array<i64: 1, 1, 1>, scalar_prefetch = 0 : i64, scratch_operands = 1 : i64, tpu.core_type = #tpu.core_type<tc>, window_params = [{transform_indices = @transform_0, window_bounds = array<i64: 16, 32>}, {transform_indices = @transform_1, window_bounds = array<i64: 32, 32>}, {transform_indices = @transform_2, window_bounds = array<i64: 1, 32>}, {transform_indices = @transform_3, window_bounds = array<i64: 16, 32>}, {transform_indices = @transform_4, window_bounds = array<i64: 16, 32>}]} {
    %c0_i32 = arith.constant 0 : i32
    %0 = arith.cmpi eq, %arg2, %c0_i32 : i32
    %1 = arith.extui %0 : i1 to i32
    %c0_i32_0 = arith.constant 0 : i32
    %2 = arith.cmpi ne, %1, %c0_i32_0 : i32
    scf.if %2 {
      %cst_10 = arith.constant 0.000000e+00 : f32
      %12 = vector.broadcast %cst_10 : f32 to vector<16x32xf32>
      %c0_11 = arith.constant 0 : index
      %c0_12 = arith.constant 0 : index
      %13 = vector.load %arg8[%c0_11, %c0_12] : memref<16x32xf32, #tpu.memory_space<vmem>>, vector<16x32xf32>
      tpu.vector_store %arg8[%c0_11, %c0_12], %12 {strides = array<i32>} : memref<16x32xf32, #tpu.memory_space<vmem>>, vector<16x32xf32>,
    } else {
    }
    %c0 = arith.constant 0 : index
    %c0_1 = arith.constant 0 : index
    %3 = vector.load %arg8[%c0, %c0_1] : memref<16x32xf32, #tpu.memory_space<vmem>>, vector<16x32xf32>
    %c0_2 = arith.constant 0 : index
    %c0_3 = arith.constant 0 : index
    %4 = vector.load %arg3[%c0_2, %c0_3] : memref<16x32xbf16, #tpu.memory_space<vmem>>, vector<16x32xbf16>
    %c0_4 = arith.constant 0 : index
    %c0_5 = arith.constant 0 : index
    %5 = vector.load %arg4[%c0_4, %c0_5] : memref<32x32xbf16, #tpu.memory_space<vmem>>, vector<32x32xbf16>
    %cst = arith.constant dense<0.000000e+00> : vector<16x32xf32>
    %6 = tpu.matmul %4, %5, %cst {dimension_numbers = #tpu.dot_dimension_numbers<[1], [0], [0], [1], [0, 0, 1, 1], [], []>} : vector<16x32xbf16>, vector<32x32xbf16>, vector<16x32xf32> -> vector<16x32xf32>
    %7 = arith.addf %3, %6 : vector<16x32xf32>
    %c0_6 = arith.constant 0 : index
    %c0_7 = arith.constant 0 : index
    %8 = vector.load %arg8[%c0_6, %c0_7] : memref<16x32xf32, #tpu.memory_space<vmem>>, vector<16x32xf32>
    tpu.vector_store %arg8[%c0_6, %c0_7], %7 {strides = array<i32>} : memref<16x32xf32, #tpu.memory_space<vmem>>, vector<16x32xf32>,
    %c0_i32_8 = arith.constant 0 : i32
    %9 = arith.cmpi eq, %arg2, %c0_i32_8 : i32
    %10 = arith.extui %9 : i1 to i32
    %c0_i32_9 = arith.constant 0 : i32
    %11 = arith.cmpi ne, %10, %c0_i32_9 : i32
    scf.if %11 {
      %c0_10 = arith.constant 0 : index
      %c0_11 = arith.constant 0 : index
      %12 = vector.load %arg8[%c0_10, %c0_11] : memref<16x32xf32, #tpu.memory_space<vmem>>, vector<16x32xf32>
      %c0_12 = arith.constant 0 : index
      %c0_13 = arith.constant 0 : index
      %13 = vector.load %arg5[%c0_12, %c0_13] : memref<1x32xf32, #tpu.memory_space<vmem>>, vector<1x32xf32>
      %14 = vector.broadcast %13 : vector<1x32xf32> to vector<16x32xf32>
      %15 = arith.addf %12, %14 : vector<16x32xf32>
      %c0_14 = arith.constant 0 : index
      %c0_15 = arith.constant 0 : index
      %16 = vector.load %arg6[%c0_14, %c0_15] : memref<16x32xbf16, #tpu.memory_space<vmem>>, vector<16x32xbf16>
      %17 = arith.extf %16 : vector<16x32xbf16> to vector<16x32xf32>
      %18 = arith.addf %15, %17 : vector<16x32xf32>
      %19 = arith.truncf %18 : vector<16x32xf32> to vector<16x32xbf16>
      %c0_16 = arith.constant 0 : index
      %c0_17 = arith.constant 0 : index
      %20 = vector.load %arg7[%c0_16, %c0_17] : memref<16x32xbf16, #tpu.memory_space<vmem>>, vector<16x32xbf16>
      tpu.vector_store %arg7[%c0_16, %c0_17], %19 {strides = array<i32>} : memref<16x32xbf16, #tpu.memory_space<vmem>>, vector<16x32xbf16>,
    } else {
    }
    return
  }
  func.func @transform_0(%arg0: i32, %arg1: i32, %arg2: i32) -> (i32, i32) {
    %c0_i32 = arith.constant 0 : i32
    return %arg0, %arg2 : i32, i32
  }
  func.func @transform_1(%arg0: i32, %arg1: i32, %arg2: i32) -> (i32, i32) {
    %c0_i32 = arith.constant 0 : i32
    return %arg2, %arg1 : i32, i32
  }
  func.func @transform_2(%arg0: i32, %arg1: i32, %arg2: i32) -> (i32, i32) {
    %c0_i32 = arith.constant 0 : i32
    %c0_i32_0 = arith.constant 0 : i32
    return %c0_i32, %arg1 : i32, i32
  }
  func.func @transform_3(%arg0: i32, %arg1: i32, %arg2: i32) -> (i32, i32) {
    %c0_i32 = arith.constant 0 : i32
    return %arg0, %arg1 : i32, i32
  }
  func.func @transform_4(%arg0: i32, %arg1: i32, %arg2: i32) -> (i32, i32) {
    %c0_i32 = arith.constant 0 : i32
    return %arg0, %arg1 : i32, i32
  }
}

module attributes {stable_mosaic.version = 11 : i64} {
  func.func @_ffn_kernel(%arg0: i32, %arg1: i32, %arg2: memref<16x32xbf16, #tpu.memory_space<vmem>>, %arg3: memref<1x32xf32, #tpu.memory_space<vmem>>, %arg4: memref<1x32xf32, #tpu.memory_space<vmem>>, %arg5: memref<32x64xbf16, #tpu.memory_space<vmem>>, %arg6: memref<1x64xf32, #tpu.memory_space<vmem>>, %arg7: memref<64x32xbf16, #tpu.memory_space<vmem>>, %arg8: memref<1x32xf32, #tpu.memory_space<vmem>>, %arg9: memref<16x32xbf16, #tpu.memory_space<vmem>>, %arg10: memref<16x32xbf16, #tpu.memory_space<vmem>>, %arg11: memref<16x32xf32, #tpu.memory_space<vmem>>) attributes {dimension_semantics = [#tpu.dimension_semantics<parallel>, #tpu.dimension_semantics<arbitrary>], iteration_bounds = array<i64: 1, 1>, scalar_prefetch = 0 : i64, scratch_operands = 2 : i64, tpu.core_type = #tpu.core_type<tc>, window_params = [{transform_indices = @transform_0, window_bounds = array<i64: 16, 32>}, {pipeline_mode = #tpu.pipeline_mode<synchronous>, transform_indices = @transform_1, window_bounds = array<i64: 1, 32>}, {pipeline_mode = #tpu.pipeline_mode<synchronous>, transform_indices = @transform_2, window_bounds = array<i64: 1, 32>}, {transform_indices = @transform_3, window_bounds = array<i64: 32, 64>}, {transform_indices = @transform_4, window_bounds = array<i64: 1, 64>}, {transform_indices = @transform_5, window_bounds = array<i64: 64, 32>}, {pipeline_mode = #tpu.pipeline_mode<synchronous>, transform_indices = @transform_6, window_bounds = array<i64: 1, 32>}, {transform_indices = @transform_7, window_bounds = array<i64: 16, 32>}]} {
    %c0_i32 = arith.constant 0 : i32
    %0 = arith.cmpi eq, %arg1, %c0_i32 : i32
    %1 = arith.extui %0 : i1 to i32
    %c0_i32_0 = arith.constant 0 : i32
    %2 = arith.cmpi ne, %1, %c0_i32_0 : i32
    scf.if %2 {
      %c0_16 = arith.constant 0 : index
      %c0_17 = arith.constant 0 : index
      %20 = vector.load %arg2[%c0_16, %c0_17] : memref<16x32xbf16, #tpu.memory_space<vmem>>, vector<16x32xbf16>
      %21 = arith.extf %20 : vector<16x32xbf16> to vector<16x32xf32>
      %c0_18 = arith.constant 0 : index
      %c0_19 = arith.constant 0 : index
      %22 = vector.load %arg3[%c0_18, %c0_19] : memref<1x32xf32, #tpu.memory_space<vmem>>, vector<1x32xf32>
      %c0_20 = arith.constant 0 : index
      %c0_21 = arith.constant 0 : index
      %23 = vector.load %arg4[%c0_20, %c0_21] : memref<1x32xf32, #tpu.memory_space<vmem>>, vector<1x32xf32>
      %cst_22 = arith.constant dense<0.000000e+00> : vector<16xf32>
      %24 = vector.multi_reduction <add>, %21, %cst_22 [1] : vector<16x32xf32> to vector<16xf32>
      %25 = vector.shape_cast %24 : vector<16xf32> to vector<16x1xf32>
      %cst_23 = arith.constant 3.200000e+01 : f32
      %26 = vector.broadcast %cst_23 : f32 to vector<16x1xf32>
      %27 = arith.divf %25, %26 : vector<16x1xf32>
      %28 = vector.broadcast %27 : vector<16x1xf32> to vector<16x32xf32>
      %29 = arith.subf %21, %28 : vector<16x32xf32>
      %30 = arith.mulf %29, %29 : vector<16x32xf32>
      %cst_24 = arith.constant dense<0.000000e+00> : vector<16xf32>
      %31 = vector.multi_reduction <add>, %30, %cst_24 [1] : vector<16x32xf32> to vector<16xf32>
      %32 = vector.shape_cast %31 : vector<16xf32> to vector<16x1xf32>
      %cst_25 = arith.constant 3.200000e+01 : f32
      %33 = vector.broadcast %cst_25 : f32 to vector<16x1xf32>
      %34 = arith.divf %32, %33 : vector<16x1xf32>
      %35 = vector.broadcast %27 : vector<16x1xf32> to vector<16x32xf32>
      %36 = arith.subf %21, %35 : vector<16x32xf32>
      %cst_26 = arith.constant 9.99999997E-7 : f32
      %37 = vector.broadcast %cst_26 : f32 to vector<16x1xf32>
      %38 = arith.addf %34, %37 : vector<16x1xf32>
      %39 = math.rsqrt %38 : vector<16x1xf32>
      %40 = vector.broadcast %39 : vector<16x1xf32> to vector<16x32xf32>
      %41 = arith.mulf %36, %40 : vector<16x32xf32>
      %42 = vector.broadcast %22 : vector<1x32xf32> to vector<16x32xf32>
      %43 = arith.mulf %41, %42 : vector<16x32xf32>
      %44 = vector.broadcast %23 : vector<1x32xf32> to vector<16x32xf32>
      %45 = arith.addf %43, %44 : vector<16x32xf32>
      %46 = arith.truncf %45 : vector<16x32xf32> to vector<16x32xbf16>
      %c0_27 = arith.constant 0 : index
      %c0_28 = arith.constant 0 : index
      %47 = vector.load %arg10[%c0_27, %c0_28] : memref<16x32xbf16, #tpu.memory_space<vmem>>, vector<16x32xbf16>
      tpu.vector_store %arg10[%c0_27, %c0_28], %46 {strides = array<i32>} : memref<16x32xbf16, #tpu.memory_space<vmem>>, vector<16x32xbf16>,
      %cst_29 = arith.constant 0.000000e+00 : f32
      %48 = vector.broadcast %cst_29 : f32 to vector<16x32xf32>
      %c0_30 = arith.constant 0 : index
      %c0_31 = arith.constant 0 : index
      %49 = vector.load %arg11[%c0_30, %c0_31] : memref<16x32xf32, #tpu.memory_space<vmem>>, vector<16x32xf32>
      tpu.vector_store %arg11[%c0_30, %c0_31], %48 {strides = array<i32>} : memref<16x32xf32, #tpu.memory_space<vmem>>, vector<16x32xf32>,
    } else {
    }
    %c0 = arith.constant 0 : index
    %c0_1 = arith.constant 0 : index
    %3 = vector.load %arg10[%c0, %c0_1] : memref<16x32xbf16, #tpu.memory_space<vmem>>, vector<16x32xbf16>
    %c0_2 = arith.constant 0 : index
    %c0_3 = arith.constant 0 : index
    %4 = vector.load %arg5[%c0_2, %c0_3] : memref<32x64xbf16, #tpu.memory_space<vmem>>, vector<32x64xbf16>
    %cst = arith.constant dense<0.000000e+00> : vector<16x64xf32>
    %5 = tpu.matmul %3, %4, %cst {dimension_numbers = #tpu.dot_dimension_numbers<[1], [0], [0], [1], [0, 0, 1, 1], [], []>} : vector<16x32xbf16>, vector<32x64xbf16>, vector<16x64xf32> -> vector<16x64xf32>
    %c0_4 = arith.constant 0 : index
    %c0_5 = arith.constant 0 : index
    %6 = vector.load %arg6[%c0_4, %c0_5] : memref<1x64xf32, #tpu.memory_space<vmem>>, vector<1x64xf32>
    %7 = vector.broadcast %6 : vector<1x64xf32> to vector<16x64xf32>
    %8 = arith.addf %5, %7 : vector<16x64xf32>
    %cst_6 = arith.constant 0.000000e+00 : f32
    %9 = vector.broadcast %cst_6 : f32 to vector<16x64xf32>
    %10 = arith.maximumf %8, %9 : vector<16x64xf32>
    %c0_7 = arith.constant 0 : index
    %c0_8 = arith.constant 0 : index
    %11 = vector.load %arg11[%c0_7, %c0_8] : memref<16x32xf32, #tpu.memory_space<vmem>>, vector<16x32xf32>
    %12 = arith.truncf %10 : vector<16x64xf32> to vector<16x64xbf16>
    %c0_9 = arith.constant 0 : index
    %c0_10 = arith.constant 0 : index
    %13 = vector.load %arg7[%c0_9, %c0_10] : memref<64x32xbf16, #tpu.memory_space<vmem>>, vector<64x32xbf16>
    %cst_11 = arith.constant dense<0.000000e+00> : vector<16x32xf32>
    %14 = tpu.matmul %12, %13, %cst_11 {dimension_numbers = #tpu.dot_dimension_numbers<[1], [0], [0], [1], [0, 0, 1, 1], [], []>} : vector<16x64xbf16>, vector<64x32xbf16>, vector<16x32xf32> -> vector<16x32xf32>
    %15 = arith.addf %11, %14 : vector<16x32xf32>
    %c0_12 = arith.constant 0 : index
    %c0_13 = arith.constant 0 : index
    %16 = vector.load %arg11[%c0_12, %c0_13] : memref<16x32xf32, #tpu.memory_space<vmem>>, vector<16x32xf32>
    tpu.vector_store %arg11[%c0_12, %c0_13], %15 {strides = array<i32>} : memref<16x32xf32, #tpu.memory_space<vmem>>, vector<16x32xf32>,
    %c0_i32_14 = arith.constant 0 : i32
    %17 = arith.cmpi eq, %arg1, %c0_i32_14 : i32
    %18 = arith.extui %17 : i1 to i32
    %c0_i32_15 = arith.constant 0 : i32
    %19 = arith.cmpi ne, %18, %c0_i32_15 : i32
    scf.if %19 {
      %c0_16 = arith.constant 0 : index
      %c0_17 = arith.constant 0 : index
      %20 = vector.load %arg11[%c0_16, %c0_17] : memref<16x32xf32, #tpu.memory_space<vmem>>, vector<16x32xf32>
      %c0_18 = arith.constant 0 : index
      %c0_19 = arith.constant 0 : index
      %21 = vector.load %arg8[%c0_18, %c0_19] : memref<1x32xf32, #tpu.memory_space<vmem>>, vector<1x32xf32>
      %22 = vector.broadcast %21 : vector<1x32xf32> to vector<16x32xf32>
      %23 = arith.addf %20, %22 : vector<16x32xf32>
      %c0_20 = arith.constant 0 : index
      %c0_21 = arith.constant 0 : index
      %24 = vector.load %arg2[%c0_20, %c0_21] : memref<16x32xbf16, #tpu.memory_space<vmem>>, vector<16x32xbf16>
      %25 = arith.extf %24 : vector<16x32xbf16> to vector<16x32xf32>
      %26 = arith.addf %23, %25 : vector<16x32xf32>
      %27 = arith.truncf %26 : vector<16x32xf32> to vector<16x32xbf16>
      %c0_22 = arith.constant 0 : index
      %c0_23 = arith.constant 0 : index
      %28 = vector.load %arg9[%c0_22, %c0_23] : memref<16x32xbf16, #tpu.memory_space<vmem>>, vector<16x32xbf16>
      tpu.vector_store %arg9[%c0_22, %c0_23], %27 {strides = array<i32>} : memref<16x32xbf16, #tpu.memory_space<vmem>>, vector<16x32xbf16>,
    } else {
    }
    return
  }
  func.func @transform_0(%arg0: i32, %arg1: i32) -> (i32, i32) {
    %c0_i32 = arith.constant 0 : i32
    %c0_i32_0 = arith.constant 0 : i32
    return %arg0, %c0_i32 : i32, i32
  }
  func.func @transform_1(%arg0: i32, %arg1: i32) -> (i32, i32) {
    %c0_i32 = arith.constant 0 : i32
    %c0_i32_0 = arith.constant 0 : i32
    %c0_i32_1 = arith.constant 0 : i32
    return %c0_i32, %c0_i32_0 : i32, i32
  }
  func.func @transform_2(%arg0: i32, %arg1: i32) -> (i32, i32) {
    %c0_i32 = arith.constant 0 : i32
    %c0_i32_0 = arith.constant 0 : i32
    %c0_i32_1 = arith.constant 0 : i32
    return %c0_i32, %c0_i32_0 : i32, i32
  }
  func.func @transform_3(%arg0: i32, %arg1: i32) -> (i32, i32) {
    %c0_i32 = arith.constant 0 : i32
    %c0_i32_0 = arith.constant 0 : i32
    return %c0_i32, %arg1 : i32, i32
  }
  func.func @transform_4(%arg0: i32, %arg1: i32) -> (i32, i32) {
    %c0_i32 = arith.constant 0 : i32
    %c0_i32_0 = arith.constant 0 : i32
    return %c0_i32, %arg1 : i32, i32
  }
  func.func @transform_5(%arg0: i32, %arg1: i32) -> (i32, i32) {
    %c0_i32 = arith.constant 0 : i32
    %c0_i32_0 = arith.constant 0 : i32
    return %arg1, %c0_i32 : i32, i32
  }
  func.func @transform_6(%arg0: i32, %arg1: i32) -> (i32, i32) {
    %c0_i32 = arith.constant 0 : i32
    %c0_i32_0 = arith.constant 0 : i32
    %c0_i32_1 = arith.constant 0 : i32
    return %c0_i32, %c0_i32_0 : i32, i32
  }
  func.func @transform_7(%arg0: i32, %arg1: i32) -> (i32, i32) {
    %c0_i32 = arith.constant 0 : i32
    %c0_i32_0 = arith.constant 0 : i32
    return %arg0, %c0_i32 : i32, i32
  }
}

module attributes {stable_mosaic.version = 11 : i64} {
  func.func @_linear_kernel(%arg0: i32, %arg1: i32, %arg2: i32, %arg3: memref<16x32xbf16, #tpu.memory_space<vmem>>, %arg4: memref<32x64xbf16, #tpu.memory_space<vmem>>, %arg5: memref<1x64xf32, #tpu.memory_space<vmem>>, %arg6: memref<16x64xbf16, #tpu.memory_space<vmem>>, %arg7: memref<16x64xf32, #tpu.memory_space<vmem>>) attributes {dimension_semantics = [#tpu.dimension_semantics<parallel>, #tpu.dimension_semantics<parallel>, #tpu.dimension_semantics<arbitrary>], iteration_bounds = array<i64: 1, 1, 1>, scalar_prefetch = 0 : i64, scratch_operands = 1 : i64, tpu.core_type = #tpu.core_type<tc>, window_params = [{transform_indices = @transform_0, window_bounds = array<i64: 16, 32>}, {transform_indices = @transform_1, window_bounds = array<i64: 32, 64>}, {transform_indices = @transform_2, window_bounds = array<i64: 1, 64>}, {transform_indices = @transform_3, window_bounds = array<i64: 16, 64>}]} {
    %c0_i32 = arith.constant 0 : i32
    %0 = arith.cmpi eq, %arg2, %c0_i32 : i32
    %1 = arith.extui %0 : i1 to i32
    %c0_i32_0 = arith.constant 0 : i32
    %2 = arith.cmpi ne, %1, %c0_i32_0 : i32
    scf.if %2 {
      %cst_10 = arith.constant 0.000000e+00 : f32
      %12 = vector.broadcast %cst_10 : f32 to vector<16x64xf32>
      %c0_11 = arith.constant 0 : index
      %c0_12 = arith.constant 0 : index
      %13 = vector.load %arg7[%c0_11, %c0_12] : memref<16x64xf32, #tpu.memory_space<vmem>>, vector<16x64xf32>
      tpu.vector_store %arg7[%c0_11, %c0_12], %12 {strides = array<i32>} : memref<16x64xf32, #tpu.memory_space<vmem>>, vector<16x64xf32>,
    } else {
    }
    %c0 = arith.constant 0 : index
    %c0_1 = arith.constant 0 : index
    %3 = vector.load %arg7[%c0, %c0_1] : memref<16x64xf32, #tpu.memory_space<vmem>>, vector<16x64xf32>
    %c0_2 = arith.constant 0 : index
    %c0_3 = arith.constant 0 : index
    %4 = vector.load %arg3[%c0_2, %c0_3] : memref<16x32xbf16, #tpu.memory_space<vmem>>, vector<16x32xbf16>
    %c0_4 = arith.constant 0 : index
    %c0_5 = arith.constant 0 : index
    %5 = vector.load %arg4[%c0_4, %c0_5] : memref<32x64xbf16, #tpu.memory_space<vmem>>, vector<32x64xbf16>
    %cst = arith.constant dense<0.000000e+00> : vector<16x64xf32>
    %6 = tpu.matmul %4, %5, %cst {dimension_numbers = #tpu.dot_dimension_numbers<[1], [0], [0], [1], [0, 0, 1, 1], [], []>} : vector<16x32xbf16>, vector<32x64xbf16>, vector<16x64xf32> -> vector<16x64xf32>
    %7 = arith.addf %3, %6 : vector<16x64xf32>
    %c0_6 = arith.constant 0 : index
    %c0_7 = arith.constant 0 : index
    %8 = vector.load %arg7[%c0_6, %c0_7] : memref<16x64xf32, #tpu.memory_space<vmem>>, vector<16x64xf32>
    tpu.vector_store %arg7[%c0_6, %c0_7], %7 {strides = array<i32>} : memref<16x64xf32, #tpu.memory_space<vmem>>, vector<16x64xf32>,
    %c0_i32_8 = arith.constant 0 : i32
    %9 = arith.cmpi eq, %arg2, %c0_i32_8 : i32
    %10 = arith.extui %9 : i1 to i32
    %c0_i32_9 = arith.constant 0 : i32
    %11 = arith.cmpi ne, %10, %c0_i32_9 : i32
    scf.if %11 {
      %c0_10 = arith.constant 0 : index
      %c0_11 = arith.constant 0 : index
      %12 = vector.load %arg7[%c0_10, %c0_11] : memref<16x64xf32, #tpu.memory_space<vmem>>, vector<16x64xf32>
      %c0_12 = arith.constant 0 : index
      %c0_13 = arith.constant 0 : index
      %13 = vector.load %arg5[%c0_12, %c0_13] : memref<1x64xf32, #tpu.memory_space<vmem>>, vector<1x64xf32>
      %14 = vector.broadcast %13 : vector<1x64xf32> to vector<16x64xf32>
      %15 = arith.addf %12, %14 : vector<16x64xf32>
      %16 = arith.truncf %15 : vector<16x64xf32> to vector<16x64xbf16>
      %c0_14 = arith.constant 0 : index
      %c0_15 = arith.constant 0 : index
      %17 = vector.load %arg6[%c0_14, %c0_15] : memref<16x64xbf16, #tpu.memory_space<vmem>>, vector<16x64xbf16>
      tpu.vector_store %arg6[%c0_14, %c0_15], %16 {strides = array<i32>} : memref<16x64xbf16, #tpu.memory_space<vmem>>, vector<16x64xbf16>,
    } else {
    }
    return
  }
  func.func @transform_0(%arg0: i32, %arg1: i32, %arg2: i32) -> (i32, i32) {
    %c0_i32 = arith.constant 0 : i32
    return %arg0, %arg2 : i32, i32
  }
  func.func @transform_1(%arg0: i32, %arg1: i32, %arg2: i32) -> (i32, i32) {
    %c0_i32 = arith.constant 0 : i32
    return %arg2, %arg1 : i32, i32
  }
  func.func @transform_2(%arg0: i32, %arg1: i32, %arg2: i32) -> (i32, i32) {
    %c0_i32 = arith.constant 0 : i32
    %c0_i32_0 = arith.constant 0 : i32
    return %c0_i32, %arg1 : i32, i32
  }
  func.func @transform_3(%arg0: i32, %arg1: i32, %arg2: i32) -> (i32, i32) {
    %c0_i32 = arith.constant 0 : i32
    return %arg0, %arg1 : i32, i32
  }
}

module attributes {stable_mosaic.version = 11 : i64} {
  func.func @_attention_kernel(%arg0: i32, %arg1: i32, %arg2: memref<2xi32, #tpu.memory_space<smem>>, %arg3: memref<1x8x32xbf16, #tpu.memory_space<vmem>>, %arg4: memref<1x8x64xbf16, #tpu.memory_space<vmem>>, %arg5: memref<1x8x32xbf16, #tpu.memory_space<vmem>>) attributes {dimension_semantics = [#tpu.dimension_semantics<parallel>, #tpu.dimension_semantics<parallel>], iteration_bounds = array<i64: 2, 1>, scalar_prefetch = 1 : i64, scratch_operands = 0 : i64, tpu.core_type = #tpu.core_type<tc>, window_params = [{transform_indices = @transform_0, window_bounds = array<i64: 1, 8, 32>}, {transform_indices = @transform_1, window_bounds = array<i64: 1, 8, 64>}, {transform_indices = @transform_2, window_bounds = array<i64: 1, 8, 32>}]} {
    %0 = arith.index_cast %arg0 : i32 to index
    %1 = memref.load %arg2[%0] : memref<2xi32, #tpu.memory_space<smem>>
    %2 = tpu.iota {dimensions = array<i32: 1>} : vector<8x8xi32>
    %3 = vector.broadcast %1 : i32 to vector<8x8xi32>
    %4 = arith.cmpi slt, %2, %3 : vector<8x8xi32>
    %c8_i32 = arith.constant 8 : i32
    %5 = arith.muli %arg1, %c8_i32 : i32
    %6 = tpu.iota {dimensions = array<i32: 0>} : vector<8x8xi32>
    %7 = vector.broadcast %5 : i32 to vector<8x8xi32>
    %8 = arith.addi %7, %6 : vector<8x8xi32>
    %9 = arith.cmpi sle, %2, %8 : vector<8x8xi32>
    %10 = arith.andi %4, %9 : vector<8x8xi1>
    %cst = arith.constant 0.000000e+00 : f32
    %cst_0 = arith.constant -1.000000e+30 : f32
    %11 = vector.broadcast %cst : f32 to vector<8x8xf32>
    %12 = vector.broadcast %cst_0 : f32 to vector<8x8xf32>
    %13 = arith.select %10, %11, %12 : vector<8x8xi1>, vector<8x8xf32>
    %c0 = arith.constant 0 : index
    %c0_1 = arith.constant 0 : index
    %c0_2 = arith.constant 0 : index
    %14 = vector.load %arg3[%c0, %c0_1, %c0_2] : memref<1x8x32xbf16, #tpu.memory_space<vmem>>, vector<1x8x32xbf16>
    %15 = vector.shape_cast %14 : vector<1x8x32xbf16> to vector<8x32xbf16>
    %c0_3 = arith.constant 0 : index
    %c0_4 = arith.constant 0 : index
    %c0_5 = arith.constant 0 : index
    %16 = vector.load %arg4[%c0_3, %c0_4, %c0_5] : memref<1x8x64xbf16, #tpu.memory_space<vmem>>, vector<1x8x64xbf16>
    %17 = vector.shape_cast %16 : vector<1x8x64xbf16> to vector<8x64xbf16>
    %18 = vector.extract_strided_slice %15 {offsets = [0, 0], sizes = [8, 8], strides = [1, 1]} : vector<8x32xbf16> to vector<8x8xbf16>
    %19 = vector.extract_strided_slice %17 {offsets = [0, 0], sizes = [8, 8], strides = [1, 1]} : vector<8x64xbf16> to vector<8x8xbf16>
    %20 = vector.extract_strided_slice %17 {offsets = [0, 32], sizes = [8, 8], strides = [1, 1]} : vector<8x64xbf16> to vector<8x8xbf16>
    %cst_6 = arith.constant dense<0.000000e+00> : vector<8x8xf32>
    %21 = tpu.matmul %18, %19, %cst_6 {dimension_numbers = #tpu.dot_dimension_numbers<[1], [1], [0], [0], [0, 0, 1, 0], [], []>} : vector<8x8xbf16>, vector<8x8xbf16>, vector<8x8xf32> -> vector<8x8xf32>
    %22 = arith.addf %21, %13 : vector<8x8xf32>
    %cst_7 = arith.constant dense<0xFF800000> : vector<8xf32>
    %23 = vector.multi_reduction <maximumf>, %22, %cst_7 [1] : vector<8x8xf32> to vector<8xf32>
    %24 = vector.shape_cast %23 : vector<8xf32> to vector<8x1xf32>
    %25 = vector.broadcast %24 : vector<8x1xf32> to vector<8x8xf32>
    %26 = arith.subf %22, %25 : vector<8x8xf32>
    %27 = math.exp %26 : vector<8x8xf32>
    %cst_8 = arith.constant dense<0.000000e+00> : vector<8xf32>
    %28 = vector.multi_reduction <add>, %27, %cst_8 [1] : vector<8x8xf32> to vector<8xf32>
    %29 = vector.shape_cast %28 : vector<8xf32> to vector<8x1xf32>
    %30 = tpu.reciprocal %29 {approx = true} : vector<8x1xf32> -> vector<8x1xf32>
    %31 = vector.broadcast %30 : vector<8x1xf32> to vector<8x8xf32>
    %32 = arith.mulf %27, %31 : vector<8x8xf32>
    %33 = arith.truncf %32 : vector<8x8xf32> to vector<8x8xbf16>
    %cst_9 = arith.constant dense<0.000000e+00> : vector<8x8xf32>
    %34 = tpu.matmul %33, %20, %cst_9 {dimension_numbers = #tpu.dot_dimension_numbers<[1], [0], [0], [1], [0, 0, 1, 1], [], []>} : vector<8x8xbf16>, vector<8x8xbf16>, vector<8x8xf32> -> vector<8x8xf32>
    %35 = vector.extract_strided_slice %15 {offsets = [0, 8], sizes = [8, 8], strides = [1, 1]} : vector<8x32xbf16> to vector<8x8xbf16>
    %36 = vector.extract_strided_slice %17 {offsets = [0, 8], sizes = [8, 8], strides = [1, 1]} : vector<8x64xbf16> to vector<8x8xbf16>
    %37 = vector.extract_strided_slice %17 {offsets = [0, 40], sizes = [8, 8], strides = [1, 1]} : vector<8x64xbf16> to vector<8x8xbf16>
    %cst_10 = arith.constant dense<0.000000e+00> : vector<8x8xf32>
    %38 = tpu.matmul %35, %36, %cst_10 {dimension_numbers = #tpu.dot_dimension_numbers<[1], [1], [0], [0], [0, 0, 1, 0], [], []>} : vector<8x8xbf16>, vector<8x8xbf16>, vector<8x8xf32> -> vector<8x8xf32>
    %39 = arith.addf %38, %13 : vector<8x8xf32>
    %cst_11 = arith.constant dense<0xFF800000> : vector<8xf32>
    %40 = vector.multi_reduction <maximumf>, %39, %cst_11 [1] : vector<8x8xf32> to vector<8xf32>
    %41 = vector.shape_cast %40 : vector<8xf32> to vector<8x1xf32>
    %42 = vector.broadcast %41 : vector<8x1xf32> to vector<8x8xf32>
    %43 = arith.subf %39, %42 : vector<8x8xf32>
    %44 = math.exp %43 : vector<8x8xf32>
    %cst_12 = arith.constant dense<0.000000e+00> : vector<8xf32>
    %45 = vector.multi_reduction <add>, %44, %cst_12 [1] : vector<8x8xf32> to vector<8xf32>
    %46 = vector.shape_cast %45 : vector<8xf32> to vector<8x1xf32>
    %47 = tpu.reciprocal %46 {approx = true} : vector<8x1xf32> -> vector<8x1xf32>
    %48 = vector.broadcast %47 : vector<8x1xf32> to vector<8x8xf32>
    %49 = arith.mulf %44, %48 : vector<8x8xf32>
    %50 = arith.truncf %49 : vector<8x8xf32> to vector<8x8xbf16>
    %cst_13 = arith.constant dense<0.000000e+00> : vector<8x8xf32>
    %51 = tpu.matmul %50, %37, %cst_13 {dimension_numbers = #tpu.dot_dimension_numbers<[1], [0], [0], [1], [0, 0, 1, 1], [], []>} : vector<8x8xbf16>, vector<8x8xbf16>, vector<8x8xf32> -> vector<8x8xf32>
    %52 = vector.extract_strided_slice %15 {offsets = [0, 16], sizes = [8, 8], strides = [1, 1]} : vector<8x32xbf16> to vector<8x8xbf16>
    %53 = vector.extract_strided_slice %17 {offsets = [0, 16], sizes = [8, 8], strides = [1, 1]} : vector<8x64xbf16> to vector<8x8xbf16>
    %54 = vector.extract_strided_slice %17 {offsets = [0, 48], sizes = [8, 8], strides = [1, 1]} : vector<8x64xbf16> to vector<8x8xbf16>
    %cst_14 = arith.constant dense<0.000000e+00> : vector<8x8xf32>
    %55 = tpu.matmul %52, %53, %cst_14 {dimension_numbers = #tpu.dot_dimension_numbers<[1], [1], [0], [0], [0, 0, 1, 0], [], []>} : vector<8x8xbf16>, vector<8x8xbf16>, vector<8x8xf32> -> vector<8x8xf32>
    %56 = arith.addf %55, %13 : vector<8x8xf32>
    %cst_15 = arith.constant dense<0xFF800000> : vector<8xf32>
    %57 = vector.multi_reduction <maximumf>, %56, %cst_15 [1] : vector<8x8xf32> to vector<8xf32>
    %58 = vector.shape_cast %57 : vector<8xf32> to vector<8x1xf32>
    %59 = vector.broadcast %58 : vector<8x1xf32> to vector<8x8xf32>
    %60 = arith.subf %56, %59 : vector<8x8xf32>
    %61 = math.exp %60 : vector<8x8xf32>
    %cst_16 = arith.constant dense<0.000000e+00> : vector<8xf32>
    %62 = vector.multi_reduction <add>, %61, %cst_16 [1] : vector<8x8xf32> to vector<8xf32>
    %63 = vector.shape_cast %62 : vector<8xf32> to vector<8x1xf32>
    %64 = tpu.reciprocal %63 {approx = true} : vector<8x1xf32> -> vector<8x1xf32>
    %65 = vector.broadcast %64 : vector<8x1xf32> to vector<8x8xf32>
    %66 = arith.mulf %61, %65 : vector<8x8xf32>
    %67 = arith.truncf %66 : vector<8x8xf32> to vector<8x8xbf16>
    %cst_17 = arith.constant dense<0.000000e+00> : vector<8x8xf32>
    %68 = tpu.matmul %67, %54, %cst_17 {dimension_numbers = #tpu.dot_dimension_numbers<[1], [0], [0], [1], [0, 0, 1, 1], [], []>} : vector<8x8xbf16>, vector<8x8xbf16>, vector<8x8xf32> -> vector<8x8xf32>
    %69 = vector.extract_strided_slice %15 {offsets = [0, 24], sizes = [8, 8], strides = [1, 1]} : vector<8x32xbf16> to vector<8x8xbf16>
    %70 = vector.extract_strided_slice %17 {offsets = [0, 24], sizes = [8, 8], strides = [1, 1]} : vector<8x64xbf16> to vector<8x8xbf16>
    %71 = vector.extract_strided_slice %17 {offsets = [0, 56], sizes = [8, 8], strides = [1, 1]} : vector<8x64xbf16> to vector<8x8xbf16>
    %cst_18 = arith.constant dense<0.000000e+00> : vector<8x8xf32>
    %72 = tpu.matmul %69, %70, %cst_18 {dimension_numbers = #tpu.dot_dimension_numbers<[1], [1], [0], [0], [0, 0, 1, 0], [], []>} : vector<8x8xbf16>, vector<8x8xbf16>, vector<8x8xf32> -> vector<8x8xf32>
    %73 = arith.addf %72, %13 : vector<8x8xf32>
    %cst_19 = arith.constant dense<0xFF800000> : vector<8xf32>
    %74 = vector.multi_reduction <maximumf>, %73, %cst_19 [1] : vector<8x8xf32> to vector<8xf32>
    %75 = vector.shape_cast %74 : vector<8xf32> to vector<8x1xf32>
    %76 = vector.broadcast %75 : vector<8x1xf32> to vector<8x8xf32>
    %77 = arith.subf %73, %76 : vector<8x8xf32>
    %78 = math.exp %77 : vector<8x8xf32>
    %cst_20 = arith.constant dense<0.000000e+00> : vector<8xf32>
    %79 = vector.multi_reduction <add>, %78, %cst_20 [1] : vector<8x8xf32> to vector<8xf32>
    %80 = vector.shape_cast %79 : vector<8xf32> to vector<8x1xf32>
    %81 = tpu.reciprocal %80 {approx = true} : vector<8x1xf32> -> vector<8x1xf32>
    %82 = vector.broadcast %81 : vector<8x1xf32> to vector<8x8xf32>
    %83 = arith.mulf %78, %82 : vector<8x8xf32>
    %84 = arith.truncf %83 : vector<8x8xf32> to vector<8x8xbf16>
    %cst_21 = arith.constant dense<0.000000e+00> : vector<8x8xf32>
    %85 = tpu.matmul %84, %71, %cst_21 {dimension_numbers = #tpu.dot_dimension_numbers<[1], [0], [0], [1], [0, 0, 1, 1], [], []>} : vector<8x8xbf16>, vector<8x8xbf16>, vector<8x8xf32> -> vector<8x8xf32>
    %86 = tpu.concatenate %34, %51, %68, %85 in 1 : vector<8x8xf32>, vector<8x8xf32>, vector<8x8xf32>, vector<8x8xf32> -> vector<8x32xf32>
    %87 = arith.truncf %86 : vector<8x32xf32> to vector<8x32xbf16>
    %c0_22 = arith.constant 0 : index
    %c0_23 = arith.constant 0 : index
    %c0_24 = arith.constant 0 : index
    %88 = vector.load %arg5[%c0_22, %c0_23, %c0_24] : memref<1x8x32xbf16, #tpu.memory_space<vmem>>, vector<1x8x32xbf16>
    %89 = vector.shape_cast %88 : vector<1x8x32xbf16> to vector<8x32xbf16>
    %90 = vector.shape_cast %87 : vector<8x32xbf16> to vector<1x8x32xbf16>
    tpu.vector_store %arg5[%c0_22, %c0_23, %c0_24], %90 {strides = array<i32>} : memref<1x8x32xbf16, #tpu.memory_space<vmem>>, vector<1x8x32xbf16>,
    return
  }
  func.func @transform_0(%arg0: i32, %arg1: i32, %arg2: memref<2xi32, #tpu.memory_space<smem>>) -> (i32, i32, i32) {
    %c0_i32 = arith.constant 0 : i32
    %c0_i32_0 = arith.constant 0 : i32
    return %arg0, %arg1, %c0_i32 : i32, i32, i32
  }
  func.func @transform_1(%arg0: i32, %arg1: i32, %arg2: memref<2xi32, #tpu.memory_space<smem>>) -> (i32, i32, i32) {
    %c0_i32 = arith.constant 0 : i32
    %c0_i32_0 = arith.constant 0 : i32
    %c0_i32_1 = arith.constant 0 : i32
    return %arg0, %c0_i32, %c0_i32_0 : i32, i32, i32
  }
  func.func @transform_2(%arg0: i32, %arg1: i32, %arg2: memref<2xi32, #tpu.memory_space<smem>>) -> (i32, i32, i32) {
    %c0_i32 = arith.constant 0 : i32
    %c0_i32_0 = arith.constant 0 : i32
    return %arg0, %arg1, %c0_i32 : i32, i32, i32
  }
}

module attributes {stable_mosaic.version = 11 : i64} {
  func.func @_layernorm_kernel(%arg0: i32, %arg1: memref<16x32xbf16, #tpu.memory_space<vmem>>, %arg2: memref<1x32xf32, #tpu.memory_space<vmem>>, %arg3: memref<1x32xf32, #tpu.memory_space<vmem>>, %arg4: memref<16x32xbf16, #tpu.memory_space<vmem>>) attributes {dimension_semantics = [#tpu.dimension_semantics<parallel>], iteration_bounds = array<i64: 1>, scalar_prefetch = 0 : i64, scratch_operands = 0 : i64, tpu.core_type = #tpu.core_type<tc>, window_params = [{transform_indices = @transform_0, window_bounds = array<i64: 16, 32>}, {pipeline_mode = #tpu.pipeline_mode<synchronous>, transform_indices = @transform_1, window_bounds = array<i64: 1, 32>}, {pipeline_mode = #tpu.pipeline_mode<synchronous>, transform_indices = @transform_2, window_bounds = array<i64: 1, 32>}, {transform_indices = @transform_3, window_bounds = array<i64: 16, 32>}]} {
    %c0 = arith.constant 0 : index
    %c0_0 = arith.constant 0 : index
    %0 = vector.load %arg1[%c0, %c0_0] : memref<16x32xbf16, #tpu.memory_space<vmem>>, vector<16x32xbf16>
    %1 = arith.extf %0 : vector<16x32xbf16> to vector<16x32xf32>
    %c0_1 = arith.constant 0 : index
    %c0_2 = arith.constant 0 : index
    %2 = vector.load %arg2[%c0_1, %c0_2] : memref<1x32xf32, #tpu.memory_space<vmem>>, vector<1x32xf32>
    %c0_3 = arith.constant 0 : index
    %c0_4 = arith.constant 0 : index
    %3 = vector.load %arg3[%c0_3, %c0_4] : memref<1x32xf32, #tpu.memory_space<vmem>>, vector<1x32xf32>
    %cst = arith.constant dense<0.000000e+00> : vector<16xf32>
    %4 = vector.multi_reduction <add>, %1, %cst [1] : vector<16x32xf32> to vector<16xf32>
    %5 = vector.shape_cast %4 : vector<16xf32> to vector<16x1xf32>
    %cst_5 = arith.constant 3.200000e+01 : f32
    %6 = vector.broadcast %cst_5 : f32 to vector<16x1xf32>
    %7 = arith.divf %5, %6 : vector<16x1xf32>
    %8 = vector.broadcast %7 : vector<16x1xf32> to vector<16x32xf32>
    %9 = arith.subf %1, %8 : vector<16x32xf32>
    %10 = arith.mulf %9, %9 : vector<16x32xf32>
    %cst_6 = arith.constant dense<0.000000e+00> : vector<16xf32>
    %11 = vector.multi_reduction <add>, %10, %cst_6 [1] : vector<16x32xf32> to vector<16xf32>
    %12 = vector.shape_cast %11 : vector<16xf32> to vector<16x1xf32>
    %cst_7 = arith.constant 3.200000e+01 : f32
    %13 = vector.broadcast %cst_7 : f32 to vector<16x1xf32>
    %14 = arith.divf %12, %13 : vector<16x1xf32>
    %15 = vector.broadcast %7 : vector<16x1xf32> to vector<16x32xf32>
    %16 = arith.subf %1, %15 : vector<16x32xf32>
    %cst_8 = arith.constant 9.99999997E-7 : f32
    %17 = vector.broadcast %cst_8 : f32 to vector<16x1xf32>
    %18 = arith.addf %14, %17 : vector<16x1xf32>
    %19 = math.rsqrt %18 : vector<16x1xf32>
    %20 = vector.broadcast %19 : vector<16x1xf32> to vector<16x32xf32>
    %21 = arith.mulf %16, %20 : vector<16x32xf32>
    %22 = vector.broadcast %2 : vector<1x32xf32> to vector<16x32xf32>
    %23 = arith.mulf %21, %22 : vector<16x32xf32>
    %24 = vector.broadcast %3 : vector<1x32xf32> to vector<16x32xf32>
    %25 = arith.addf %23, %24 : vector<16x32xf32>
    %26 = arith.truncf %25 : vector<16x32xf32> to vector<16x32xbf16>
    %c0_9 = arith.constant 0 : index
    %c0_10 = arith.constant 0 : index
    %27 = vector.load %arg4[%c0_9, %c0_10] : memref<16x32xbf16, #tpu.memory_space<vmem>>, vector<16x32xbf16>
    tpu.vector_store %arg4[%c0_9, %c0_10], %26 {strides = array<i32>} : memref<16x32xbf16, #tpu.memory_space<vmem>>, vector<16x32xbf16>,
    return
  }
  func.func @transform_0(%arg0: i32) -> (i32, i32) {
    %c0_i32 = arith.constant 0 : i32
    %c0_i32_0 = arith.constant 0 : i32
    return %arg0, %c0_i32 : i32, i32
  }
  func.func @transform_1(%arg0: i32) -> (i32, i32) {
    %c0_i32 = arith.constant 0 : i32
    %c0_i32_0 = arith.constant 0 : i32
    %c0_i32_1 = arith.constant 0 : i32
    return %c0_i32, %c0_i32_0 : i32, i32
  }
  func.func @transform_2(%arg0: i32) -> (i32, i32) {
    %c0_i32 = arith.constant 0 : i32
    %c0_i32_0 = arith.constant 0 : i32
    %c0_i32_1 = arith.constant 0 : i32
    return %c0_i32, %c0_i32_0 : i32, i32
  }
  func.func @transform_3(%arg0: i32) -> (i32, i32) {
    %c0_i32 = arith.constant 0 : i32
    %c0_i32_0 = arith.constant 0 : i32
    return %arg0, %c0_i32 : i32, i32
  }
}

module attributes {stable_mosaic.version = 11 : i64} {
  func.func @_ln_linear_kernel(%arg0: i32, %arg1: memref<16x32xbf16, #tpu.memory_space<vmem>>, %arg2: memref<1x32xf32, #tpu.memory_space<vmem>>, %arg3: memref<1x32xf32, #tpu.memory_space<vmem>>, %arg4: memref<32x32xbf16, #tpu.memory_space<vmem>>, %arg5: memref<1x32xf32, #tpu.memory_space<vmem>>, %arg6: memref<16x32xbf16, #tpu.memory_space<vmem>>) attributes {dimension_semantics = [#tpu.dimension_semantics<parallel>], iteration_bounds = array<i64: 1>, scalar_prefetch = 0 : i64, scratch_operands = 0 : i64, tpu.core_type = #tpu.core_type<tc>, window_params = [{transform_indices = @transform_0, window_bounds = array<i64: 16, 32>}, {pipeline_mode = #tpu.pipeline_mode<synchronous>, transform_indices = @transform_1, window_bounds = array<i64: 1, 32>}, {pipeline_mode = #tpu.pipeline_mode<synchronous>, transform_indices = @transform_2, window_bounds = array<i64: 1, 32>}, {pipeline_mode = #tpu.pipeline_mode<synchronous>, transform_indices = @transform_3, window_bounds = array<i64: 32, 32>}, {pipeline_mode = #tpu.pipeline_mode<synchronous>, transform_indices = @transform_4, window_bounds = array<i64: 1, 32>}, {transform_indices = @transform_5, window_bounds = array<i64: 16, 32>}]} {
    %c0 = arith.constant 0 : index
    %c0_0 = arith.constant 0 : index
    %0 = vector.load %arg1[%c0, %c0_0] : memref<16x32xbf16, #tpu.memory_space<vmem>>, vector<16x32xbf16>
    %1 = arith.extf %0 : vector<16x32xbf16> to vector<16x32xf32>
    %c0_1 = arith.constant 0 : index
    %c0_2 = arith.constant 0 : index
    %2 = vector.load %arg2[%c0_1, %c0_2] : memref<1x32xf32, #tpu.memory_space<vmem>>, vector<1x32xf32>
    %c0_3 = arith.constant 0 : index
    %c0_4 = arith.constant 0 : index
    %3 = vector.load %arg3[%c0_3, %c0_4] : memref<1x32xf32, #tpu.memory_space<vmem>>, vector<1x32xf32>
    %cst = arith.constant dense<0.000000e+00> : vector<16xf32>
    %4 = vector.multi_reduction <add>, %1, %cst [1] : vector<16x32xf32> to vector<16xf32>
    %5 = vector.shape_cast %4 : vector<16xf32> to vector<16x1xf32>
    %cst_5 = arith.constant 3.200000e+01 : f32
    %6 = vector.broadcast %cst_5 : f32 to vector<16x1xf32>
    %7 = arith.divf %5, %6 : vector<16x1xf32>
    %8 = vector.broadcast %7 : vector<16x1xf32> to vector<16x32xf32>
    %9 = arith.subf %1, %8 : vector<16x32xf32>
    %10 = arith.mulf %9, %9 : vector<16x32xf32>
    %cst_6 = arith.constant dense<0.000000e+00> : vector<16xf32>
    %11 = vector.multi_reduction <add>, %10, %cst_6 [1] : vector<16x32xf32> to vector<16xf32>
    %12 = vector.shape_cast %11 : vector<16xf32> to vector<16x1xf32>
    %cst_7 = arith.constant 3.200000e+01 : f32
    %13 = vector.broadcast %cst_7 : f32 to vector<16x1xf32>
    %14 = arith.divf %12, %13 : vector<16x1xf32>
    %15 = vector.broadcast %7 : vector<16x1xf32> to vector<16x32xf32>
    %16 = arith.subf %1, %15 : vector<16x32xf32>
    %cst_8 = arith.constant 9.99999997E-7 : f32
    %17 = vector.broadcast %cst_8 : f32 to vector<16x1xf32>
    %18 = arith.addf %14, %17 : vector<16x1xf32>
    %19 = math.rsqrt %18 : vector<16x1xf32>
    %20 = vector.broadcast %19 : vector<16x1xf32> to vector<16x32xf32>
    %21 = arith.mulf %16, %20 : vector<16x32xf32>
    %22 = vector.broadcast %2 : vector<1x32xf32> to vector<16x32xf32>
    %23 = arith.mulf %21, %22 : vector<16x32xf32>
    %24 = vector.broadcast %3 : vector<1x32xf32> to vector<16x32xf32>
    %25 = arith.addf %23, %24 : vector<16x32xf32>
    %26 = arith.truncf %25 : vector<16x32xf32> to vector<16x32xbf16>
    %c0_9 = arith.constant 0 : index
    %c0_10 = arith.constant 0 : index
    %27 = vector.load %arg4[%c0_9, %c0_10] : memref<32x32xbf16, #tpu.memory_space<vmem>>, vector<32x32xbf16>
    %cst_11 = arith.constant dense<0.000000e+00> : vector<16x32xf32>
    %28 = tpu.matmul %26, %27, %cst_11 {dimension_numbers = #tpu.dot_dimension_numbers<[1], [0], [0], [1], [0, 0, 1, 1], [], []>} : vector<16x32xbf16>, vector<32x32xbf16>, vector<16x32xf32> -> vector<16x32xf32>
    %c0_12 = arith.constant 0 : index
    %c0_13 = arith.constant 0 : index
    %29 = vector.load %arg5[%c0_12, %c0_13] : memref<1x32xf32, #tpu.memory_space<vmem>>, vector<1x32xf32>
    %30 = vector.broadcast %29 : vector<1x32xf32> to vector<16x32xf32>
    %31 = arith.addf %28, %30 : vector<16x32xf32>
    %cst_14 = arith.constant 0.353553385 : f32
    %32 = vector.broadcast %cst_14 : f32 to vector<16x32xf32>
    %33 = arith.mulf %31, %32 : vector<16x32xf32>
    %34 = arith.truncf %33 : vector<16x32xf32> to vector<16x32xbf16>
    %c0_15 = arith.constant 0 : index
    %c0_16 = arith.constant 0 : index
    %35 = vector.load %arg6[%c0_15, %c0_16] : memref<16x32xbf16, #tpu.memory_space<vmem>>, vector<16x32xbf16>
    tpu.vector_store %arg6[%c0_15, %c0_16], %34 {strides = array<i32>} : memref<16x32xbf16, #tpu.memory_space<vmem>>, vector<16x32xbf16>,
    return
  }
  func.func @transform_0(%arg0: i32) -> (i32, i32) {
    %c0_i32 = arith.constant 0 : i32
    %c0_i32_0 = arith.constant 0 : i32
    return %arg0, %c0_i32 : i32, i32
  }
  func.func @transform_1(%arg0: i32) -> (i32, i32) {
    %c0_i32 = arith.constant 0 : i32
    %c0_i32_0 = arith.constant 0 : i32
    %c0_i32_1 = arith.constant 0 : i32
    return %c0_i32, %c0_i32_0 : i32, i32
  }
  func.func @transform_2(%arg0: i32) -> (i32, i32) {
    %c0_i32 = arith.constant 0 : i32
    %c0_i32_0 = arith.constant 0 : i32
    %c0_i32_1 = arith.constant 0 : i32
    return %c0_i32, %c0_i32_0 : i32, i32
  }
  func.func @transform_3(%arg0: i32) -> (i32, i32) {
    %c0_i32 = arith.constant 0 : i32
    %c0_i32_0 = arith.constant 0 : i32
    %c0_i32_1 = arith.constant 0 : i32
    return %c0_i32, %c0_i32_0 : i32, i32
  }
  func.func @transform_4(%arg0: i32) -> (i32, i32) {
    %c0_i32 = arith.constant 0 : i32
    %c0_i32_0 = arith.constant 0 : i32
    %c0_i32_1 = arith.constant 0 : i32
    return %c0_i32, %c0_i32_0 : i32, i32
  }
  func.func @transform_5(%arg0: i32) -> (i32, i32) {
    %c0_i32 = arith.constant 0 : i32
    %c0_i32_0 = arith.constant 0 : i32
    return %arg0, %c0_i32 : i32, i32
  }
}

module attributes {stable_mosaic.version = 11 : i64} {
  func.func @_linear_kernel(%arg0: i32, %arg1: i32, %arg2: i32, %arg3: memref<16x32xbf16, #tpu.memory_space<vmem>>, %arg4: memref<32x32xbf16, #tpu.memory_space<vmem>>, %arg5: memref<1x32xf32, #tpu.memory_space<vmem>>, %arg6: memref<16x32xbf16, #tpu.memory_space<vmem>>, %arg7: memref<16x32xbf16, #tpu.memory_space<vmem>>, %arg8: memref<16x32xf32, #tpu.memory_space<vmem>>) attributes {dimension_semantics = [#tpu.dimension_semantics<parallel>, #tpu.dimension_semantics<parallel>, #tpu.dimension_semantics<arbitrary>], iteration_bounds = array<i64: 1, 1, 1>, scalar_prefetch = 0 : i64, scratch_operands = 1 : i64, tpu.core_type = #tpu.core_type<tc>, window_params = [{transform_indices = @transform_0, window_bounds = array<i64: 16, 32>}, {transform_indices = @transform_1, window_bounds = array<i64: 32, 32>}, {transform_indices = @transform_2, window_bounds = array<i64: 1, 32>}, {transform_indices = @transform_3, window_bounds = array<i64: 16, 32>}, {transform_indices = @transform_4, window_bounds = array<i64: 16, 32>}]} {
    %c0_i32 = arith.constant 0 : i32
    %0 = arith.cmpi eq, %arg2, %c0_i32 : i32
    %1 = arith.extui %0 : i1 to i32
    %c0_i32_0 = arith.constant 0 : i32
    %2 = arith.cmpi ne, %1, %c0_i32_0 : i32
    scf.if %2 {
      %cst_10 = arith.constant 0.000000e+00 : f32
      %12 = vector.broadcast %cst_10 : f32 to vector<16x32xf32>
      %c0_11 = arith.constant 0 : index
      %c0_12 = arith.constant 0 : index
      %13 = vector.load %arg8[%c0_11, %c0_12] : memref<16x32xf32, #tpu.memory_space<vmem>>, vector<16x32xf32>
      tpu.vector_store %arg8[%c0_11, %c0_12], %12 {strides = array<i32>} : memref<16x32xf32, #tpu.memory_space<vmem>>, vector<16x32xf32>,
    } else {
    }
    %c0 = arith.constant 0 : index
    %c0_1 = arith.constant 0 : index
    %3 = vector.load %arg8[%c0, %c0_1] : memref<16x32xf32, #tpu.memory_space<vmem>>, vector<16x32xf32>
    %c0_2 = arith.constant 0 : index
    %c0_3 = arith.constant 0 : index
    %4 = vector.load %arg3[%c0_2, %c0_3] : memref<16x32xbf16, #tpu.memory_space<vmem>>, vector<16x32xbf16>
    %c0_4 = arith.constant 0 : index
    %c0_5 = arith.constant 0 : index
    %5 = vector.load %arg4[%c0_4, %c0_5] : memref<32x32xbf16, #tpu.memory_space<vmem>>, vector<32x32xbf16>
    %cst = arith.constant dense<0.000000e+00> : vector<16x32xf32>
    %6 = tpu.matmul %4, %5, %cst {dimension_numbers = #tpu.dot_dimension_numbers<[1], [0], [0], [1], [0, 0, 1, 1], [], []>} : vector<16x32xbf16>, vector<32x32xbf16>, vector<16x32xf32> -> vector<16x32xf32>
    %7 = arith.addf %3, %6 : vector<16x32xf32>
    %c0_6 = arith.constant 0 : index
    %c0_7 = arith.constant 0 : index
    %8 = vector.load %arg8[%c0_6, %c0_7] : memref<16x32xf32, #tpu.memory_space<vmem>>, vector<16x32xf32>
    tpu.vector_store %arg8[%c0_6, %c0_7], %7 {strides = array<i32>} : memref<16x32xf32, #tpu.memory_space<vmem>>, vector<16x32xf32>,
    %c0_i32_8 = arith.constant 0 : i32
    %9 = arith.cmpi eq, %arg2, %c0_i32_8 : i32
    %10 = arith.extui %9 : i1 to i32
    %c0_i32_9 = arith.constant 0 : i32
    %11 = arith.cmpi ne, %10, %c0_i32_9 : i32
    scf.if %11 {
      %c0_10 = arith.constant 0 : index
      %c0_11 = arith.constant 0 : index
      %12 = vector.load %arg8[%c0_10, %c0_11] : memref<16x32xf32, #tpu.memory_space<vmem>>, vector<16x32xf32>
      %c0_12 = arith.constant 0 : index
      %c0_13 = arith.constant 0 : index
      %13 = vector.load %arg5[%c0_12, %c0_13] : memref<1x32xf32, #tpu.memory_space<vmem>>, vector<1x32xf32>
      %14 = vector.broadcast %13 : vector<1x32xf32> to vector<16x32xf32>
      %15 = arith.addf %12, %14 : vector<16x32xf32>
      %c0_14 = arith.constant 0 : index
      %c0_15 = arith.constant 0 : index
      %16 = vector.load %arg6[%c0_14, %c0_15] : memref<16x32xbf16, #tpu.memory_space<vmem>>, vector<16x32xbf16>
      %17 = arith.extf %16 : vector<16x32xbf16> to vector<16x32xf32>
      %18 = arith.addf %15, %17 : vector<16x32xf32>
      %19 = arith.truncf %18 : vector<16x32xf32> to vector<16x32xbf16>
      %c0_16 = arith.constant 0 : index
      %c0_17 = arith.constant 0 : index
      %20 = vector.load %arg7[%c0_16, %c0_17] : memref<16x32xbf16, #tpu.memory_space<vmem>>, vector<16x32xbf16>
      tpu.vector_store %arg7[%c0_16, %c0_17], %19 {strides = array<i32>} : memref<16x32xbf16, #tpu.memory_space<vmem>>, vector<16x32xbf16>,
    } else {
    }
    return
  }
  func.func @transform_0(%arg0: i32, %arg1: i32, %arg2: i32) -> (i32, i32) {
    %c0_i32 = arith.constant 0 : i32
    return %arg0, %arg2 : i32, i32
  }
  func.func @transform_1(%arg0: i32, %arg1: i32, %arg2: i32) -> (i32, i32) {
    %c0_i32 = arith.constant 0 : i32
    return %arg2, %arg1 : i32, i32
  }
  func.func @transform_2(%arg0: i32, %arg1: i32, %arg2: i32) -> (i32, i32) {
    %c0_i32 = arith.constant 0 : i32
    %c0_i32_0 = arith.constant 0 : i32
    return %c0_i32, %arg1 : i32, i32
  }
  func.func @transform_3(%arg0: i32, %arg1: i32, %arg2: i32) -> (i32, i32) {
    %c0_i32 = arith.constant 0 : i32
    return %arg0, %arg1 : i32, i32
  }
  func.func @transform_4(%arg0: i32, %arg1: i32, %arg2: i32) -> (i32, i32) {
    %c0_i32 = arith.constant 0 : i32
    return %arg0, %arg1 : i32, i32
  }
}

module attributes {stable_mosaic.version = 11 : i64} {
  func.func @_ffn_kernel(%arg0: i32, %arg1: i32, %arg2: memref<16x32xbf16, #tpu.memory_space<vmem>>, %arg3: memref<1x32xf32, #tpu.memory_space<vmem>>, %arg4: memref<1x32xf32, #tpu.memory_space<vmem>>, %arg5: memref<32x64xbf16, #tpu.memory_space<vmem>>, %arg6: memref<1x64xf32, #tpu.memory_space<vmem>>, %arg7: memref<64x32xbf16, #tpu.memory_space<vmem>>, %arg8: memref<1x32xf32, #tpu.memory_space<vmem>>, %arg9: memref<16x32xbf16, #tpu.memory_space<vmem>>, %arg10: memref<16x32xbf16, #tpu.memory_space<vmem>>, %arg11: memref<16x32xf32, #tpu.memory_space<vmem>>) attributes {dimension_semantics = [#tpu.dimension_semantics<parallel>, #tpu.dimension_semantics<arbitrary>], iteration_bounds = array<i64: 1, 1>, scalar_prefetch = 0 : i64, scratch_operands = 2 : i64, tpu.core_type = #tpu.core_type<tc>, window_params = [{transform_indices = @transform_0, window_bounds = array<i64: 16, 32>}, {pipeline_mode = #tpu.pipeline_mode<synchronous>, transform_indices = @transform_1, window_bounds = array<i64: 1, 32>}, {pipeline_mode = #tpu.pipeline_mode<synchronous>, transform_indices = @transform_2, window_bounds = array<i64: 1, 32>}, {transform_indices = @transform_3, window_bounds = array<i64: 32, 64>}, {transform_indices = @transform_4, window_bounds = array<i64: 1, 64>}, {transform_indices = @transform_5, window_bounds = array<i64: 64, 32>}, {pipeline_mode = #tpu.pipeline_mode<synchronous>, transform_indices = @transform_6, window_bounds = array<i64: 1, 32>}, {transform_indices = @transform_7, window_bounds = array<i64: 16, 32>}]} {
    %c0_i32 = arith.constant 0 : i32
    %0 = arith.cmpi eq, %arg1, %c0_i32 : i32
    %1 = arith.extui %0 : i1 to i32
    %c0_i32_0 = arith.constant 0 : i32
    %2 = arith.cmpi ne, %1, %c0_i32_0 : i32
    scf.if %2 {
      %c0_16 = arith.constant 0 : index
      %c0_17 = arith.constant 0 : index
      %20 = vector.load %arg2[%c0_16, %c0_17] : memref<16x32xbf16, #tpu.memory_space<vmem>>, vector<16x32xbf16>
      %21 = arith.extf %20 : vector<16x32xbf16> to vector<16x32xf32>
      %c0_18 = arith.constant 0 : index
      %c0_19 = arith.constant 0 : index
      %22 = vector.load %arg3[%c0_18, %c0_19] : memref<1x32xf32, #tpu.memory_space<vmem>>, vector<1x32xf32>
      %c0_20 = arith.constant 0 : index
      %c0_21 = arith.constant 0 : index
      %23 = vector.load %arg4[%c0_20, %c0_21] : memref<1x32xf32, #tpu.memory_space<vmem>>, vector<1x32xf32>
      %cst_22 = arith.constant dense<0.000000e+00> : vector<16xf32>
      %24 = vector.multi_reduction <add>, %21, %cst_22 [1] : vector<16x32xf32> to vector<16xf32>
      %25 = vector.shape_cast %24 : vector<16xf32> to vector<16x1xf32>
      %cst_23 = arith.constant 3.200000e+01 : f32
      %26 = vector.broadcast %cst_23 : f32 to vector<16x1xf32>
      %27 = arith.divf %25, %26 : vector<16x1xf32>
      %28 = vector.broadcast %27 : vector<16x1xf32> to vector<16x32xf32>
      %29 = arith.subf %21, %28 : vector<16x32xf32>
      %30 = arith.mulf %29, %29 : vector<16x32xf32>
      %cst_24 = arith.constant dense<0.000000e+00> : vector<16xf32>
      %31 = vector.multi_reduction <add>, %30, %cst_24 [1] : vector<16x32xf32> to vector<16xf32>
      %32 = vector.shape_cast %31 : vector<16xf32> to vector<16x1xf32>
      %cst_25 = arith.constant 3.200000e+01 : f32
      %33 = vector.broadcast %cst_25 : f32 to vector<16x1xf32>
      %34 = arith.divf %32, %33 : vector<16x1xf32>
      %35 = vector.broadcast %27 : vector<16x1xf32> to vector<16x32xf32>
      %36 = arith.subf %21, %35 : vector<16x32xf32>
      %cst_26 = arith.constant 9.99999997E-7 : f32
      %37 = vector.broadcast %cst_26 : f32 to vector<16x1xf32>
      %38 = arith.addf %34, %37 : vector<16x1xf32>
      %39 = math.rsqrt %38 : vector<16x1xf32>
      %40 = vector.broadcast %39 : vector<16x1xf32> to vector<16x32xf32>
      %41 = arith.mulf %36, %40 : vector<16x32xf32>
      %42 = vector.broadcast %22 : vector<1x32xf32> to vector<16x32xf32>
      %43 = arith.mulf %41, %42 : vector<16x32xf32>
      %44 = vector.broadcast %23 : vector<1x32xf32> to vector<16x32xf32>
      %45 = arith.addf %43, %44 : vector<16x32xf32>
      %46 = arith.truncf %45 : vector<16x32xf32> to vector<16x32xbf16>
      %c0_27 = arith.constant 0 : index
      %c0_28 = arith.constant 0 : index
      %47 = vector.load %arg10[%c0_27, %c0_28] : memref<16x32xbf16, #tpu.memory_space<vmem>>, vector<16x32xbf16>
      tpu.vector_store %arg10[%c0_27, %c0_28], %46 {strides = array<i32>} : memref<16x32xbf16, #tpu.memory_space<vmem>>, vector<16x32xbf16>,
      %cst_29 = arith.constant 0.000000e+00 : f32
      %48 = vector.broadcast %cst_29 : f32 to vector<16x32xf32>
      %c0_30 = arith.constant 0 : index
      %c0_31 = arith.constant 0 : index
      %49 = vector.load %arg11[%c0_30, %c0_31] : memref<16x32xf32, #tpu.memory_space<vmem>>, vector<16x32xf32>
      tpu.vector_store %arg11[%c0_30, %c0_31], %48 {strides = array<i32>} : memref<16x32xf32, #tpu.memory_space<vmem>>, vector<16x32xf32>,
    } else {
    }
    %c0 = arith.constant 0 : index
    %c0_1 = arith.constant 0 : index
    %3 = vector.load %arg10[%c0, %c0_1] : memref<16x32xbf16, #tpu.memory_space<vmem>>, vector<16x32xbf16>
    %c0_2 = arith.constant 0 : index
    %c0_3 = arith.constant 0 : index
    %4 = vector.load %arg5[%c0_2, %c0_3] : memref<32x64xbf16, #tpu.memory_space<vmem>>, vector<32x64xbf16>
    %cst = arith.constant dense<0.000000e+00> : vector<16x64xf32>
    %5 = tpu.matmul %3, %4, %cst {dimension_numbers = #tpu.dot_dimension_numbers<[1], [0], [0], [1], [0, 0, 1, 1], [], []>} : vector<16x32xbf16>, vector<32x64xbf16>, vector<16x64xf32> -> vector<16x64xf32>
    %c0_4 = arith.constant 0 : index
    %c0_5 = arith.constant 0 : index
    %6 = vector.load %arg6[%c0_4, %c0_5] : memref<1x64xf32, #tpu.memory_space<vmem>>, vector<1x64xf32>
    %7 = vector.broadcast %6 : vector<1x64xf32> to vector<16x64xf32>
    %8 = arith.addf %5, %7 : vector<16x64xf32>
    %cst_6 = arith.constant 0.000000e+00 : f32
    %9 = vector.broadcast %cst_6 : f32 to vector<16x64xf32>
    %10 = arith.maximumf %8, %9 : vector<16x64xf32>
    %c0_7 = arith.constant 0 : index
    %c0_8 = arith.constant 0 : index
    %11 = vector.load %arg11[%c0_7, %c0_8] : memref<16x32xf32, #tpu.memory_space<vmem>>, vector<16x32xf32>
    %12 = arith.truncf %10 : vector<16x64xf32> to vector<16x64xbf16>
    %c0_9 = arith.constant 0 : index
    %c0_10 = arith.constant 0 : index
    %13 = vector.load %arg7[%c0_9, %c0_10] : memref<64x32xbf16, #tpu.memory_space<vmem>>, vector<64x32xbf16>
    %cst_11 = arith.constant dense<0.000000e+00> : vector<16x32xf32>
    %14 = tpu.matmul %12, %13, %cst_11 {dimension_numbers = #tpu.dot_dimension_numbers<[1], [0], [0], [1], [0, 0, 1, 1], [], []>} : vector<16x64xbf16>, vector<64x32xbf16>, vector<16x32xf32> -> vector<16x32xf32>
    %15 = arith.addf %11, %14 : vector<16x32xf32>
    %c0_12 = arith.constant 0 : index
    %c0_13 = arith.constant 0 : index
    %16 = vector.load %arg11[%c0_12, %c0_13] : memref<16x32xf32, #tpu.memory_space<vmem>>, vector<16x32xf32>
    tpu.vector_store %arg11[%c0_12, %c0_13], %15 {strides = array<i32>} : memref<16x32xf32, #tpu.memory_space<vmem>>, vector<16x32xf32>,
    %c0_i32_14 = arith.constant 0 : i32
    %17 = arith.cmpi eq, %arg1, %c0_i32_14 : i32
    %18 = arith.extui %17 : i1 to i32
    %c0_i32_15 = arith.constant 0 : i32
    %19 = arith.cmpi ne, %18, %c0_i32_15 : i32
    scf.if %19 {
      %c0_16 = arith.constant 0 : index
      %c0_17 = arith.constant 0 : index
      %20 = vector.load %arg11[%c0_16, %c0_17] : memref<16x32xf32, #tpu.memory_space<vmem>>, vector<16x32xf32>
      %c0_18 = arith.constant 0 : index
      %c0_19 = arith.constant 0 : index
      %21 = vector.load %arg8[%c0_18, %c0_19] : memref<1x32xf32, #tpu.memory_space<vmem>>, vector<1x32xf32>
      %22 = vector.broadcast %21 : vector<1x32xf32> to vector<16x32xf32>
      %23 = arith.addf %20, %22 : vector<16x32xf32>
      %c0_20 = arith.constant 0 : index
      %c0_21 = arith.constant 0 : index
      %24 = vector.load %arg2[%c0_20, %c0_21] : memref<16x32xbf16, #tpu.memory_space<vmem>>, vector<16x32xbf16>
      %25 = arith.extf %24 : vector<16x32xbf16> to vector<16x32xf32>
      %26 = arith.addf %23, %25 : vector<16x32xf32>
      %27 = arith.truncf %26 : vector<16x32xf32> to vector<16x32xbf16>
      %c0_22 = arith.constant 0 : index
      %c0_23 = arith.constant 0 : index
      %28 = vector.load %arg9[%c0_22, %c0_23] : memref<16x32xbf16, #tpu.memory_space<vmem>>, vector<16x32xbf16>
      tpu.vector_store %arg9[%c0_22, %c0_23], %27 {strides = array<i32>} : memref<16x32xbf16, #tpu.memory_space<vmem>>, vector<16x32xbf16>,
    } else {
    }
    return
  }
  func.func @transform_0(%arg0: i32, %arg1: i32) -> (i32, i32) {
    %c0_i32 = arith.constant 0 : i32
    %c0_i32_0 = arith.constant 0 : i32
    return %arg0, %c0_i32 : i32, i32
  }
  func.func @transform_1(%arg0: i32, %arg1: i32) -> (i32, i32) {
    %c0_i32 = arith.constant 0 : i32
    %c0_i32_0 = arith.constant 0 : i32
    %c0_i32_1 = arith.constant 0 : i32
    return %c0_i32, %c0_i32_0 : i32, i32
  }
  func.func @transform_2(%arg0: i32, %arg1: i32) -> (i32, i32) {
    %c0_i32 = arith.constant 0 : i32
    %c0_i32_0 = arith.constant 0 : i32
    %c0_i32_1 = arith.constant 0 : i32
    return %c0_i32, %c0_i32_0 : i32, i32
  }
  func.func @transform_3(%arg0: i32, %arg1: i32) -> (i32, i32) {
    %c0_i32 = arith.constant 0 : i32
    %c0_i32_0 = arith.constant 0 : i32
    return %c0_i32, %arg1 : i32, i32
  }
  func.func @transform_4(%arg0: i32, %arg1: i32) -> (i32, i32) {
    %c0_i32 = arith.constant 0 : i32
    %c0_i32_0 = arith.constant 0 : i32
    return %c0_i32, %arg1 : i32, i32
  }
  func.func @transform_5(%arg0: i32, %arg1: i32) -> (i32, i32) {
    %c0_i32 = arith.constant 0 : i32
    %c0_i32_0 = arith.constant 0 : i32
    return %arg1, %c0_i32 : i32, i32
  }
  func.func @transform_6(%arg0: i32, %arg1: i32) -> (i32, i32) {
    %c0_i32 = arith.constant 0 : i32
    %c0_i32_0 = arith.constant 0 : i32
    %c0_i32_1 = arith.constant 0 : i32
    return %c0_i32, %c0_i32_0 : i32, i32
  }
  func.func @transform_7(%arg0: i32, %arg1: i32) -> (i32, i32) {
    %c0_i32 = arith.constant 0 : i32
    %c0_i32_0 = arith.constant 0 : i32
    return %arg0, %c0_i32 : i32, i32
  }
}

module attributes {stable_mosaic.version = 11 : i64} {
  func.func @_ln_qkv_kernel(%arg0: i32, %arg1: memref<16x32xbf16, #tpu.memory_space<vmem>>, %arg2: memref<1x32xf32, #tpu.memory_space<vmem>>, %arg3: memref<1x32xf32, #tpu.memory_space<vmem>>, %arg4: memref<32x96xbf16, #tpu.memory_space<vmem>>, %arg5: memref<1x96xf32, #tpu.memory_space<vmem>>, %arg6: memref<16x32xbf16, #tpu.memory_space<vmem>>, %arg7: memref<16x64xbf16, #tpu.memory_space<vmem>>) attributes {dimension_semantics = [#tpu.dimension_semantics<parallel>], iteration_bounds = array<i64: 1>, scalar_prefetch = 0 : i64, scratch_operands = 0 : i64, tpu.core_type = #tpu.core_type<tc>, window_params = [{transform_indices = @transform_0, window_bounds = array<i64: 16, 32>}, {pipeline_mode = #tpu.pipeline_mode<synchronous>, transform_indices = @transform_1, window_bounds = array<i64: 1, 32>}, {pipeline_mode = #tpu.pipeline_mode<synchronous>, transform_indices = @transform_2, window_bounds = array<i64: 1, 32>}, {pipeline_mode = #tpu.pipeline_mode<synchronous>, transform_indices = @transform_3, window_bounds = array<i64: 32, 96>}, {pipeline_mode = #tpu.pipeline_mode<synchronous>, transform_indices = @transform_4, window_bounds = array<i64: 1, 96>}, {transform_indices = @transform_5, window_bounds = array<i64: 16, 32>}, {transform_indices = @transform_6, window_bounds = array<i64: 16, 64>}]} {
    %c0 = arith.constant 0 : index
    %c0_0 = arith.constant 0 : index
    %0 = vector.load %arg1[%c0, %c0_0] : memref<16x32xbf16, #tpu.memory_space<vmem>>, vector<16x32xbf16>
    %1 = arith.extf %0 : vector<16x32xbf16> to vector<16x32xf32>
    %c0_1 = arith.constant 0 : index
    %c0_2 = arith.constant 0 : index
    %2 = vector.load %arg2[%c0_1, %c0_2] : memref<1x32xf32, #tpu.memory_space<vmem>>, vector<1x32xf32>
    %c0_3 = arith.constant 0 : index
    %c0_4 = arith.constant 0 : index
    %3 = vector.load %arg3[%c0_3, %c0_4] : memref<1x32xf32, #tpu.memory_space<vmem>>, vector<1x32xf32>
    %cst = arith.constant dense<0.000000e+00> : vector<16xf32>
    %4 = vector.multi_reduction <add>, %1, %cst [1] : vector<16x32xf32> to vector<16xf32>
    %5 = vector.shape_cast %4 : vector<16xf32> to vector<16x1xf32>
    %cst_5 = arith.constant 3.200000e+01 : f32
    %6 = vector.broadcast %cst_5 : f32 to vector<16x1xf32>
    %7 = arith.divf %5, %6 : vector<16x1xf32>
    %8 = vector.broadcast %7 : vector<16x1xf32> to vector<16x32xf32>
    %9 = arith.subf %1, %8 : vector<16x32xf32>
    %10 = arith.mulf %9, %9 : vector<16x32xf32>
    %cst_6 = arith.constant dense<0.000000e+00> : vector<16xf32>
    %11 = vector.multi_reduction <add>, %10, %cst_6 [1] : vector<16x32xf32> to vector<16xf32>
    %12 = vector.shape_cast %11 : vector<16xf32> to vector<16x1xf32>
    %cst_7 = arith.constant 3.200000e+01 : f32
    %13 = vector.broadcast %cst_7 : f32 to vector<16x1xf32>
    %14 = arith.divf %12, %13 : vector<16x1xf32>
    %15 = vector.broadcast %7 : vector<16x1xf32> to vector<16x32xf32>
    %16 = arith.subf %1, %15 : vector<16x32xf32>
    %cst_8 = arith.constant 9.99999997E-7 : f32
    %17 = vector.broadcast %cst_8 : f32 to vector<16x1xf32>
    %18 = arith.addf %14, %17 : vector<16x1xf32>
    %19 = math.rsqrt %18 : vector<16x1xf32>
    %20 = vector.broadcast %19 : vector<16x1xf32> to vector<16x32xf32>
    %21 = arith.mulf %16, %20 : vector<16x32xf32>
    %22 = vector.broadcast %2 : vector<1x32xf32> to vector<16x32xf32>
    %23 = arith.mulf %21, %22 : vector<16x32xf32>
    %24 = vector.broadcast %3 : vector<1x32xf32> to vector<16x32xf32>
    %25 = arith.addf %23, %24 : vector<16x32xf32>
    %26 = arith.truncf %25 : vector<16x32xf32> to vector<16x32xbf16>
    %c0_9 = arith.constant 0 : index
    %c0_10 = arith.constant 0 : index
    %27 = vector.load %arg4[%c0_9, %c0_10] : memref<32x96xbf16, #tpu.memory_space<vmem>>, vector<32x96xbf16>
    %cst_11 = arith.constant dense<0.000000e+00> : vector<16x96xf32>
    %28 = tpu.matmul %26, %27, %cst_11 {dimension_numbers = #tpu.dot_dimension_numbers<[1], [0], [0], [1], [0, 0, 1, 1], [], []>} : vector<16x32xbf16>, vector<32x96xbf16>, vector<16x96xf32> -> vector<16x96xf32>
    %c0_12 = arith.constant 0 : index
    %c0_13 = arith.constant 0 : index
    %29 = vector.load %arg5[%c0_12, %c0_13] : memref<1x96xf32, #tpu.memory_space<vmem>>, vector<1x96xf32>
    %30 = vector.broadcast %29 : vector<1x96xf32> to vector<16x96xf32>
    %31 = arith.addf %28, %30 : vector<16x96xf32>
    %32 = vector.extract_strided_slice %31 {offsets = [0, 0], sizes = [16, 32], strides = [1, 1]} : vector<16x96xf32> to vector<16x32xf32>
    %cst_14 = arith.constant 0.353553385 : f32
    %33 = vector.broadcast %cst_14 : f32 to vector<16x32xf32>
    %34 = arith.mulf %32, %33 : vector<16x32xf32>
    %35 = arith.truncf %34 : vector<16x32xf32> to vector<16x32xbf16>
    %c0_15 = arith.constant 0 : index
    %c0_16 = arith.constant 0 : index
    %36 = vector.load %arg6[%c0_15, %c0_16] : memref<16x32xbf16, #tpu.memory_space<vmem>>, vector<16x32xbf16>
    tpu.vector_store %arg6[%c0_15, %c0_16], %35 {strides = array<i32>} : memref<16x32xbf16, #tpu.memory_space<vmem>>, vector<16x32xbf16>,
    %37 = vector.extract_strided_slice %31 {offsets = [0, 32], sizes = [16, 64], strides = [1, 1]} : vector<16x96xf32> to vector<16x64xf32>
    %38 = arith.truncf %37 : vector<16x64xf32> to vector<16x64xbf16>
    %c0_17 = arith.constant 0 : index
    %c0_18 = arith.constant 0 : index
    %39 = vector.load %arg7[%c0_17, %c0_18] : memref<16x64xbf16, #tpu.memory_space<vmem>>, vector<16x64xbf16>
    tpu.vector_store %arg7[%c0_17, %c0_18], %38 {strides = array<i32>} : memref<16x64xbf16, #tpu.memory_space<vmem>>, vector<16x64xbf16>,
    return
  }
  func.func @transform_0(%arg0: i32) -> (i32, i32) {
    %c0_i32 = arith.constant 0 : i32
    %c0_i32_0 = arith.constant 0 : i32
    return %arg0, %c0_i32 : i32, i32
  }
  func.func @transform_1(%arg0: i32) -> (i32, i32) {
    %c0_i32 = arith.constant 0 : i32
    %c0_i32_0 = arith.constant 0 : i32
    %c0_i32_1 = arith.constant 0 : i32
    return %c0_i32, %c0_i32_0 : i32, i32
  }
  func.func @transform_2(%arg0: i32) -> (i32, i32) {
    %c0_i32 = arith.constant 0 : i32
    %c0_i32_0 = arith.constant 0 : i32
    %c0_i32_1 = arith.constant 0 : i32
    return %c0_i32, %c0_i32_0 : i32, i32
  }
  func.func @transform_3(%arg0: i32) -> (i32, i32) {
    %c0_i32 = arith.constant 0 : i32
    %c0_i32_0 = arith.constant 0 : i32
    %c0_i32_1 = arith.constant 0 : i32
    return %c0_i32, %c0_i32_0 : i32, i32
  }
  func.func @transform_4(%arg0: i32) -> (i32, i32) {
    %c0_i32 = arith.constant 0 : i32
    %c0_i32_0 = arith.constant 0 : i32
    %c0_i32_1 = arith.constant 0 : i32
    return %c0_i32, %c0_i32_0 : i32, i32
  }
  func.func @transform_5(%arg0: i32) -> (i32, i32) {
    %c0_i32 = arith.constant 0 : i32
    %c0_i32_0 = arith.constant 0 : i32
    return %arg0, %c0_i32 : i32, i32
  }
  func.func @transform_6(%arg0: i32) -> (i32, i32) {
    %c0_i32 = arith.constant 0 : i32
    %c0_i32_0 = arith.constant 0 : i32
    return %arg0, %c0_i32 : i32, i32
  }
}

module attributes {stable_mosaic.version = 11 : i64} {
  func.func @_linear_kernel(%arg0: i32, %arg1: i32, %arg2: i32, %arg3: memref<16x32xbf16, #tpu.memory_space<vmem>>, %arg4: memref<32x64xbf16, #tpu.memory_space<vmem>>, %arg5: memref<1x64xf32, #tpu.memory_space<vmem>>, %arg6: memref<16x64xbf16, #tpu.memory_space<vmem>>, %arg7: memref<16x64xf32, #tpu.memory_space<vmem>>) attributes {dimension_semantics = [#tpu.dimension_semantics<parallel>, #tpu.dimension_semantics<parallel>, #tpu.dimension_semantics<arbitrary>], iteration_bounds = array<i64: 1, 1, 1>, scalar_prefetch = 0 : i64, scratch_operands = 1 : i64, tpu.core_type = #tpu.core_type<tc>, window_params = [{transform_indices = @transform_0, window_bounds = array<i64: 16, 32>}, {transform_indices = @transform_1, window_bounds = array<i64: 32, 64>}, {transform_indices = @transform_2, window_bounds = array<i64: 1, 64>}, {transform_indices = @transform_3, window_bounds = array<i64: 16, 64>}]} {
    %c0_i32 = arith.constant 0 : i32
    %0 = arith.cmpi eq, %arg2, %c0_i32 : i32
    %1 = arith.extui %0 : i1 to i32
    %c0_i32_0 = arith.constant 0 : i32
    %2 = arith.cmpi ne, %1, %c0_i32_0 : i32
    scf.if %2 {
      %cst_10 = arith.constant 0.000000e+00 : f32
      %12 = vector.broadcast %cst_10 : f32 to vector<16x64xf32>
      %c0_11 = arith.constant 0 : index
      %c0_12 = arith.constant 0 : index
      %13 = vector.load %arg7[%c0_11, %c0_12] : memref<16x64xf32, #tpu.memory_space<vmem>>, vector<16x64xf32>
      tpu.vector_store %arg7[%c0_11, %c0_12], %12 {strides = array<i32>} : memref<16x64xf32, #tpu.memory_space<vmem>>, vector<16x64xf32>,
    } else {
    }
    %c0 = arith.constant 0 : index
    %c0_1 = arith.constant 0 : index
    %3 = vector.load %arg7[%c0, %c0_1] : memref<16x64xf32, #tpu.memory_space<vmem>>, vector<16x64xf32>
    %c0_2 = arith.constant 0 : index
    %c0_3 = arith.constant 0 : index
    %4 = vector.load %arg3[%c0_2, %c0_3] : memref<16x32xbf16, #tpu.memory_space<vmem>>, vector<16x32xbf16>
    %c0_4 = arith.constant 0 : index
    %c0_5 = arith.constant 0 : index
    %5 = vector.load %arg4[%c0_4, %c0_5] : memref<32x64xbf16, #tpu.memory_space<vmem>>, vector<32x64xbf16>
    %cst = arith.constant dense<0.000000e+00> : vector<16x64xf32>
    %6 = tpu.matmul %4, %5, %cst {dimension_numbers = #tpu.dot_dimension_numbers<[1], [0], [0], [1], [0, 0, 1, 1], [], []>} : vector<16x32xbf16>, vector<32x64xbf16>, vector<16x64xf32> -> vector<16x64xf32>
    %7 = arith.addf %3, %6 : vector<16x64xf32>
    %c0_6 = arith.constant 0 : index
    %c0_7 = arith.constant 0 : index
    %8 = vector.load %arg7[%c0_6, %c0_7] : memref<16x64xf32, #tpu.memory_space<vmem>>, vector<16x64xf32>
    tpu.vector_store %arg7[%c0_6, %c0_7], %7 {strides = array<i32>} : memref<16x64xf32, #tpu.memory_space<vmem>>, vector<16x64xf32>,
    %c0_i32_8 = arith.constant 0 : i32
    %9 = arith.cmpi eq, %arg2, %c0_i32_8 : i32
    %10 = arith.extui %9 : i1 to i32
    %c0_i32_9 = arith.constant 0 : i32
    %11 = arith.cmpi ne, %10, %c0_i32_9 : i32
    scf.if %11 {
      %c0_10 = arith.constant 0 : index
      %c0_11 = arith.constant 0 : index
      %12 = vector.load %arg7[%c0_10, %c0_11] : memref<16x64xf32, #tpu.memory_space<vmem>>, vector<16x64xf32>
      %c0_12 = arith.constant 0 : index
      %c0_13 = arith.constant 0 : index
      %13 = vector.load %arg5[%c0_12, %c0_13] : memref<1x64xf32, #tpu.memory_space<vmem>>, vector<1x64xf32>
      %14 = vector.broadcast %13 : vector<1x64xf32> to vector<16x64xf32>
      %15 = arith.addf %12, %14 : vector<16x64xf32>
      %16 = arith.truncf %15 : vector<16x64xf32> to vector<16x64xbf16>
      %c0_14 = arith.constant 0 : index
      %c0_15 = arith.constant 0 : index
      %17 = vector.load %arg6[%c0_14, %c0_15] : memref<16x64xbf16, #tpu.memory_space<vmem>>, vector<16x64xbf16>
      tpu.vector_store %arg6[%c0_14, %c0_15], %16 {strides = array<i32>} : memref<16x64xbf16, #tpu.memory_space<vmem>>, vector<16x64xbf16>,
    } else {
    }
    return
  }
  func.func @transform_0(%arg0: i32, %arg1: i32, %arg2: i32) -> (i32, i32) {
    %c0_i32 = arith.constant 0 : i32
    return %arg0, %arg2 : i32, i32
  }
  func.func @transform_1(%arg0: i32, %arg1: i32, %arg2: i32) -> (i32, i32) {
    %c0_i32 = arith.constant 0 : i32
    return %arg2, %arg1 : i32, i32
  }
  func.func @transform_2(%arg0: i32, %arg1: i32, %arg2: i32) -> (i32, i32) {
    %c0_i32 = arith.constant 0 : i32
    %c0_i32_0 = arith.constant 0 : i32
    return %c0_i32, %arg1 : i32, i32
  }
  func.func @transform_3(%arg0: i32, %arg1: i32, %arg2: i32) -> (i32, i32) {
    %c0_i32 = arith.constant 0 : i32
    return %arg0, %arg1 : i32, i32
  }
}

module attributes {stable_mosaic.version = 11 : i64} {
  func.func @_ln_proj_kernel(%arg0: i32, %arg1: i32, %arg2: memref<16x32xbf16, #tpu.memory_space<vmem>>, %arg3: memref<1x32xf32, #tpu.memory_space<vmem>>, %arg4: memref<1x32xf32, #tpu.memory_space<vmem>>, %arg5: memref<32x60xbf16, #tpu.memory_space<vmem>>, %arg6: memref<16x60xf32, #tpu.memory_space<vmem>>) attributes {dimension_semantics = [#tpu.dimension_semantics<parallel>, #tpu.dimension_semantics<parallel>], iteration_bounds = array<i64: 1, 1>, scalar_prefetch = 0 : i64, scratch_operands = 0 : i64, tpu.core_type = #tpu.core_type<tc>, window_params = [{transform_indices = @transform_0, window_bounds = array<i64: 16, 32>}, {pipeline_mode = #tpu.pipeline_mode<synchronous>, transform_indices = @transform_1, window_bounds = array<i64: 1, 32>}, {pipeline_mode = #tpu.pipeline_mode<synchronous>, transform_indices = @transform_2, window_bounds = array<i64: 1, 32>}, {transform_indices = @transform_3, window_bounds = array<i64: 32, 60>}, {transform_indices = @transform_4, window_bounds = array<i64: 16, 60>}]} {
    %c0 = arith.constant 0 : index
    %c0_0 = arith.constant 0 : index
    %0 = vector.load %arg2[%c0, %c0_0] : memref<16x32xbf16, #tpu.memory_space<vmem>>, vector<16x32xbf16>
    %1 = arith.extf %0 : vector<16x32xbf16> to vector<16x32xf32>
    %c0_1 = arith.constant 0 : index
    %c0_2 = arith.constant 0 : index
    %2 = vector.load %arg3[%c0_1, %c0_2] : memref<1x32xf32, #tpu.memory_space<vmem>>, vector<1x32xf32>
    %c0_3 = arith.constant 0 : index
    %c0_4 = arith.constant 0 : index
    %3 = vector.load %arg4[%c0_3, %c0_4] : memref<1x32xf32, #tpu.memory_space<vmem>>, vector<1x32xf32>
    %cst = arith.constant dense<0.000000e+00> : vector<16xf32>
    %4 = vector.multi_reduction <add>, %1, %cst [1] : vector<16x32xf32> to vector<16xf32>
    %5 = vector.shape_cast %4 : vector<16xf32> to vector<16x1xf32>
    %cst_5 = arith.constant 3.200000e+01 : f32
    %6 = vector.broadcast %cst_5 : f32 to vector<16x1xf32>
    %7 = arith.divf %5, %6 : vector<16x1xf32>
    %8 = vector.broadcast %7 : vector<16x1xf32> to vector<16x32xf32>
    %9 = arith.subf %1, %8 : vector<16x32xf32>
    %10 = arith.mulf %9, %9 : vector<16x32xf32>
    %cst_6 = arith.constant dense<0.000000e+00> : vector<16xf32>
    %11 = vector.multi_reduction <add>, %10, %cst_6 [1] : vector<16x32xf32> to vector<16xf32>
    %12 = vector.shape_cast %11 : vector<16xf32> to vector<16x1xf32>
    %cst_7 = arith.constant 3.200000e+01 : f32
    %13 = vector.broadcast %cst_7 : f32 to vector<16x1xf32>
    %14 = arith.divf %12, %13 : vector<16x1xf32>
    %15 = vector.broadcast %7 : vector<16x1xf32> to vector<16x32xf32>
    %16 = arith.subf %1, %15 : vector<16x32xf32>
    %cst_8 = arith.constant 9.99999997E-7 : f32
    %17 = vector.broadcast %cst_8 : f32 to vector<16x1xf32>
    %18 = arith.addf %14, %17 : vector<16x1xf32>
    %19 = math.rsqrt %18 : vector<16x1xf32>
    %20 = vector.broadcast %19 : vector<16x1xf32> to vector<16x32xf32>
    %21 = arith.mulf %16, %20 : vector<16x32xf32>
    %22 = vector.broadcast %2 : vector<1x32xf32> to vector<16x32xf32>
    %23 = arith.mulf %21, %22 : vector<16x32xf32>
    %24 = vector.broadcast %3 : vector<1x32xf32> to vector<16x32xf32>
    %25 = arith.addf %23, %24 : vector<16x32xf32>
    %26 = arith.truncf %25 : vector<16x32xf32> to vector<16x32xbf16>
    %c0_9 = arith.constant 0 : index
    %c0_10 = arith.constant 0 : index
    %27 = vector.load %arg5[%c0_9, %c0_10] : memref<32x60xbf16, #tpu.memory_space<vmem>>, vector<32x60xbf16>
    %cst_11 = arith.constant dense<0.000000e+00> : vector<16x60xf32>
    %28 = tpu.matmul %26, %27, %cst_11 {dimension_numbers = #tpu.dot_dimension_numbers<[1], [0], [0], [1], [0, 0, 1, 1], [], []>} : vector<16x32xbf16>, vector<32x60xbf16>, vector<16x60xf32> -> vector<16x60xf32>
    %c0_12 = arith.constant 0 : index
    %c0_13 = arith.constant 0 : index
    %29 = vector.load %arg6[%c0_12, %c0_13] : memref<16x60xf32, #tpu.memory_space<vmem>>, vector<16x60xf32>
    tpu.vector_store %arg6[%c0_12, %c0_13], %28 {strides = array<i32>} : memref<16x60xf32, #tpu.memory_space<vmem>>, vector<16x60xf32>,
    return
  }
  func.func @transform_0(%arg0: i32, %arg1: i32) -> (i32, i32) {
    %c0_i32 = arith.constant 0 : i32
    %c0_i32_0 = arith.constant 0 : i32
    return %arg0, %c0_i32 : i32, i32
  }
  func.func @transform_1(%arg0: i32, %arg1: i32) -> (i32, i32) {
    %c0_i32 = arith.constant 0 : i32
    %c0_i32_0 = arith.constant 0 : i32
    %c0_i32_1 = arith.constant 0 : i32
    return %c0_i32, %c0_i32_0 : i32, i32
  }
  func.func @transform_2(%arg0: i32, %arg1: i32) -> (i32, i32) {
    %c0_i32 = arith.constant 0 : i32
    %c0_i32_0 = arith.constant 0 : i32
    %c0_i32_1 = arith.constant 0 : i32
    return %c0_i32, %c0_i32_0 : i32, i32
  }
  func.func @transform_3(%arg0: i32, %arg1: i32) -> (i32, i32) {
    %c0_i32 = arith.constant 0 : i32
    %c0_i32_0 = arith.constant 0 : i32
    return %c0_i32, %arg1 : i32, i32
  }
  func.func @transform_4(%arg0: i32, %arg1: i32) -> (i32, i32) {
    %c0_i32 = arith.constant 0 : i32
    return %arg0, %arg1 : i32, i32
  }
}

</mosaic_0001>

<bundles_post_ra>
// kernel: seq2seq_transformer_forward.28
= control target key start
LH: loop header
LB: loop body
LE: loop exit
PB: predicated region body
PF: predicated region fallthrough
CT: control target
= control target key end

     0   :  { %vm22_vm0 = vcmask 261120   ;;  %v120_v1 = vmov 0.0   ;;  %vm91_vm1 = vcmask 257024   ;;  %s172_s1 = inlined_call_operand.vmem [shape: bf16[32,32], index: 1, kind: input, shape index: {}]   ;;  %s173_s2 = inlined_call_operand.vmem [shape: f32[1,32], index: 2, kind: input, shape index: {}]   ;;  %s174_s0 = inlined_call_operand.vmem [shape: bf16[16,32], index: 0, kind: input, shape index: {}]   ;;  %s175_s3 = inlined_call_operand.vmem [shape: bf16[16,32], index: 3, kind: input, shape index: {}]   ;;  %s176_s4 = inlined_call_operand.vmem [shape: bf16[16,32], index: 4, kind: output, shape index: {}]  }
   0x1   :  { %v113_v0 = vld [vmem:[%s172_s1 + $0x8] sm:$0xff]  ;;  %23 = vst.msk [vmem:[#allocation2] sm:$0xff] %vm22_vm0, %v120_v1  ;;  %v112_v2 = vld [vmem:[%s172_s1] sm:$0xff] }
   0x2   :  { %24 = vst.msk [vmem:[#allocation2 + $0x8] sm:$0xff] %vm22_vm0, %v120_v1  ;;  %60 = vmatpush.bf16.msra.mxu0 %v113_v0  ;;  %v111_v3 = vld [vmem:[%s174_s0] sm:$0xff] }
   0x3   :  { %v115_v7 = vld [vmem:[%s175_s3] sm:$0xff]  }
   0x4   :  { %v119_v9 = vld [vmem:[%s173_s2] ss:$0 sm:$0xff]  ;;  %v116_v11 = vunpack.c.l.bf16 %v115_v7  ;;  %v117_v17 = vunpack.c.h.bf16 %v115_v7 }
   0x6   :  { %61 = vmatpush.bf16.msra.mxu0 %v112_v2 }
   0x8   :  { %v25_v4 = vld [vmem:[#allocation2] sm:$0xff] }
   0x9   :  { %110 = vmatmul.msk.bf16.vlgmr.msra.gmra.mxu0 %vm22_vm0, %v111_v3  ;;  %v26_v8 = vld [vmem:[#allocation2 + $0x8] sm:$0xff] }
  0x86   :  { %v63_v5 = vpop.f32.mrf.mxu0 }
  0x87   :  { %v68_v6 = vadd.f32 %v63_v5, %v25_v4 }
  0x89   :  { %70 = vst.msk [vmem:[#allocation2] sm:$0xff] %vm22_vm0, %v68_v6 }
  0x8e   :  { %v65_v10 = vpop.f32.mrf.mxu0 }
  0x8f   :  { %v69_v12 = vadd.f32 %v65_v10, %v26_v8 }
  0x90   :  { %v75_v13 = vld [vmem:[#allocation2] sm:$0xff] }
  0x91   :  { %v81_v14 = vadd.f32 %v119_v9, %v75_v13  ;;  %71 = vst.msk [vmem:[#allocation2 + $0x8] sm:$0xff] %vm22_vm0, %v69_v12 }
  0x93   :  { %v87_v15 = vadd.f32 %v116_v11, %v81_v14 }
  0x95   :  { %v89_v16 = vpack.c.bf16 %v87_v15, %v87_v15 }
  0x97   :  { %92 = vst.msk [vmem:[%s176_s4] sm:$0xf] %vm91_vm1, %v89_v16 }
  0x98   :  { %v76_v18 = vld [vmem:[#allocation2 + $0x8] sm:$0xff] }
  0x99   :  { %v82_v19 = vadd.f32 %v119_v9, %v76_v18 }
  0x9b   :  { %v88_v20 = vadd.f32 %v117_v17, %v82_v19 }
  0x9d   :  { %v90_v21 = vpack.c.bf16 %v88_v20, %v88_v20 }
  0x9f   :  { %93 = vst.msk [vmem:[%s176_s4 + $0x4] sm:$0xf] %vm91_vm1, %v90_v21 }

// kernel: seq2seq_transformer_forward.26
= control target key start
LH: loop header
LB: loop body
LE: loop exit
PB: predicated region body
PF: predicated region fallthrough
CT: control target
= control target key end

     0   :  { %vm29_vm0 = vcmask 261120   ;;  %v183_v5 = vmov 32.0   ;;  %vm133_vm8 = vcmask 257024   ;;  %vm146_vm9 = vcmask 519168   ;;  %s255_s0 = inlined_call_operand.vmem [shape: bf16[16,32], index: 0, kind: input, shape index: {}]   ;;  %s256_s1 = inlined_call_operand.vmem [shape: f32[1,32], index: 1, kind: input, shape index: {}]   ;;  %s257_s2 = inlined_call_operand.vmem [shape: f32[1,32], index: 2, kind: input, shape index: {}]   ;;  %s258_s4 = inlined_call_operand.vmem [shape: f32[1,96], index: 4, kind: input, shape index: {}]   ;;  %s259_s3 = inlined_call_operand.vmem [shape: bf16[32,96], index: 3, kind: input, shape index: {}]   ;;  %s260_s5 = inlined_call_operand.vmem [shape: bf16[16,32], index: 5, kind: output, shape index: {0}]   ;;  %s261_s6 = inlined_call_operand.vmem [shape: bf16[16,64], index: 6, kind: output, shape index: {1}]  }
   0x1   :  { %v169_v0 = vld [vmem:[%s255_s0] sm:$0xff]   ;;  %177 = vrcp.f32 %v183_v5  ;;  %v167_v22 = vld [vmem:[%s259_s3 + $0x8] sm:$0xff] }
   0x2   :  { %v170_v1 = vunpack.c.l.bf16 %v169_v0  ;;  %v171_v3 = vunpack.c.h.bf16 %v169_v0  ;;  %121 = vmatpush.bf16.msra.mxu0 %v167_v22  ;;  %v166_v24 = vld [vmem:[%s259_s3] sm:$0xff] }
   0x3   :  { %v174_v43 = vld [vmem:[%s256_s1] ss:$0 sm:$0xff]  ;;  %s184_s1 = smov 96  }
   0x4   :  { %v30_v2 = vsel %vm29_vm0, %v170_v1, 0.0  ;;  %v33_v4 = vsel %vm29_vm0, %v171_v3, 0.0  ;;  %v175_v48 = vld [vmem:[%s257_s2] ss:$0 sm:$0xff] }
   0x5   :  { %31 = vadd.xlane.f32.xlu0 %v30_v2  ;;  %v176_v53 = vld [vmem:[%s258_s4] ss:$0 sm:$0xff] }
   0x6   :  { %122 = vmatpush.bf16.msra.mxu0 %v166_v24 }
   0x7   :  { %v178_v6 = vpop.eup %177 }
   0x8   :  { %v37_v7 = vmul.f32 32.0, %v178_v6  ;;  %vm41_vm1 = vweird.f32 %v178_v6 }
   0xa   :  { %v38_v8 = vsub.f32 1.0, %v37_v7 }
   0xc   :  { %v39_v9 = vmul.f32 %v178_v6, %v38_v8 }
   0xd   :  { %34 = vadd.xlane.f32.xlu0 %v33_v4 }
   0xe   :  { %v40_v10 = vadd.f32 %v178_v6, %v39_v9 }
  0x10   :  { %v42_v11 = vsel %vm41_vm1, %v178_v6, %v40_v10 }
  0x78   :  { %v32_v12 = vpop.xlane.xlu0 %31 }
  0x79   :  { %v43_v13 = vmul.f32 %v42_v11, %v32_v12 }
  0x7b   :  { %v45_v14 = vsub.f32 %v170_v1, %v43_v13 }
  0x7d   :  { %v47_v15 = vmul.f32 %v45_v14, %v45_v14 }
  0x7f   :  { %v49_v16 = vsel %vm29_vm0, %v47_v15, 0.0 }
  0x80   :  { %50 = vadd.xlane.f32.xlu1 %v49_v16  ;;  %v35_v17 = vpop.xlane.xlu0 %34 }
  0x81   :  { %v44_v18 = vmul.f32 %v42_v11, %v35_v17 }
  0x83   :  { %v46_v19 = vsub.f32 %v171_v3, %v44_v18 }
  0x85   :  { %v48_v20 = vmul.f32 %v46_v19, %v46_v19 }
  0x87   :  { %v52_v21 = vsel %vm29_vm0, %v48_v20, 0.0 }
  0x88   :  { %53 = vadd.xlane.f32.xlu1 %v52_v21 }
  0xf3   :  { %v51_v23 = vpop.xlane.xlu1 %50 }
  0xf4   :  { %v55_v25 = vmul.f32 %v51_v23, %v42_v11 }
  0xf6   :  { %v57_v26 = vadd.f32 1e-06, %v55_v25 }
  0xf8   :  { %179 = vrsqrt.f32 %v57_v26  ;;  %vm65_vm3 = vweird.f32 %v57_v26 }
  0xfb   :  { %v54_v27 = vpop.xlane.xlu1 %53 }
  0xfc   :  { %v56_v28 = vmul.f32 %v54_v27, %v42_v11 }
  0xfe   :  { %v180_v29 = vpop.eup %179  ;;  %v58_v30 = vadd.f32 1e-06, %v56_v28 }
  0xff   :  { %v60_v31 = vmul.f32 %v180_v29, %v57_v26  ;;  %vm66_vm2 = vweird.f32 %v180_v29 }
 0x100   :  { %181 = vrsqrt.f32 %v58_v30  ;;  %vm67_vm4 = vmor %vm65_vm3, %vm66_vm2  ;;  %vm75_vm6 = vweird.f32 %v58_v30 }
 0x101   :  { %v61_v32 = vmul.f32 %v180_v29, %v60_v31 }
 0x103   :  { %v62_v33 = vmul.f32 0.5, %v61_v32 }
 0x105   :  { %v63_v34 = vsub.f32 1.5, %v62_v33 }
 0x106   :  { %v182_v35 = vpop.eup %181 }
 0x107   :  { %v64_v36 = vmul.f32 %v180_v29, %v63_v34  ;;  %v70_v37 = vmul.f32 %v182_v35, %v58_v30  ;;  %vm76_vm5 = vweird.f32 %v182_v35 }
 0x108   :  { %vm77_vm7 = vmor %vm75_vm6, %vm76_vm5 }
 0x109   :  { %v71_v38 = vmul.f32 %v182_v35, %v70_v37  ;;  %v68_v39 = vsel %vm67_vm4, %v180_v29, %v64_v36 }
 0x10a   :  { %v79_v42 = vmul.f32 %v68_v39, %v45_v14 }
 0x10b   :  { %v72_v40 = vmul.f32 0.5, %v71_v38 }
 0x10c   :  { %v84_v47 = vmul.f32 %v174_v43, %v79_v42 }
 0x10d   :  { %v73_v41 = vsub.f32 1.5, %v72_v40 }
 0x10e   :  { %v89_v50 = vadd.f32 %v175_v48, %v84_v47 }
 0x10f   :  { %v74_v44 = vmul.f32 %v182_v35, %v73_v41 }
 0x111   :  { %v78_v45 = vsel %vm77_vm7, %v182_v35, %v74_v44 }
 0x112   :  { %v80_v46 = vmul.f32 %v78_v45, %v46_v19 }
 0x114   :  { %v85_v49 = vmul.f32 %v174_v43, %v80_v46 }
 0x116   :  { %v90_v51 = vadd.f32 %v175_v48, %v85_v49 }
 0x118   :  { %v91_v52 = vpack.c.bf16 %v90_v51, %v89_v50 }
 0x11a   :  { %165 = vmatmul.msk.bf16.vlgmr.msra.gmra.mxu0 %vm29_vm0, %v91_v52 }
 0x197   :  { %v124_v54 = vpop.f32.mrf.mxu0 }
 0x198   :  { %v125_v55 = vadd.f32 %v176_v53, %v124_v54 }
 0x19a   :  { %v129_v56 = vmul.f32 0.35355338, %v125_v55  ;;  %v136_v57 = vpack.c.bf16 %v125_v55, %v125_v55 }
 0x19c   :  { %v131_v58 = vpack.c.bf16 %v129_v56, %v129_v56  ;;  %140 = vrot.lane.b32.xlu2 %v136_v57, %s184_s1 }
 0x19e   :  { %134 = vst.msk [vmem:[%s260_s5] sm:$0xf] %vm133_vm8, %v131_v58 }
 0x19f   :  { %v126_v59 = vpop.f32.mrf.mxu0 }
 0x1a0   :  { %v127_v60 = vadd.f32 %v176_v53, %v126_v59 }
 0x1a2   :  { %v130_v61 = vmul.f32 0.35355338, %v127_v60  ;;  %v137_v62 = vpack.c.bf16 %v127_v60, %v127_v60 }
 0x1a4   :  { %v132_v63 = vpack.c.bf16 %v130_v61, %v130_v61  ;;  %142 = vrot.lane.b32.xlu2 %v137_v62, %s184_s1 }
 0x1a6   :  { %135 = vst.msk [vmem:[%s260_s5 + $0x4] sm:$0xf] %vm133_vm8, %v132_v63 }
 0x1f6   :  { %v141_v0 = vpop.permute.xlu2 %140 }
 0x1f7   :  { %147 = vst.msk [vmem:[%s261_s6] sm:$0xf] %vm146_vm9, %v141_v0 }
 0x1fe   :  { %v143_v1 = vpop.permute.xlu2 %142 }
 0x1ff   :  { %148 = vst.msk [vmem:[%s261_s6 + $0x4] sm:$0xf] %vm146_vm9, %v143_v1 }

// kernel: seq2seq_transformer_forward.27
= control target key start
LH: loop header
LB: loop body
LE: loop exit
PB: predicated region body
PF: predicated region fallthrough
CT: control target
= control target key end

     0   :  { %s647_s15 = smov [#allocation3]   ;;  %s765_s0 = inlined_call_operand.vmem [shape: s32[2], index: 0, kind: input, shape index: {}]   ;;  %s766_s1 = inlined_call_operand.vmem [shape: bf16[2,8,32], index: 1, kind: input, shape index: {}]   ;;  %s767_s2 = inlined_call_operand.vmem [shape: bf16[2,8,64], index: 2, kind: input, shape index: {}]   ;;  %s768_s3 = inlined_call_operand.vmem [shape: bf16[2,8,32], index: 3, kind: output, shape index: {}]  }
   0x1   :  { %s9_s14 = sshll.u32 %s765_s0, 4  ;;  %s10_s14 = int_to_ptr.vmem [resolvable:$true] %s9_s14 }
   0x2   :  { %12 = dma.vmem_to_smem %s10_s14, 16, %s647_s15, [#allocation2] }
   0x3   :  { %633 = dma.done.wait [#allocation2], 16 }
   0x4   :  { %634 = vsyncadd [#allocation2], 4294967280 }
   0x5   :  { %15 = sfence }
   0x6   :  { %s682_s16 = smov 0   ;;  %s684_s17 = smov 0  }
   0x7   :  { %s686_s18 = smov 0  }
   0x8 LB: > { %s33_s0 = sadd.s32 1, %s641_s17  ;;  %p543_p0 = scmp.ge.s32.totalorder %s645_s18, 1  ;;  %s645_s18 = sphi %s686_s18, %s21_s18   ;;  %s641_s17 = sphi %s684_s17, %s770_s17   ;;  %s637_s16 = sphi %s682_s16, %s769_s16  }
   0x9   : > { %p35_p1 = scmp.ge.s32.totalorder %s33_s0, 2  ;;  %p148_p2 = scmp.lt.s32.totalorder %s645_s18, 3 }
   0xb   : > { %s772_s0 = smov (%p35_p1, %s33_s0), 0  ;;  %p149_p3 = pnand %p543_p0, %p148_p2 }
   0xc   : > { %p178_p4 = scmp.lt.s32.totalorder (!%p149_p3), %s637_s16, 1  ;;  %s648_s27 = smov (!%p149_p3), 96  }
   0xd   : > { %152 = sbr.rel (%p149_p3) target bundleno = 1086 (0x43e), region = 28  ;;  %s649_s28 = smov (!%p149_p3), 112  }
   0xe   : > { %s650_s29 = smov (!%p149_p3), 104   ;;  %s197_s30 = sld [smem:[#allocation3 + %s637_s16]] (!%p149_p3) }
   0xf   : > { %s652_s4 = smov (!%p149_p3), 120   ;;  %s653_s5 = smov (!%p149_p3), 88  }
  0x10   : > { %s654_s6 = smov (!%p149_p3), 80   ;;  %s655_s7 = smov (!%p149_p3), 72  }
  0x11   : > { %s656_s8 = smov (!%p149_p3), 8   ;;  %s657_s9 = smov (!%p149_p3), 24  }
  0x12   : > { %s179_s19 = scalar_select %p178_p4, %s637_s16, 1  ;;  %vm205_vm0 = vcmask 64512   ;;  %v198_v7 = vlaneseq  ;;  %v651_v10 = vmov -1e+30   ;;  %vm245_vm2 = vcmask 1043456  }
  0x13   : > { %s658_s10 = smov 16   ;;  %vm446_vm3 = vcmask 130048   ;;  %vm448_vm4 = vcmask 195584   ;;  %vm451_vm5 = vcmask 257024  }
  0x14   : > { %s704_s20 = sshll.u32 %s179_s19, 2  ;;  %v199_v8 = vand.u32 127, %v198_v7  ;;  %v200_v9 = vstv %s197_s30 }
  0x15   : > { %s188_s23 = scalar_lea.vmem %s767_s2, %s704_s20  ;;  %s184_s26 = scalar_lea.vmem %s766_s1, %s704_s20 }
  0x16   : > { %v204_v0 = vld [vmem:[%s188_s23] sm:$0xf]  ;;  %vm201_vm1 = vcmp.lt.s32.totalorder %v199_v8, %v200_v9  ;;  %s195_s13 = scalar_lea.vmem %s768_s3, %s704_s20 }
  0x17   : > { %v210_v1 = vsel %vm205_vm0, %v204_v0, 0  ;;  %v203_v2 = vld [vmem:[%s184_s26] sm:$0xf]  ;;  %v238_v3 = vunpack.c.l.b16 %v204_v0  ;;  %v202_v11 = vsel %vm201_vm1, 0.0, %v651_v10 }
  0x18   : > { %219 = vmatpush.bf16.xpose.msra.mxu0 %v210_v1  ;;  %v263_v5 = vunpack.c.l.b16 %v203_v2 }
  0x19   : > { %v716_v4 = vpack.c.b16 %v238_v3, %v238_v3 }
  0x1a   : > { %v264_v6 = vpack.c.b16 %v263_v5, %v263_v5 }
  0x1b   : > { %240 = vrot.lane.b32.xlu2 %v716_v4, %s648_s27 }
  0x1f   : > { %547 = vmatmul.msk.bf16.vlgmr.msra.gmra.mxu0 %vm205_vm0, %v203_v2 }
  0x23   : > { %323 = vrot.lane.b32.xlu2 %v716_v4, %s649_s28 }
  0x2b   : > { %379 = vrot.lane.b32.xlu2 %v716_v4, %s650_s29 }
  0x33   : > { %321 = vrot.lane.b32.xlu2 %v264_v6, %s649_s28 }
  0x75   : > { %v241_v16 = vpop.permute.xlu2 %240 }
  0x76   : > { %v247_v27 = vsel %vm245_vm2, %v241_v16, 0 }
  0x77   : > { %256 = vmatpush.bf16.msra.mxu1 %v247_v27 }
  0x7d   : > { %v324_v17 = vpop.permute.xlu2 %323 }
  0x7e   : > { %v329_v28 = vsel %vm205_vm0, %v324_v17, 0 }
  0x7f   : > { %338 = vmatpush.bf16.xpose.msrb.mxu1 %v329_v28 }
  0x85   : > { %v380_v21 = vpop.permute.xlu2 %379 }
  0x86   : > { %v385_v22 = vsel %vm205_vm0, %v380_v21, 0 }
  0x87   : > { %394 = vmatpush.bf16.xpose.msrb.mxu0 %v385_v22 }
  0x8d   : > { %v322_v35 = vpop.permute.xlu2 %321 }
  0x9c   : > { %v221_v12 = vpop.f32.mrf.mxu0 }
  0x9d   : > { %v222_v13 = vadd.f32 %v221_v12, %v202_v11 }
  0x9f   : > { %v225_v14 = vsel %vm205_vm0, %v222_v13, -inf }
  0xa0   : > { %226 = vmax.xlane.f32.xlu0 %v225_v14 }
  0xa4   : > { %v223_v15 = vpop.f32.mrf.mxu0 }
  0xb4   : > { %267 = vrot.lane.b32.xlu0 %v716_v4, %s652_s4 }
  0xbc   : > { %377 = vrot.lane.b32.xlu0 %v264_v6, %s650_s29 }
 0x113   : > { %v227_v18 = vpop.xlane.xlu0 %226 }
 0x114   : > { %v228_v19 = vsub.f32 %v222_v13, %v227_v18 }
 0x116   : > { %v229_v20 = vmul.f32 1.442695, %v228_v19 }
 0x118   : > { %593 = vpow2.f32 %v229_v20 }
 0x11e   : > { %v594_v23 = vpop.eup %593 }
 0x11f   : > { %v231_v24 = vsel %vm205_vm0, %v594_v23, 0.0 }
 0x120   : > { %232 = vadd.xlane.f32.xlu1 %v231_v24 }
 0x126   : > { %v268_v25 = vpop.permute.xlu0 %267 }
 0x127   : > { %v273_v29 = vsel %vm205_vm0, %v268_v25, 0 }
 0x128   : > { %282 = vmatpush.bf16.xpose.msra.mxu2 %v273_v29 }
 0x12e   : > { %v378_v26 = vpop.permute.xlu0 %377 }
 0x12f   : > { %553 = vmatmul.msk.bf16.vlgmr.msrb.gmra.mxu0 %vm205_vm0, %v378_v26 }
 0x139   : > { %265 = vrot.lane.b32.xlu1 %v264_v6, %s652_s4 }
 0x193   : > { %v233_v30 = vpop.xlane.xlu1 %232 }
 0x194   : > { %595 = vrcp.f32 %v233_v30 }
 0x19a   : > { %v596_v31 = vpop.eup %595 }
 0x19b   : > { %v235_v32 = vmul.f32 %v596_v31, %v594_v23 }
 0x19d   : > { %v236_v33 = vpack.c.bf16 %v235_v32, %v235_v32 }
 0x19f   : > { %548 = vmatmul.msk.bf16.vlgmr.msra.gmra.mxu1 %vm205_vm0, %v236_v33 }
 0x1ab   : > { %v266_v34 = vpop.permute.xlu1 %265 }
 0x1ac   : > { %549 = vmatmul.msk.bf16.vlgmr.msra.gmra.mxu2 %vm205_vm0, %v266_v34  ;;  %v396_v36 = vpop.f32.mrf.mxu0 }
 0x1ad   : > { %v397_v37 = vadd.f32 %v396_v36, %v202_v11 }
 0x1af   : > { %551 = vmatmul.msk.bf16.vlgmr.msrb.gmra.mxu1 %vm205_vm0, %v322_v35  ;;  %v400_v38 = vsel %vm205_vm0, %v397_v37, -inf }
 0x1b0   : > { %401 = vmax.xlane.f32.xlu0 %v400_v38 }
 0x1b4   : > { %v398_v39 = vpop.f32.mrf.mxu0 }
 0x21c   : > { %v734_v40 = vpop.f32.mrf.mxu1 }
 0x223   : > { %v402_v52 = vpop.xlane.xlu0 %401 }
 0x224   : > { %v260_v41 = vpop.f32.mrf.mxu1  ;;  %v403_v56 = vsub.f32 %v397_v37, %v402_v52 }
 0x226   : > { %v404_v58 = vmul.f32 1.442695, %v403_v56 }
 0x22c   : > { %v340_v42 = vpop.f32.mrf.mxu1 }
 0x22d   : > { %v341_v43 = vadd.f32 %v340_v42, %v202_v11 }
 0x22f   : > { %v284_v44 = vpop.f32.mrf.mxu2  ;;  %v344_v45 = vsel %vm205_vm0, %v341_v43, -inf }
 0x230   : > { %v285_v46 = vadd.f32 %v284_v44, %v202_v11  ;;  %345 = vmax.xlane.f32.xlu1 %v344_v45 }
 0x232   : > { %v288_v47 = vsel %vm205_vm0, %v285_v46, -inf }
 0x233   : > { %289 = vmax.xlane.f32.xlu2 %v288_v47 }
 0x234   : > { %v342_v48 = vpop.f32.mrf.mxu1 }
 0x237   : > { %v286_v49 = vpop.f32.mrf.mxu2 }
 0x249   : > { %300 = vrot.lane.b32.xlu1 %v716_v4, %s653_s5 }
 0x2a3   : > { %v346_v50 = vpop.xlane.xlu1 %345 }
 0x2a4   : > { %v347_v51 = vsub.f32 %v341_v43, %v346_v50 }
 0x2a6   : > { %v348_v53 = vmul.f32 1.442695, %v347_v51  ;;  %v290_v54 = vpop.xlane.xlu2 %289 }
 0x2a7   : > { %v291_v55 = vsub.f32 %v285_v46, %v290_v54 }
 0x2a8   : > { %597 = vpow2.f32 %v348_v53 }
 0x2a9   : > { %v292_v57 = vmul.f32 1.442695, %v291_v55 }
 0x2ab   : > { %599 = vpow2.f32 %v292_v57 }
 0x2ac   : > { %601 = vpow2.f32 %v404_v58 }
 0x2ae   : > { %v598_v59 = vpop.eup %597 }
 0x2af   : > { %v350_v60 = vsel %vm205_vm0, %v598_v59, 0.0 }
 0x2b0   : > { %351 = vadd.xlane.f32.xlu0 %v350_v60 }
 0x2b1   : > { %v600_v61 = vpop.eup %599 }
 0x2b2   : > { %v294_v62 = vsel %vm205_vm0, %v600_v61, 0.0  ;;  %v602_v63 = vpop.eup %601 }
 0x2b3   : > { %295 = vadd.xlane.f32.xlu2 %v294_v62  ;;  %v406_v0 = vsel %vm205_vm0, %v602_v63, 0.0 }
 0x2bb   : > { %407 = vadd.xlane.f32.xlu2 %v406_v0  ;;  %v301_v1 = vpop.permute.xlu1 %300 }
 0x2bc   : > { %v306_v2 = vsel %vm245_vm2, %v301_v1, 0 }
 0x2bd   : > { %315 = vmatpush.bf16.msra.mxu3 %v306_v2 }
 0x2c4   : > { %356 = vrot.lane.b32.xlu0 %v716_v4, %s654_s6 }
 0x2d3   : > { %412 = vrot.lane.b32.xlu2 %v716_v4, %s655_s7 }
 0x323   : > { %v352_v6 = vpop.xlane.xlu0 %351 }
 0x326   : > { %v296_v3 = vpop.xlane.xlu2 %295 }
 0x327   : > { %603 = vrcp.f32 %v296_v3 }
 0x32d   : > { %v604_v5 = vpop.eup %603 }
 0x32e   : > { %v408_v7 = vpop.xlane.xlu2 %407  ;;  %v298_v8 = vmul.f32 %v604_v5, %v600_v61 }
 0x32f   : > { %605 = vrcp.f32 %v408_v7 }
 0x330   : > { %v299_v9 = vpack.c.bf16 %v298_v8, %v298_v8  ;;  %607 = vrcp.f32 %v352_v6 }
 0x332   : > { %550 = vmatmul.msk.bf16.vlgmr.msra.gmra.mxu3 %vm205_vm0, %v299_v9 }
 0x335   : > { %v606_v10 = vpop.eup %605 }
 0x336   : > { %v410_v11 = vmul.f32 %v606_v10, %v602_v63  ;;  %v413_v12 = vpop.permute.xlu2 %412  ;;  %v357_v13 = vpop.permute.xlu0 %356 }
 0x337   : > { %v362_v4 = vsel %vm245_vm2, %v357_v13, 0  ;;  %v418_v14 = vsel %vm245_vm2, %v413_v12, 0  ;;  %v608_v16 = vpop.eup %607 }
 0x338   : > { %371 = vmatpush.bf16.msrb.mxu3 %v362_v4  ;;  %427 = vmatpush.bf16.msrb.mxu2 %v418_v14  ;;  %v411_v15 = vpack.c.bf16 %v410_v11, %v410_v11  ;;  %v354_v17 = vmul.f32 %v608_v16, %v598_v59 }
 0x33a   : > { %v355_v18 = vpack.c.bf16 %v354_v17, %v354_v17 }
 0x33b   : > { %554 = vmatmul.msk.bf16.vlgmr.msrb.gmra.mxu2 %vm205_vm0, %v411_v15 }
 0x342   : > { %552 = vmatmul.msk.bf16.vlgmr.msrb.gmra.mxu3 %vm205_vm0, %v355_v18 }
 0x3b5   : > { %v317_v19 = vpop.f32.mrf.mxu3 }
 0x3b6   : > { %434 = vrot.lane.b32.xlu1 %v317_v19, %s656_s8 }
 0x3bd   : > { %v319_v20 = vpop.f32.mrf.mxu3 }
 0x3be   : > { %v429_v21 = vpop.f32.mrf.mxu2 }
 0x3bf   : > { %442 = vrot.lane.b32.xlu1 %v429_v21, %s657_s9 }
 0x3c5   : > { %v373_v22 = vpop.f32.mrf.mxu3 }
 0x3c6   : > { %v431_v23 = vpop.f32.mrf.mxu2  ;;  %438 = vrot.lane.b32.xlu0 %v373_v22, %s658_s10 }
 0x3cd   : > { %v375_v24 = vpop.f32.mrf.mxu3 }
 0x428   : > { %v435_v25 = vpop.permute.xlu1 %434 }
 0x429   : > { %v445_v26 = vsel %vm205_vm0, %v734_v40, %v435_v25 }
 0x431   : > { %v443_v28 = vpop.permute.xlu1 %442 }
 0x438   : > { %v439_v27 = vpop.permute.xlu0 %438 }
 0x439   : > { %v447_v29 = vsel %vm446_vm3, %v445_v26, %v439_v27 }
 0x43a   : > { %v449_v30 = vsel %vm448_vm4, %v447_v29, %v443_v28 }
 0x43b   : > { %v450_v31 = vpack.c.bf16 %v449_v30, %v449_v30 }
 0x43d   : > { %452 = vst.msk [vmem:[%s195_s13] sm:$0xf] %vm451_vm5, %v450_v31 }
 0x43e PF: > { %s21_s18 = sadd.s32 1, %s645_s18   ;;  %s769_s16 = smov %s641_s17 }
 0x43f   : > { %p18_p5 = scmp.ge.s32.totalorder %s21_s18, 4   ;;  %s770_s17 = smov %s772_s0 }
 0x441   :  { %20 = sbr.rel (!%p18_p5) target bundleno = 8 (0x8), region = 61 }

// kernel: seq2seq_transformer_forward.29
= control target key start
LH: loop header
LB: loop body
LE: loop exit
PB: predicated region body
PF: predicated region fallthrough
CT: control target
= control target key end

     0   :  { %vm37_vm0 = vcmask 261120   ;;  %v293_v5 = vmov 32.0   ;;  %vm101_vm6 = vcmask 257024   ;;  %v294_v59 = vmov 0.0   ;;  %s397_s0 = inlined_call_operand.vmem [shape: bf16[16,32], index: 0, kind: input, shape index: {}]   ;;  %s398_s1 = inlined_call_operand.vmem [shape: f32[1,32], index: 1, kind: input, shape index: {}]   ;;  %s399_s2 = inlined_call_operand.vmem [shape: f32[1,32], index: 2, kind: input, shape index: {}]   ;;  %s400_s4 = inlined_call_operand.vmem [shape: f32[1,64], index: 4, kind: input, shape index: {}]   ;;  %s401_s3 = inlined_call_operand.vmem [shape: bf16[32,64], index: 3, kind: input, shape index: {}]   ;;  %s402_s6 = inlined_call_operand.vmem [shape: f32[1,32], index: 6, kind: input, shape index: {}]   ;;  %s403_s5 = inlined_call_operand.vmem [shape: bf16[64,32], index: 5, kind: input, shape index: {}]   ;;  %s404_s7 = inlined_call_operand.vmem [shape: bf16[16,32], index: 7, kind: output, shape index: {}]  }
   0x1   :  { %v274_v0 = vld [vmem:[%s397_s0] sm:$0xff]   ;;  %287 = vrcp.f32 %v293_v5  ;;  %v268_v25 = vld [vmem:[%s401_s3 + $0x8] sm:$0xff]  ;;  %v272_v55 = vld [vmem:[%s403_s5 + $0x18] sm:$0xff]  ;;  %104 = vst.msk [vmem:[#allocation3] sm:$0xff] %vm37_vm0, %v294_v59  ;;  %vm188_vm9 = vcmask 523264  }
   0x2   :  { %v338_v1 = vunpack.c.l.bf16 %v274_v0  ;;  %v342_v3 = vunpack.c.h.bf16 %v274_v0  ;;  %143 = vmatpush.bf16.msra.mxu0 %v268_v25  ;;  %v267_v28 = vld [vmem:[%s401_s3] sm:$0xff]  ;;  %196 = vmatpush.bf16.msra.mxu1 %v272_v55  ;;  %v271_v56 = vld [vmem:[%s403_s5 + $0x10] sm:$0xff]  ;;  %v270_v57 = vld [vmem:[%s403_s5 + $0x8] sm:$0xff]  ;;  %105 = vst.msk [vmem:[#allocation3 + $0x8] sm:$0xff] %vm37_vm0, %v294_v59 }
   0x3   :  { %v283_v38 = vld [vmem:[%s398_s1] ss:$0 sm:$0xff] }
   0x4   :  { %v38_v2 = vsel %vm37_vm0, %v338_v1, 0.0  ;;  %v41_v4 = vsel %vm37_vm0, %v342_v3, 0.0  ;;  %v284_v41 = vld [vmem:[%s399_s2] ss:$0 sm:$0xff] }
   0x5   :  { %39 = vadd.xlane.f32.xlu0 %v38_v2  ;;  %v269_v58 = vld [vmem:[%s403_s5] sm:$0xff] }
   0x6   :  { %144 = vmatpush.bf16.msra.mxu0 %v267_v28  ;;  %197 = vmatpush.bf16.msra.mxu1 %v271_v56  ;;  %v285_v61 = vld [vmem:[%s400_s4] ss:$0 sm:$0xff] }
   0x7   :  { %v288_v6 = vpop.eup %287 }
   0x8   :  { %v45_v7 = vmul.f32 32.0, %v288_v6  ;;  %vm49_vm1 = vweird.f32 %v288_v6 }
   0xa   :  { %v46_v8 = vsub.f32 1.0, %v45_v7  ;;  %198 = vmatpush.bf16.msra.mxu1 %v270_v57 }
   0xc   :  { %v47_v9 = vmul.f32 %v288_v6, %v46_v8 }
   0xd   :  { %42 = vadd.xlane.f32.xlu0 %v41_v4 }
   0xe   :  { %v48_v10 = vadd.f32 %v288_v6, %v47_v9  ;;  %199 = vmatpush.bf16.msra.mxu1 %v269_v58  ;;  %v154_v9 = vld [vmem:[#allocation3 + $0x8] sm:$0xff] }
  0x10   :  { %v50_v11 = vsel %vm49_vm1, %v288_v6, %v48_v10  ;;  %v153_v6 = vld [vmem:[#allocation3] sm:$0xff]  ;;  %v286_v10 = vld [vmem:[%s402_s6] ss:$0 sm:$0xff] }
  0x78   :  { %v40_v12 = vpop.xlane.xlu0 %39 }
  0x79   :  { %v51_v13 = vmul.f32 %v50_v11, %v40_v12 }
  0x7b   :  { %v53_v14 = vsub.f32 %v338_v1, %v51_v13 }
  0x7d   :  { %v55_v15 = vmul.f32 %v53_v14, %v53_v14 }
  0x7f   :  { %v57_v16 = vsel %vm37_vm0, %v55_v15, 0.0 }
  0x80   :  { %58 = vadd.xlane.f32.xlu1 %v57_v16  ;;  %v43_v17 = vpop.xlane.xlu0 %42 }
  0x81   :  { %v52_v18 = vmul.f32 %v50_v11, %v43_v17 }
  0x83   :  { %v54_v19 = vsub.f32 %v342_v3, %v52_v18 }
  0x85   :  { %v56_v20 = vmul.f32 %v54_v19, %v54_v19 }
  0x87   :  { %v60_v21 = vsel %vm37_vm0, %v56_v20, 0.0 }
  0x88   :  { %61 = vadd.xlane.f32.xlu1 %v60_v21 }
  0xf3   :  { %v59_v22 = vpop.xlane.xlu1 %58 }
  0xf4   :  { %v63_v23 = vmul.f32 %v59_v22, %v50_v11 }
  0xf6   :  { %v65_v24 = vadd.f32 1e-06, %v63_v23 }
  0xf8   :  { %289 = vrsqrt.f32 %v65_v24  ;;  %vm73_vm3 = vweird.f32 %v65_v24 }
  0xfb   :  { %v62_v26 = vpop.xlane.xlu1 %61 }
  0xfc   :  { %v64_v27 = vmul.f32 %v62_v26, %v50_v11 }
  0xfe   :  { %v290_v29 = vpop.eup %289  ;;  %v66_v30 = vadd.f32 1e-06, %v64_v27 }
  0xff   :  { %v68_v31 = vmul.f32 %v290_v29, %v65_v24  ;;  %vm74_vm2 = vweird.f32 %v290_v29 }
 0x100   :  { %291 = vrsqrt.f32 %v66_v30  ;;  %vm75_vm4 = vmor %vm73_vm3, %vm74_vm2  ;;  %vm83_vm7 = vweird.f32 %v66_v30 }
 0x101   :  { %v69_v32 = vmul.f32 %v290_v29, %v68_v31 }
 0x103   :  { %v70_v33 = vmul.f32 0.5, %v69_v32 }
 0x105   :  { %v71_v34 = vsub.f32 1.5, %v70_v33 }
 0x106   :  { %v292_v35 = vpop.eup %291 }
 0x107   :  { %v72_v36 = vmul.f32 %v290_v29, %v71_v34  ;;  %v78_v37 = vmul.f32 %v292_v35, %v66_v30  ;;  %vm84_vm5 = vweird.f32 %v292_v35 }
 0x108   :  { %vm85_vm8 = vmor %vm83_vm7, %vm84_vm5 }
 0x109   :  { %v76_v39 = vsel %vm75_vm4, %v290_v29, %v72_v36  ;;  %v79_v40 = vmul.f32 %v292_v35, %v78_v37 }
 0x10a   :  { %v87_v42 = vmul.f32 %v76_v39, %v53_v14 }
 0x10b   :  { %v80_v43 = vmul.f32 0.5, %v79_v40 }
 0x10c   :  { %v92_v44 = vmul.f32 %v283_v38, %v87_v42 }
 0x10d   :  { %v81_v45 = vsub.f32 1.5, %v80_v43 }
 0x10e   :  { %v97_v46 = vadd.f32 %v284_v41, %v92_v44 }
 0x10f   :  { %v82_v47 = vmul.f32 %v292_v35, %v81_v45 }
 0x110   :  { %v99_v48 = vpack.c.bf16 %v97_v46, %v97_v46 }
 0x111   :  { %v86_v49 = vsel %vm85_vm8, %v292_v35, %v82_v47 }
 0x112   :  { %102 = vst.msk [vmem:[#allocation2] sm:$0xf] %vm101_vm6, %v99_v48  ;;  %v88_v50 = vmul.f32 %v86_v49, %v54_v19 }
 0x114   :  { %v93_v51 = vmul.f32 %v283_v38, %v88_v50 }
 0x116   :  { %v98_v52 = vadd.f32 %v284_v41, %v93_v51 }
 0x118   :  { %v100_v53 = vpack.c.bf16 %v98_v52, %v98_v52 }
 0x11a   :  { %103 = vst.msk [vmem:[#allocation2 + $0x4] sm:$0xf] %vm101_vm6, %v100_v53 }
 0x121   :  { %v266_v54 = vld [vmem:[#allocation2] sm:$0xff] }
 0x122   :  { %248 = vmatmul.msk.bf16.vlgmr.msra.gmra.mxu0 %vm37_vm0, %v266_v54 }
 0x19f   :  { %v146_v60 = vpop.f32.mrf.mxu0 }
 0x1a0   :  { %v147_v62 = vadd.f32 %v285_v61, %v146_v60 }
 0x1a2   :  { %v151_v2 = vmax.f32 %v147_v62, 0.0 }
 0x1a7   :  { %v148_v63 = vpop.f32.mrf.mxu0 }
 0x1a8   :  { %v149_v0 = vadd.f32 %v285_v61, %v148_v63 }
 0x1aa   :  { %v152_v4 = vmax.f32 %v149_v0, 0.0 }
 0x1ac   :  { %v155_v5 = vpack.c.bf16 %v152_v4, %v151_v2 }
 0x1ae   :  { %265 = vmatmul.msk.bf16.vlgmr.msra.gmra.mxu1 %vm188_vm9, %v155_v5 }
 0x22b   :  { %v201_v7 = vpop.f32.mrf.mxu1 }
 0x22c   :  { %v206_v8 = vadd.f32 %v201_v7, %v153_v6 }
 0x22e   :  { %208 = vst.msk [vmem:[#allocation3] sm:$0xff] %vm37_vm0, %v206_v8 }
 0x233   :  { %v203_v11 = vpop.f32.mrf.mxu1 }
 0x234   :  { %v207_v12 = vadd.f32 %v203_v11, %v154_v9 }
 0x235   :  { %v213_v13 = vld [vmem:[#allocation3] sm:$0xff] }
 0x236   :  { %v219_v14 = vadd.f32 %v286_v10, %v213_v13  ;;  %209 = vst.msk [vmem:[#allocation3 + $0x8] sm:$0xff] %vm37_vm0, %v207_v12 }
 0x238   :  { %v225_v15 = vadd.f32 %v338_v1, %v219_v14 }
 0x23a   :  { %v227_v16 = vpack.c.bf16 %v225_v15, %v225_v15 }
 0x23c   :  { %230 = vst.msk [vmem:[%s404_s7] sm:$0xf] %vm101_vm6, %v227_v16 }
 0x23d   :  { %v214_v17 = vld [vmem:[#allocation3 + $0x8] sm:$0xff] }
 0x23e   :  { %v220_v18 = vadd.f32 %v286_v10, %v214_v17 }
 0x240   :  { %v226_v19 = vadd.f32 %v342_v3, %v220_v18 }
 0x242   :  { %v228_v20 = vpack.c.bf16 %v226_v19, %v226_v19 }
 0x244   :  { %231 = vst.msk [vmem:[%s404_s7 + $0x4] sm:$0xf] %vm101_vm6, %v228_v20 }

// kernel: seq2seq_transformer_forward.39
= control target key start
LH: loop header
LB: loop body
LE: loop exit
PB: predicated region body
PF: predicated region fallthrough
CT: control target
= control target key end

     0   :  { %vm19_vm0 = vcmask 523264   ;;  %v108_v1 = vmov 0.0   ;;  %vm47_vm1 = vcmask 261120   ;;  %vm83_vm2 = vcmask 519168   ;;  %s151_s1 = inlined_call_operand.vmem [shape: bf16[32,64], index: 1, kind: input, shape index: {}]   ;;  %s152_s2 = inlined_call_operand.vmem [shape: f32[1,64], index: 2, kind: input, shape index: {}]   ;;  %s153_s0 = inlined_call_operand.vmem [shape: bf16[16,32], index: 0, kind: input, shape index: {}]   ;;  %s154_s3 = inlined_call_operand.vmem [shape: bf16[16,64], index: 3, kind: output, shape index: {}]  }
   0x1   :  { %v105_v0 = vld [vmem:[%s151_s1 + $0x8] sm:$0xff]  ;;  %20 = vst.msk [vmem:[#allocation2] sm:$0xff] %vm19_vm0, %v108_v1  ;;  %v104_v2 = vld [vmem:[%s151_s1] sm:$0xff] }
   0x2   :  { %21 = vst.msk [vmem:[#allocation2 + $0x8] sm:$0xff] %vm19_vm0, %v108_v1  ;;  %57 = vmatpush.bf16.msra.mxu0 %v105_v0  ;;  %v103_v3 = vld [vmem:[%s153_s0] sm:$0xff] }
   0x3   :  { %v107_v8 = vld [vmem:[%s152_s2] ss:$0 sm:$0xff] }
   0x6   :  { %58 = vmatpush.bf16.msra.mxu0 %v104_v2 }
   0x8   :  { %v22_v4 = vld [vmem:[#allocation2] sm:$0xff] }
   0x9   :  { %102 = vmatmul.msk.bf16.vlgmr.msra.gmra.mxu0 %vm47_vm1, %v103_v3  ;;  %v23_v7 = vld [vmem:[#allocation2 + $0x8] sm:$0xff] }
  0x86   :  { %v60_v5 = vpop.f32.mrf.mxu0 }
  0x87   :  { %v65_v6 = vadd.f32 %v60_v5, %v22_v4 }
  0x89   :  { %68 = vst.msk [vmem:[#allocation2] sm:$0xff] %vm19_vm0, %v65_v6 }
  0x8e   :  { %v62_v9 = vpop.f32.mrf.mxu0 }
  0x8f   :  { %v66_v10 = vadd.f32 %v62_v9, %v23_v7 }
  0x90   :  { %v73_v11 = vld [vmem:[#allocation2] sm:$0xff] }
  0x91   :  { %v79_v12 = vadd.f32 %v107_v8, %v73_v11  ;;  %69 = vst.msk [vmem:[#allocation2 + $0x8] sm:$0xff] %vm19_vm0, %v66_v10 }
  0x93   :  { %v81_v13 = vpack.c.bf16 %v79_v12, %v79_v12 }
  0x95   :  { %84 = vst.msk [vmem:[%s154_s3] sm:$0xf] %vm83_vm2, %v81_v13 }
  0x98   :  { %v74_v14 = vld [vmem:[#allocation2 + $0x8] sm:$0xff] }
  0x99   :  { %v80_v15 = vadd.f32 %v107_v8, %v74_v14 }
  0x9b   :  { %v82_v16 = vpack.c.bf16 %v80_v15, %v80_v15 }
  0x9d   :  { %85 = vst.msk [vmem:[%s154_s3 + $0x4] sm:$0xf] %vm83_vm2, %v82_v16 }

// kernel: seq2seq_transformer_forward.34
= control target key start
LH: loop header
LB: loop body
LE: loop exit
PB: predicated region body
PF: predicated region fallthrough
CT: control target
= control target key end

     0   :  { %vm20_vm0 = vcmask 261120   ;;  %v104_v5 = vmov 32.0   ;;  %vm84_vm6 = vcmask 257024   ;;  %s144_s0 = inlined_call_operand.vmem [shape: bf16[16,32], index: 0, kind: input, shape index: {}]   ;;  %s145_s1 = inlined_call_operand.vmem [shape: f32[1,32], index: 1, kind: input, shape index: {}]   ;;  %s146_s2 = inlined_call_operand.vmem [shape: f32[1,32], index: 2, kind: input, shape index: {}]   ;;  %s147_s3 = inlined_call_operand.vmem [shape: bf16[16,32], index: 3, kind: output, shape index: {}]  }
   0x1   :  { %v92_v0 = vld [vmem:[%s144_s0] sm:$0xff]   ;;  %98 = vrcp.f32 %v104_v5 }
   0x2   :  { %v93_v1 = vunpack.c.l.bf16 %v92_v0  ;;  %v94_v3 = vunpack.c.h.bf16 %v92_v0  ;;  %v96_v36 = vld [vmem:[%s145_s1] ss:$0 sm:$0xff] }
   0x3   :  { %v97_v39 = vld [vmem:[%s146_s2] ss:$0 sm:$0xff] }
   0x4   :  { %v21_v2 = vsel %vm20_vm0, %v93_v1, 0.0  ;;  %v24_v4 = vsel %vm20_vm0, %v94_v3, 0.0 }
   0x5   :  { %22 = vadd.xlane.f32.xlu0 %v21_v2 }
   0x7   :  { %v99_v6 = vpop.eup %98 }
   0x8   :  { %v28_v7 = vmul.f32 32.0, %v99_v6  ;;  %vm32_vm1 = vweird.f32 %v99_v6 }
   0xa   :  { %v29_v8 = vsub.f32 1.0, %v28_v7 }
   0xc   :  { %v30_v9 = vmul.f32 %v99_v6, %v29_v8 }
   0xd   :  { %25 = vadd.xlane.f32.xlu0 %v24_v4 }
   0xe   :  { %v31_v10 = vadd.f32 %v99_v6, %v30_v9 }
  0x10   :  { %v33_v11 = vsel %vm32_vm1, %v99_v6, %v31_v10 }
  0x78   :  { %v23_v12 = vpop.xlane.xlu0 %22 }
  0x79   :  { %v34_v13 = vmul.f32 %v33_v11, %v23_v12 }
  0x7b   :  { %v36_v14 = vsub.f32 %v93_v1, %v34_v13 }
  0x7d   :  { %v38_v15 = vmul.f32 %v36_v14, %v36_v14 }
  0x7f   :  { %v40_v16 = vsel %vm20_vm0, %v38_v15, 0.0 }
  0x80   :  { %41 = vadd.xlane.f32.xlu1 %v40_v16  ;;  %v26_v17 = vpop.xlane.xlu0 %25 }
  0x81   :  { %v35_v18 = vmul.f32 %v33_v11, %v26_v17 }
  0x83   :  { %v37_v19 = vsub.f32 %v94_v3, %v35_v18 }
  0x85   :  { %v39_v20 = vmul.f32 %v37_v19, %v37_v19 }
  0x87   :  { %v43_v21 = vsel %vm20_vm0, %v39_v20, 0.0 }
  0x88   :  { %44 = vadd.xlane.f32.xlu1 %v43_v21 }
  0xf3   :  { %v42_v22 = vpop.xlane.xlu1 %41 }
  0xf4   :  { %v46_v23 = vmul.f32 %v42_v22, %v33_v11 }
  0xf6   :  { %v48_v24 = vadd.f32 1e-06, %v46_v23 }
  0xf8   :  { %100 = vrsqrt.f32 %v48_v24  ;;  %vm56_vm3 = vweird.f32 %v48_v24 }
  0xfb   :  { %v45_v25 = vpop.xlane.xlu1 %44 }
  0xfc   :  { %v47_v26 = vmul.f32 %v45_v25, %v33_v11 }
  0xfe   :  { %v101_v27 = vpop.eup %100  ;;  %v49_v28 = vadd.f32 1e-06, %v47_v26 }
  0xff   :  { %v51_v29 = vmul.f32 %v101_v27, %v48_v24  ;;  %vm57_vm2 = vweird.f32 %v101_v27 }
 0x100   :  { %102 = vrsqrt.f32 %v49_v28  ;;  %vm58_vm4 = vmor %vm56_vm3, %vm57_vm2  ;;  %vm66_vm7 = vweird.f32 %v49_v28 }
 0x101   :  { %v52_v30 = vmul.f32 %v101_v27, %v51_v29 }
 0x103   :  { %v53_v31 = vmul.f32 0.5, %v52_v30 }
 0x105   :  { %v54_v32 = vsub.f32 1.5, %v53_v31 }
 0x106   :  { %v103_v33 = vpop.eup %102 }
 0x107   :  { %v55_v34 = vmul.f32 %v101_v27, %v54_v32  ;;  %v61_v35 = vmul.f32 %v103_v33, %v49_v28  ;;  %vm67_vm5 = vweird.f32 %v103_v33 }
 0x108   :  { %vm68_vm8 = vmor %vm66_vm7, %vm67_vm5 }
 0x109   :  { %v59_v37 = vsel %vm58_vm4, %v101_v27, %v55_v34  ;;  %v62_v38 = vmul.f32 %v103_v33, %v61_v35 }
 0x10a   :  { %v70_v40 = vmul.f32 %v59_v37, %v36_v14 }
 0x10b   :  { %v63_v41 = vmul.f32 0.5, %v62_v38 }
 0x10c   :  { %v75_v42 = vmul.f32 %v96_v36, %v70_v40 }
 0x10d   :  { %v64_v43 = vsub.f32 1.5, %v63_v41 }
 0x10e   :  { %v80_v44 = vadd.f32 %v97_v39, %v75_v42 }
 0x10f   :  { %v65_v45 = vmul.f32 %v103_v33, %v64_v43 }
 0x110   :  { %v82_v46 = vpack.c.bf16 %v80_v44, %v80_v44 }
 0x111   :  { %v69_v47 = vsel %vm68_vm8, %v103_v33, %v65_v45 }
 0x112   :  { %85 = vst.msk [vmem:[%s147_s3] sm:$0xf] %vm84_vm6, %v82_v46  ;;  %v71_v48 = vmul.f32 %v69_v47, %v37_v19 }
 0x114   :  { %v76_v49 = vmul.f32 %v96_v36, %v71_v48 }
 0x116   :  { %v81_v50 = vadd.f32 %v97_v39, %v76_v49 }
 0x118   :  { %v83_v51 = vpack.c.bf16 %v81_v50, %v81_v50 }
 0x11a   :  { %86 = vst.msk [vmem:[%s147_s3 + $0x4] sm:$0xf] %vm84_vm6, %v83_v51 }

// kernel: seq2seq_transformer_forward.36
= control target key start
LH: loop header
LB: loop body
LE: loop exit
PB: predicated region body
PF: predicated region fallthrough
CT: control target
= control target key end

     0   :  { %s654_s15 = smov [#allocation3]   ;;  %s772_s0 = inlined_call_operand.vmem [shape: s32[2], index: 0, kind: input, shape index: {}]   ;;  %s773_s1 = inlined_call_operand.vmem [shape: bf16[2,8,32], index: 1, kind: input, shape index: {}]   ;;  %s774_s2 = inlined_call_operand.vmem [shape: bf16[2,8,64], index: 2, kind: input, shape index: {}]   ;;  %s775_s3 = inlined_call_operand.vmem [shape: bf16[2,8,32], index: 3, kind: output, shape index: {}]  }
   0x1   :  { %s9_s14 = sshll.u32 %s772_s0, 4  ;;  %s10_s14 = int_to_ptr.vmem [resolvable:$true] %s9_s14 }
   0x2   :  { %12 = dma.vmem_to_smem %s10_s14, 16, %s654_s15, [#allocation2] }
   0x3   :  { %640 = dma.done.wait [#allocation2], 16 }
   0x4   :  { %641 = vsyncadd [#allocation2], 4294967280 }
   0x5   :  { %15 = sfence }
   0x6   :  { %s689_s16 = smov 0   ;;  %s691_s17 = smov 0  }
   0x7   :  { %s693_s18 = smov 0  }
   0x8 LB: > { %s33_s0 = sadd.s32 1, %s648_s17  ;;  %p550_p0 = scmp.ge.s32.totalorder %s652_s18, 1  ;;  %s652_s18 = sphi %s693_s18, %s21_s18   ;;  %s648_s17 = sphi %s691_s17, %s777_s17   ;;  %s644_s16 = sphi %s689_s16, %s776_s16  }
   0x9   : > { %p35_p1 = scmp.ge.s32.totalorder %s33_s0, 2  ;;  %p148_p2 = scmp.lt.s32.totalorder %s652_s18, 3 }
   0xb   : > { %s779_s0 = smov (%p35_p1, %s33_s0), 0  ;;  %p149_p3 = pnand %p550_p0, %p148_p2 }
   0xc   : > { %p178_p4 = scmp.lt.s32.totalorder (!%p149_p3), %s644_s16, 1  ;;  %s655_s27 = smov (!%p149_p3), 96  }
   0xd   : > { %152 = sbr.rel (%p149_p3) target bundleno = 1086 (0x43e), region = 28  ;;  %s656_s28 = smov (!%p149_p3), 112  }
   0xe   : > { %s657_s29 = smov (!%p149_p3), 104   ;;  %s197_s30 = sld [smem:[#allocation3 + %s644_s16]] (!%p149_p3) }
   0xf   : > { %s659_s4 = smov (!%p149_p3), 120   ;;  %s660_s5 = smov (!%p149_p3), 88  }
  0x10   : > { %s661_s6 = smov (!%p149_p3), 80   ;;  %s662_s7 = smov (!%p149_p3), 72  }
  0x11   : > { %s663_s8 = smov (!%p149_p3), 8   ;;  %s664_s9 = smov (!%p149_p3), 24  }
  0x12   : > { %s179_s19 = scalar_select %p178_p4, %s644_s16, 1  ;;  %vm212_vm0 = vcmask 64512   ;;  %v198_v7 = vlaneseq  ;;  %v658_v11 = vmov -1e+30   ;;  %vm252_vm4 = vcmask 1043456  }
  0x13   : > { %s665_s10 = smov 16   ;;  %vm453_vm5 = vcmask 130048   ;;  %vm455_vm6 = vcmask 195584   ;;  %vm458_vm7 = vcmask 257024  }
  0x14   : > { %s711_s20 = sshll.u32 %s179_s19, 2  ;;  %v199_v8 = vand.u32 127, %v198_v7  ;;  %v204_v9 = vshrl.u32 %v198_v7, 7  ;;  %v200_v10 = vstv %s197_s30 }
  0x15   : > { %s188_s23 = scalar_lea.vmem %s774_s2, %s711_s20  ;;  %s184_s26 = scalar_lea.vmem %s773_s1, %s711_s20 }
  0x16   : > { %v211_v0 = vld [vmem:[%s188_s23] sm:$0xf]  ;;  %vm201_vm1 = vcmp.lt.s32.totalorder %v199_v8, %v200_v10  ;;  %vm207_vm2 = vcmp.le.s32.totalorder %v199_v8, %v204_v9  ;;  %s195_s13 = scalar_lea.vmem %s775_s3, %s711_s20 }
  0x17   : > { %v217_v1 = vsel %vm212_vm0, %v211_v0, 0  ;;  %v210_v2 = vld [vmem:[%s184_s26] sm:$0xf]  ;;  %v245_v3 = vunpack.c.l.b16 %v211_v0  ;;  %vm208_vm3 = vmand %vm201_vm1, %vm207_vm2 }
  0x18   : > { %226 = vmatpush.bf16.xpose.msra.mxu0 %v217_v1  ;;  %v270_v5 = vunpack.c.l.b16 %v210_v2  ;;  %v209_v12 = vsel %vm208_vm3, 0.0, %v658_v11 }
  0x19   : > { %v723_v4 = vpack.c.b16 %v245_v3, %v245_v3 }
  0x1a   : > { %v271_v6 = vpack.c.b16 %v270_v5, %v270_v5 }
  0x1b   : > { %247 = vrot.lane.b32.xlu2 %v723_v4, %s655_s27 }
  0x1f   : > { %554 = vmatmul.msk.bf16.vlgmr.msra.gmra.mxu0 %vm212_vm0, %v210_v2 }
  0x23   : > { %330 = vrot.lane.b32.xlu2 %v723_v4, %s656_s28 }
  0x2b   : > { %386 = vrot.lane.b32.xlu2 %v723_v4, %s657_s29 }
  0x33   : > { %328 = vrot.lane.b32.xlu2 %v271_v6, %s656_s28 }
  0x75   : > { %v248_v17 = vpop.permute.xlu2 %247 }
  0x76   : > { %v254_v28 = vsel %vm252_vm4, %v248_v17, 0 }
  0x77   : > { %263 = vmatpush.bf16.msra.mxu1 %v254_v28 }
  0x7d   : > { %v331_v18 = vpop.permute.xlu2 %330 }
  0x7e   : > { %v336_v29 = vsel %vm212_vm0, %v331_v18, 0 }
  0x7f   : > { %345 = vmatpush.bf16.xpose.msrb.mxu1 %v336_v29 }
  0x85   : > { %v387_v22 = vpop.permute.xlu2 %386 }
  0x86   : > { %v392_v23 = vsel %vm212_vm0, %v387_v22, 0 }
  0x87   : > { %401 = vmatpush.bf16.xpose.msrb.mxu0 %v392_v23 }
  0x8d   : > { %v329_v36 = vpop.permute.xlu2 %328 }
  0x9c   : > { %v228_v13 = vpop.f32.mrf.mxu0 }
  0x9d   : > { %v229_v14 = vadd.f32 %v228_v13, %v209_v12 }
  0x9f   : > { %v232_v15 = vsel %vm212_vm0, %v229_v14, -inf }
  0xa0   : > { %233 = vmax.xlane.f32.xlu0 %v232_v15 }
  0xa4   : > { %v230_v16 = vpop.f32.mrf.mxu0 }
  0xb4   : > { %274 = vrot.lane.b32.xlu0 %v723_v4, %s659_s4 }
  0xbc   : > { %384 = vrot.lane.b32.xlu0 %v271_v6, %s657_s29 }
 0x113   : > { %v234_v19 = vpop.xlane.xlu0 %233 }
 0x114   : > { %v235_v20 = vsub.f32 %v229_v14, %v234_v19 }
 0x116   : > { %v236_v21 = vmul.f32 1.442695, %v235_v20 }
 0x118   : > { %600 = vpow2.f32 %v236_v21 }
 0x11e   : > { %v601_v24 = vpop.eup %600 }
 0x11f   : > { %v238_v25 = vsel %vm212_vm0, %v601_v24, 0.0 }
 0x120   : > { %239 = vadd.xlane.f32.xlu1 %v238_v25 }
 0x126   : > { %v275_v26 = vpop.permute.xlu0 %274 }
 0x127   : > { %v280_v30 = vsel %vm212_vm0, %v275_v26, 0 }
 0x128   : > { %289 = vmatpush.bf16.xpose.msra.mxu2 %v280_v30 }
 0x12e   : > { %v385_v27 = vpop.permute.xlu0 %384 }
 0x12f   : > { %560 = vmatmul.msk.bf16.vlgmr.msrb.gmra.mxu0 %vm212_vm0, %v385_v27 }
 0x139   : > { %272 = vrot.lane.b32.xlu1 %v271_v6, %s659_s4 }
 0x193   : > { %v240_v31 = vpop.xlane.xlu1 %239 }
 0x194   : > { %602 = vrcp.f32 %v240_v31 }
 0x19a   : > { %v603_v32 = vpop.eup %602 }
 0x19b   : > { %v242_v33 = vmul.f32 %v603_v32, %v601_v24 }
 0x19d   : > { %v243_v34 = vpack.c.bf16 %v242_v33, %v242_v33 }
 0x19f   : > { %555 = vmatmul.msk.bf16.vlgmr.msra.gmra.mxu1 %vm212_vm0, %v243_v34 }
 0x1ab   : > { %v273_v35 = vpop.permute.xlu1 %272 }
 0x1ac   : > { %556 = vmatmul.msk.bf16.vlgmr.msra.gmra.mxu2 %vm212_vm0, %v273_v35  ;;  %v403_v37 = vpop.f32.mrf.mxu0 }
 0x1ad   : > { %v404_v38 = vadd.f32 %v403_v37, %v209_v12 }
 0x1af   : > { %558 = vmatmul.msk.bf16.vlgmr.msrb.gmra.mxu1 %vm212_vm0, %v329_v36  ;;  %v407_v39 = vsel %vm212_vm0, %v404_v38, -inf }
 0x1b0   : > { %408 = vmax.xlane.f32.xlu0 %v407_v39 }
 0x1b4   : > { %v405_v40 = vpop.f32.mrf.mxu0 }
 0x21c   : > { %v741_v41 = vpop.f32.mrf.mxu1 }
 0x223   : > { %v409_v53 = vpop.xlane.xlu0 %408 }
 0x224   : > { %v267_v42 = vpop.f32.mrf.mxu1  ;;  %v410_v57 = vsub.f32 %v404_v38, %v409_v53 }
 0x226   : > { %v411_v59 = vmul.f32 1.442695, %v410_v57 }
 0x22c   : > { %v347_v43 = vpop.f32.mrf.mxu1 }
 0x22d   : > { %v348_v44 = vadd.f32 %v347_v43, %v209_v12 }
 0x22f   : > { %v291_v45 = vpop.f32.mrf.mxu2  ;;  %v351_v46 = vsel %vm212_vm0, %v348_v44, -inf }
 0x230   : > { %v292_v47 = vadd.f32 %v291_v45, %v209_v12  ;;  %352 = vmax.xlane.f32.xlu1 %v351_v46 }
 0x232   : > { %v295_v48 = vsel %vm212_vm0, %v292_v47, -inf }
 0x233   : > { %296 = vmax.xlane.f32.xlu2 %v295_v48 }
 0x234   : > { %v349_v49 = vpop.f32.mrf.mxu1 }
 0x237   : > { %v293_v50 = vpop.f32.mrf.mxu2 }
 0x249   : > { %307 = vrot.lane.b32.xlu1 %v723_v4, %s660_s5 }
 0x2a3   : > { %v353_v51 = vpop.xlane.xlu1 %352 }
 0x2a4   : > { %v354_v52 = vsub.f32 %v348_v44, %v353_v51 }
 0x2a6   : > { %v355_v54 = vmul.f32 1.442695, %v354_v52  ;;  %v297_v55 = vpop.xlane.xlu2 %296 }
 0x2a7   : > { %v298_v56 = vsub.f32 %v292_v47, %v297_v55 }
 0x2a8   : > { %604 = vpow2.f32 %v355_v54 }
 0x2a9   : > { %v299_v58 = vmul.f32 1.442695, %v298_v56 }
 0x2ab   : > { %606 = vpow2.f32 %v299_v58 }
 0x2ac   : > { %608 = vpow2.f32 %v411_v59 }
 0x2ae   : > { %v605_v60 = vpop.eup %604 }
 0x2af   : > { %v357_v61 = vsel %vm212_vm0, %v605_v60, 0.0 }
 0x2b0   : > { %358 = vadd.xlane.f32.xlu0 %v357_v61 }
 0x2b1   : > { %v607_v62 = vpop.eup %606 }
 0x2b2   : > { %v301_v63 = vsel %vm212_vm0, %v607_v62, 0.0  ;;  %v609_v0 = vpop.eup %608 }
 0x2b3   : > { %302 = vadd.xlane.f32.xlu2 %v301_v63  ;;  %v413_v1 = vsel %vm212_vm0, %v609_v0, 0.0 }
 0x2bb   : > { %414 = vadd.xlane.f32.xlu2 %v413_v1  ;;  %v308_v2 = vpop.permute.xlu1 %307 }
 0x2bc   : > { %v313_v3 = vsel %vm252_vm4, %v308_v2, 0 }
 0x2bd   : > { %322 = vmatpush.bf16.msra.mxu3 %v313_v3 }
 0x2c4   : > { %363 = vrot.lane.b32.xlu0 %v723_v4, %s661_s6 }
 0x2d3   : > { %419 = vrot.lane.b32.xlu2 %v723_v4, %s662_s7 }
 0x323   : > { %v359_v7 = vpop.xlane.xlu0 %358 }
 0x326   : > { %v303_v5 = vpop.xlane.xlu2 %302 }
 0x327   : > { %610 = vrcp.f32 %v303_v5 }
 0x32d   : > { %v611_v6 = vpop.eup %610 }
 0x32e   : > { %v415_v8 = vpop.xlane.xlu2 %414  ;;  %v305_v9 = vmul.f32 %v611_v6, %v607_v62 }
 0x32f   : > { %612 = vrcp.f32 %v415_v8 }
 0x330   : > { %v306_v10 = vpack.c.bf16 %v305_v9, %v305_v9  ;;  %614 = vrcp.f32 %v359_v7 }
 0x332   : > { %557 = vmatmul.msk.bf16.vlgmr.msra.gmra.mxu3 %vm212_vm0, %v306_v10 }
 0x335   : > { %v613_v11 = vpop.eup %612 }
 0x336   : > { %v417_v12 = vmul.f32 %v613_v11, %v609_v0  ;;  %v420_v13 = vpop.permute.xlu2 %419  ;;  %v364_v14 = vpop.permute.xlu0 %363 }
 0x337   : > { %v369_v4 = vsel %vm252_vm4, %v364_v14, 0  ;;  %v425_v15 = vsel %vm252_vm4, %v420_v13, 0  ;;  %v615_v17 = vpop.eup %614 }
 0x338   : > { %378 = vmatpush.bf16.msrb.mxu3 %v369_v4  ;;  %434 = vmatpush.bf16.msrb.mxu2 %v425_v15  ;;  %v418_v16 = vpack.c.bf16 %v417_v12, %v417_v12  ;;  %v361_v18 = vmul.f32 %v615_v17, %v605_v60 }
 0x33a   : > { %v362_v19 = vpack.c.bf16 %v361_v18, %v361_v18 }
 0x33b   : > { %561 = vmatmul.msk.bf16.vlgmr.msrb.gmra.mxu2 %vm212_vm0, %v418_v16 }
 0x342   : > { %559 = vmatmul.msk.bf16.vlgmr.msrb.gmra.mxu3 %vm212_vm0, %v362_v19 }
 0x3b5   : > { %v324_v20 = vpop.f32.mrf.mxu3 }
 0x3b6   : > { %441 = vrot.lane.b32.xlu1 %v324_v20, %s663_s8 }
 0x3bd   : > { %v326_v21 = vpop.f32.mrf.mxu3 }
 0x3be   : > { %v436_v22 = vpop.f32.mrf.mxu2 }
 0x3bf   : > { %449 = vrot.lane.b32.xlu1 %v436_v22, %s664_s9 }
 0x3c5   : > { %v380_v23 = vpop.f32.mrf.mxu3 }
 0x3c6   : > { %v438_v24 = vpop.f32.mrf.mxu2  ;;  %445 = vrot.lane.b32.xlu0 %v380_v23, %s665_s10 }
 0x3cd   : > { %v382_v25 = vpop.f32.mrf.mxu3 }
 0x428   : > { %v442_v26 = vpop.permute.xlu1 %441 }
 0x429   : > { %v452_v27 = vsel %vm212_vm0, %v741_v41, %v442_v26 }
 0x431   : > { %v450_v29 = vpop.permute.xlu1 %449 }
 0x438   : > { %v446_v28 = vpop.permute.xlu0 %445 }
 0x439   : > { %v454_v30 = vsel %vm453_vm5, %v452_v27, %v446_v28 }
 0x43a   : > { %v456_v31 = vsel %vm455_vm6, %v454_v30, %v450_v29 }
 0x43b   : > { %v457_v32 = vpack.c.bf16 %v456_v31, %v456_v31 }
 0x43d   : > { %459 = vst.msk [vmem:[%s195_s13] sm:$0xf] %vm458_vm7, %v457_v32 }
 0x43e PF: > { %s21_s18 = sadd.s32 1, %s652_s18   ;;  %s776_s16 = smov %s648_s17 }
 0x43f   : > { %p18_p5 = scmp.ge.s32.totalorder %s21_s18, 4   ;;  %s777_s17 = smov %s779_s0 }
 0x441   :  { %20 = sbr.rel (!%p18_p5) target bundleno = 8 (0x8), region = 61 }

// kernel: seq2seq_transformer_forward.38
= control target key start
LH: loop header
LB: loop body
LE: loop exit
PB: predicated region body
PF: predicated region fallthrough
CT: control target
= control target key end

     0   :  { %10 = vsyncpa [#allocation3], 0  ;;  %s348_s0 = inlined_call_operand.vmem [shape: bf16[16,32], index: 0, kind: input, shape index: {}]   ;;  %s349_s1 = inlined_call_operand.hbm [shape: f32[1,32], index: 1, kind: input, shape index: {}]   ;;  %s350_s2 = inlined_call_operand.hbm [shape: f32[1,32], index: 2, kind: input, shape index: {}]   ;;  %s351_s3 = inlined_call_operand.vmem [shape: bf16[32,32], index: 3, kind: input, shape index: {}]   ;;  %s352_s4 = inlined_call_operand.hbm [shape: f32[1,32], index: 4, kind: input, shape index: {}]   ;;  %s353_s5 = inlined_call_operand.vmem [shape: bf16[16,32], index: 5, kind: output, shape index: {}]  }
   0x1   :  { %11 = vsyncpa [#allocation5], 0  ;;  %s30_s20 = sshll.u32 %s350_s2, 4  ;;  %s285_s21 = smov [#allocation4]   ;;  %s31_s20 = int_to_ptr.hbm [resolvable:$true] %s30_s20 }
   0x2   :  { %s32_s22 = sshll.u32 %s285_s21, 4  ;;  %s19_s25 = sshll.u32 %s349_s1, 4  ;;  %s33_s22 = int_to_ptr.vmem [resolvable:$true] %s32_s22  ;;  %s20_s25 = int_to_ptr.hbm [resolvable:$true] %s19_s25 }
   0x3   :  { %35 = dma.hbm_to_vmem [thread:$0]  %s31_s20, 16, %s33_s22, [#allocation5]  }
   0x4   :  { %s286_s26 = smov [#allocation2]   ;;  %s43_s30 = sshll.u32 %s352_s4, 4  ;;  %s44_s30 = int_to_ptr.hbm [resolvable:$true] %s43_s30 }
   0x5   :  { %s21_s27 = sshll.u32 %s286_s26, 4  ;;  %s287_s2 = smov [#allocation6]   ;;  %s22_s27 = int_to_ptr.vmem [resolvable:$true] %s21_s27 }
   0x6   :  { %24 = dma.hbm_to_vmem [thread:$0]  %s20_s25, 16, %s22_s27, [#allocation3]  }
   0x7   :  { %s45_s6 = sshll.u32 %s287_s2, 4  ;;  %s46_s6 = int_to_ptr.vmem [resolvable:$true] %s45_s6 }
   0x8   :  { %48 = dma.hbm_to_vmem [thread:$0]  %s44_s30, 16, %s46_s6, [#allocation5]  }
   0x9   :  { %281 = dma.done.wait [#allocation3], 16  }
   0xa   :  { %282 = vsyncadd [#allocation3], 4294967280 }
   0xb   :  { %283 = dma.done.wait [#allocation5], 32  }
   0xc   :  { %284 = vsyncadd [#allocation5], 4294967264  ;;  %v193_v0 = vld [vmem:[%s348_s0] sm:$0xff]   ;;  %vm68_vm0 = vcmask 261120   ;;  %v288_v5 = vmov 32.0   ;;  %v191_v22 = vld [vmem:[%s351_s3 + $0x8] sm:$0xff] }
   0xd   :  { %v194_v1 = vunpack.c.l.bf16 %v193_v0  ;;  %v195_v3 = vunpack.c.h.bf16 %v193_v0  ;;  %203 = vrcp.f32 %v288_v5  ;;  %160 = vmatpush.bf16.msra.mxu0 %v191_v22  ;;  %v190_v24 = vld [vmem:[%s351_s3] sm:$0xff]  ;;  %vm172_vm8 = vcmask 257024  }
   0xe   :  { %v200_v43 = vld [vmem:[#allocation2] ss:$0 sm:$0xff]  ;;  %v201_v48 = vld [vmem:[#allocation4] ss:$0 sm:$0xff]  ;;  %v202_v53 = vld [vmem:[#allocation6] ss:$0 sm:$0xff] }
   0xf   :  { %v69_v2 = vsel %vm68_vm0, %v194_v1, 0.0  ;;  %v72_v4 = vsel %vm68_vm0, %v195_v3, 0.0 }
  0x10   :  { %70 = vadd.xlane.f32.xlu0 %v69_v2 }
  0x11   :  { %161 = vmatpush.bf16.msra.mxu0 %v190_v24 }
  0x13   :  { %v204_v6 = vpop.eup %203 }
  0x14   :  { %v76_v7 = vmul.f32 32.0, %v204_v6  ;;  %vm80_vm1 = vweird.f32 %v204_v6 }
  0x16   :  { %v77_v8 = vsub.f32 1.0, %v76_v7 }
  0x18   :  { %73 = vadd.xlane.f32.xlu0 %v72_v4  ;;  %v78_v9 = vmul.f32 %v204_v6, %v77_v8 }
  0x1a   :  { %v79_v10 = vadd.f32 %v204_v6, %v78_v9 }
  0x1c   :  { %v81_v11 = vsel %vm80_vm1, %v204_v6, %v79_v10 }
  0x83   :  { %v71_v12 = vpop.xlane.xlu0 %70 }
  0x84   :  { %v82_v13 = vmul.f32 %v81_v11, %v71_v12 }
  0x86   :  { %v84_v14 = vsub.f32 %v194_v1, %v82_v13 }
  0x88   :  { %v86_v15 = vmul.f32 %v84_v14, %v84_v14 }
  0x8a   :  { %v88_v16 = vsel %vm68_vm0, %v86_v15, 0.0 }
  0x8b   :  { %89 = vadd.xlane.f32.xlu1 %v88_v16  ;;  %v74_v17 = vpop.xlane.xlu0 %73 }
  0x8c   :  { %v83_v18 = vmul.f32 %v81_v11, %v74_v17 }
  0x8e   :  { %v85_v19 = vsub.f32 %v195_v3, %v83_v18 }
  0x90   :  { %v87_v20 = vmul.f32 %v85_v19, %v85_v19 }
  0x92   :  { %v91_v21 = vsel %vm68_vm0, %v87_v20, 0.0 }
  0x93   :  { %92 = vadd.xlane.f32.xlu1 %v91_v21 }
  0xfe   :  { %v90_v23 = vpop.xlane.xlu1 %89 }
  0xff   :  { %v94_v25 = vmul.f32 %v90_v23, %v81_v11 }
 0x101   :  { %v96_v26 = vadd.f32 1e-06, %v94_v25 }
 0x103   :  { %205 = vrsqrt.f32 %v96_v26  ;;  %vm104_vm3 = vweird.f32 %v96_v26 }
 0x106   :  { %v93_v27 = vpop.xlane.xlu1 %92 }
 0x107   :  { %v95_v28 = vmul.f32 %v93_v27, %v81_v11 }
 0x109   :  { %v206_v29 = vpop.eup %205  ;;  %v97_v30 = vadd.f32 1e-06, %v95_v28 }
 0x10a   :  { %v99_v31 = vmul.f32 %v206_v29, %v96_v26  ;;  %vm105_vm2 = vweird.f32 %v206_v29 }
 0x10b   :  { %207 = vrsqrt.f32 %v97_v30  ;;  %vm106_vm4 = vmor %vm104_vm3, %vm105_vm2  ;;  %vm114_vm6 = vweird.f32 %v97_v30 }
 0x10c   :  { %v100_v32 = vmul.f32 %v206_v29, %v99_v31 }
 0x10e   :  { %v101_v33 = vmul.f32 0.5, %v100_v32 }
 0x110   :  { %v102_v34 = vsub.f32 1.5, %v101_v33 }
 0x111   :  { %v208_v35 = vpop.eup %207 }
 0x112   :  { %v103_v36 = vmul.f32 %v206_v29, %v102_v34  ;;  %v109_v37 = vmul.f32 %v208_v35, %v97_v30  ;;  %vm115_vm5 = vweird.f32 %v208_v35 }
 0x113   :  { %vm116_vm7 = vmor %vm114_vm6, %vm115_vm5 }
 0x114   :  { %v110_v38 = vmul.f32 %v208_v35, %v109_v37  ;;  %v107_v39 = vsel %vm106_vm4, %v206_v29, %v103_v36 }
 0x115   :  { %v118_v42 = vmul.f32 %v107_v39, %v84_v14 }
 0x116   :  { %v111_v40 = vmul.f32 0.5, %v110_v38 }
 0x117   :  { %v123_v47 = vmul.f32 %v200_v43, %v118_v42 }
 0x118   :  { %v112_v41 = vsub.f32 1.5, %v111_v40 }
 0x119   :  { %v128_v50 = vadd.f32 %v201_v48, %v123_v47 }
 0x11a   :  { %v113_v44 = vmul.f32 %v208_v35, %v112_v41 }
 0x11c   :  { %v117_v45 = vsel %vm116_vm7, %v208_v35, %v113_v44 }
 0x11d   :  { %v119_v46 = vmul.f32 %v117_v45, %v85_v19 }
 0x11f   :  { %v124_v49 = vmul.f32 %v200_v43, %v119_v46 }
 0x121   :  { %v129_v51 = vadd.f32 %v201_v48, %v124_v49 }
 0x123   :  { %v130_v52 = vpack.c.bf16 %v129_v51, %v128_v50 }
 0x125   :  { %189 = vmatmul.msk.bf16.vlgmr.msra.gmra.mxu0 %vm68_vm0, %v130_v52 }
 0x1a2   :  { %v163_v54 = vpop.f32.mrf.mxu0 }
 0x1a3   :  { %v164_v55 = vadd.f32 %v202_v53, %v163_v54 }
 0x1a5   :  { %v168_v56 = vmul.f32 0.35355338, %v164_v55 }
 0x1a7   :  { %v170_v57 = vpack.c.bf16 %v168_v56, %v168_v56 }
 0x1a9   :  { %173 = vst.msk [vmem:[%s353_s5] sm:$0xf] %vm172_vm8, %v170_v57 }
 0x1aa   :  { %v165_v58 = vpop.f32.mrf.mxu0 }
 0x1ab   :  { %v166_v59 = vadd.f32 %v202_v53, %v165_v58 }
 0x1ad   :  { %v169_v60 = vmul.f32 0.35355338, %v166_v59 }
 0x1af   :  { %v171_v61 = vpack.c.bf16 %v169_v60, %v169_v60 }
 0x1b1   :  { %174 = vst.msk [vmem:[%s353_s5 + $0x4] sm:$0xf] %vm172_vm8, %v171_v61 }
 0x1b2   :  { %179 = vsyncpa [#allocation3], 1 }
 0x1b3   :  { %180 = vsyncpa [#allocation5], 1 }

// kernel: seq2seq_transformer_forward.41
= control target key start
LH: loop header
LB: loop body
LE: loop exit
PB: predicated region body
PF: predicated region fallthrough
CT: control target
= control target key end

     0   :  { %9 = vsyncpa [#allocation4], 0  ;;  %s162_s18 = smov [#allocation3]   ;;  %s215_s0 = inlined_call_operand.vmem [shape: bf16[16,32], index: 0, kind: input, shape index: {}]   ;;  %s216_s1 = inlined_call_operand.vmem [shape: bf16[32,32], index: 1, kind: input, shape index: {}]   ;;  %s217_s2 = inlined_call_operand.hbm [shape: f32[1,32], index: 2, kind: input, shape index: {}]   ;;  %s218_s3 = inlined_call_operand.vmem [shape: bf16[16,32], index: 3, kind: input, shape index: {}]   ;;  %s219_s4 = inlined_call_operand.vmem [shape: bf16[16,32], index: 4, kind: output, shape index: {}]  }
   0x1   :  { %s19_s17 = sshll.u32 %s217_s2, 4  ;;  %s21_s19 = sshll.u32 %s162_s18, 4  ;;  %s20_s17 = int_to_ptr.hbm [resolvable:$true] %s19_s17  ;;  %s22_s19 = int_to_ptr.vmem [resolvable:$true] %s21_s19 }
   0x2   :  { %24 = dma.hbm_to_vmem [thread:$0]  %s20_s17, 16, %s22_s19, [#allocation4]  }
   0x3   :  { %160 = dma.done.wait [#allocation4], 16  }
   0x4   :  { %161 = vsyncadd [#allocation4], 4294967280  ;;  %vm36_vm0 = vcmask 261120   ;;  %v163_v0 = vmov 0.0   ;;  %v128_v1 = vld [vmem:[%s216_s1 + $0x8] sm:$0xff]  ;;  %v127_v2 = vld [vmem:[%s216_s1] sm:$0xff] }
   0x5   :  { %37 = vst.msk [vmem:[#allocation2] sm:$0xff] %vm36_vm0, %v163_v0  ;;  %74 = vmatpush.bf16.msra.mxu0 %v128_v1  ;;  %v126_v3 = vld [vmem:[%s215_s0] sm:$0xff]  ;;  %v135_v9 = vld [vmem:[#allocation3] ss:$0 sm:$0xff]  ;;  %vm105_vm1 = vcmask 257024  }
   0x6   :  { %38 = vst.msk [vmem:[#allocation2 + $0x8] sm:$0xff] %vm36_vm0, %v163_v0  ;;  %v130_v7 = vld [vmem:[%s218_s3] sm:$0xff]  }
   0x7   :  { %v131_v11 = vunpack.c.l.bf16 %v130_v7  ;;  %v132_v17 = vunpack.c.h.bf16 %v130_v7 }
   0x9   :  { %75 = vmatpush.bf16.msra.mxu0 %v127_v2 }
   0xc   :  { %125 = vmatmul.msk.bf16.vlgmr.msra.gmra.mxu0 %vm36_vm0, %v126_v3  ;;  %v39_v4 = vld [vmem:[#allocation2] sm:$0xff] }
   0xd   :  { %v40_v8 = vld [vmem:[#allocation2 + $0x8] sm:$0xff] }
  0x89   :  { %v77_v5 = vpop.f32.mrf.mxu0 }
  0x8a   :  { %v82_v6 = vadd.f32 %v77_v5, %v39_v4 }
  0x8c   :  { %84 = vst.msk [vmem:[#allocation2] sm:$0xff] %vm36_vm0, %v82_v6 }
  0x91   :  { %v79_v10 = vpop.f32.mrf.mxu0 }
  0x92   :  { %v83_v12 = vadd.f32 %v79_v10, %v40_v8 }
  0x93   :  { %v89_v13 = vld [vmem:[#allocation2] sm:$0xff] }
  0x94   :  { %v95_v14 = vadd.f32 %v135_v9, %v89_v13  ;;  %85 = vst.msk [vmem:[#allocation2 + $0x8] sm:$0xff] %vm36_vm0, %v83_v12 }
  0x96   :  { %v101_v15 = vadd.f32 %v131_v11, %v95_v14 }
  0x98   :  { %v103_v16 = vpack.c.bf16 %v101_v15, %v101_v15 }
  0x9a   :  { %106 = vst.msk [vmem:[%s219_s4] sm:$0xf] %vm105_vm1, %v103_v16 }
  0x9b   :  { %v90_v18 = vld [vmem:[#allocation2 + $0x8] sm:$0xff] }
  0x9c   :  { %v96_v19 = vadd.f32 %v135_v9, %v90_v18 }
  0x9e   :  { %v102_v20 = vadd.f32 %v132_v17, %v96_v19 }
  0xa0   :  { %v104_v21 = vpack.c.bf16 %v102_v20, %v102_v20 }
  0xa2   :  { %107 = vst.msk [vmem:[%s219_s4 + $0x4] sm:$0xf] %vm105_vm1, %v104_v21 }
  0xa3   :  { %112 = vsyncpa [#allocation4], 1 }

// kernel: seq2seq_transformer_forward.42
= control target key start
LH: loop header
LB: loop body
LE: loop exit
PB: predicated region body
PF: predicated region fallthrough
CT: control target
= control target key end

     0   :  { %12 = vsyncpa [#allocation5], 0  ;;  %s565_s0 = inlined_call_operand.vmem [shape: bf16[16,32], index: 0, kind: input, shape index: {}]   ;;  %s566_s1 = inlined_call_operand.hbm [shape: f32[1,32], index: 1, kind: input, shape index: {}]   ;;  %s567_s2 = inlined_call_operand.hbm [shape: f32[1,32], index: 2, kind: input, shape index: {}]   ;;  %s568_s3 = inlined_call_operand.vmem [shape: bf16[32,64], index: 3, kind: input, shape index: {}]   ;;  %s569_s4 = inlined_call_operand.hbm [shape: f32[1,64], index: 4, kind: input, shape index: {}]   ;;  %s570_s5 = inlined_call_operand.vmem [shape: bf16[64,32], index: 5, kind: input, shape index: {}]   ;;  %s571_s6 = inlined_call_operand.hbm [shape: f32[1,32], index: 6, kind: input, shape index: {}]   ;;  %s572_s7 = inlined_call_operand.vmem [shape: bf16[16,32], index: 7, kind: output, shape index: {}]  }
   0x1   :  { %13 = vsyncpa [#allocation7], 0  ;;  %s33_s26 = sshll.u32 %s567_s2, 4  ;;  %s34_s26 = int_to_ptr.hbm [resolvable:$true] %s33_s26 }
   0x2   :  { %14 = vsyncpa [#allocation10], 0  ;;  %s457_s27 = smov [#allocation6]   ;;  %s22_s8 = sshll.u32 %s566_s1, 4  ;;  %s23_s8 = int_to_ptr.hbm [resolvable:$true] %s22_s8 }
   0x3   :  { %s35_s28 = sshll.u32 %s457_s27, 4  ;;  %s458_s9 = smov [#allocation4]   ;;  %s36_s28 = int_to_ptr.vmem [resolvable:$true] %s35_s28 }
   0x4   :  { %38 = dma.hbm_to_vmem [thread:$0]  %s34_s26, 16, %s36_s28, [#allocation7]  }
   0x5   :  { %s24_s10 = sshll.u32 %s458_s9, 4  ;;  %s46_s13 = sshll.u32 %s569_s4, 4  ;;  %s25_s10 = int_to_ptr.vmem [resolvable:$true] %s24_s10  ;;  %s47_s13 = int_to_ptr.hbm [resolvable:$true] %s46_s13 }
   0x6   :  { %27 = dma.hbm_to_vmem [thread:$0]  %s23_s8, 16, %s25_s10, [#allocation5]  }
   0x7   :  { %s59_s15 = sshll.u32 %s571_s6, 4  ;;  %s459_s16 = smov [#allocation8]   ;;  %s60_s15 = int_to_ptr.hbm [resolvable:$true] %s59_s15 }
   0x8   :  { %s48_s17 = sshll.u32 %s459_s16, 4  ;;  %s460_s1 = smov [#allocation9]   ;;  %s49_s17 = int_to_ptr.vmem [resolvable:$true] %s48_s17 }
   0x9   :  { %51 = dma.hbm_to_vmem [thread:$0]  %s47_s13, 16, %s49_s17, [#allocation7]  }
   0xa   :  { %s61_s18 = sshll.u32 %s460_s1, 4  ;;  %s62_s18 = int_to_ptr.vmem [resolvable:$true] %s61_s18 }
   0xb   :  { %64 = dma.hbm_to_vmem [thread:$0]  %s60_s15, 16, %s62_s18, [#allocation10]  }
   0xc   :  { %451 = dma.done.wait [#allocation5], 16  }
   0xd   :  { %452 = vsyncadd [#allocation5], 4294967280 }
   0xe   :  { %453 = dma.done.wait [#allocation7], 32  }
   0xf   :  { %454 = vsyncadd [#allocation7], 4294967264 }
  0x10   :  { %455 = dma.done.wait [#allocation10], 16  }
  0x11   :  { %456 = vsyncadd [#allocation10], 4294967280  ;;  %v332_v0 = vld [vmem:[%s565_s0] sm:$0xff]   ;;  %vm92_vm0 = vcmask 261120   ;;  %v461_v5 = vmov 32.0   ;;  %v326_v25 = vld [vmem:[%s568_s3 + $0x8] sm:$0xff] }
  0x12   :  { %v518_v1 = vunpack.c.l.bf16 %v332_v0  ;;  %v522_v3 = vunpack.c.h.bf16 %v332_v0  ;;  %349 = vrcp.f32 %v461_v5  ;;  %198 = vmatpush.bf16.msra.mxu0 %v326_v25  ;;  %v325_v28 = vld [vmem:[%s568_s3] sm:$0xff]  ;;  %v345_v38 = vld [vmem:[#allocation4] ss:$0 sm:$0xff]  ;;  %v346_v41 = vld [vmem:[#allocation6] ss:$0 sm:$0xff]  ;;  %vm156_vm6 = vcmask 257024  }
  0x13   :  { %v330_v55 = vld [vmem:[%s570_s5 + $0x18] sm:$0xff]  ;;  %v329_v56 = vld [vmem:[%s570_s5 + $0x10] sm:$0xff]  ;;  %v328_v57 = vld [vmem:[%s570_s5 + $0x8] sm:$0xff]  ;;  %v462_v59 = vmov 0.0   ;;  %vm243_vm9 = vcmask 523264  }
  0x14   :  { %v93_v2 = vsel %vm92_vm0, %v518_v1, 0.0  ;;  %v96_v4 = vsel %vm92_vm0, %v522_v3, 0.0  ;;  %251 = vmatpush.bf16.msra.mxu1 %v330_v55  ;;  %v327_v58 = vld [vmem:[%s570_s5] sm:$0xff]  ;;  %159 = vst.msk [vmem:[#allocation3] sm:$0xff] %vm92_vm0, %v462_v59  ;;  %v347_v61 = vld [vmem:[#allocation8] ss:$0 sm:$0xff] }
  0x15   :  { %94 = vadd.xlane.f32.xlu0 %v93_v2  ;;  %160 = vst.msk [vmem:[#allocation3 + $0x8] sm:$0xff] %vm92_vm0, %v462_v59 }
  0x16   :  { %199 = vmatpush.bf16.msra.mxu0 %v325_v28 }
  0x18   :  { %v350_v6 = vpop.eup %349  ;;  %252 = vmatpush.bf16.msra.mxu1 %v329_v56 }
  0x19   :  { %v100_v7 = vmul.f32 32.0, %v350_v6  ;;  %vm104_vm1 = vweird.f32 %v350_v6 }
  0x1b   :  { %v101_v8 = vsub.f32 1.0, %v100_v7 }
  0x1c   :  { %253 = vmatpush.bf16.msra.mxu1 %v328_v57 }
  0x1d   :  { %97 = vadd.xlane.f32.xlu0 %v96_v4  ;;  %v102_v9 = vmul.f32 %v350_v6, %v101_v8 }
  0x1f   :  { %v103_v10 = vadd.f32 %v350_v6, %v102_v9  ;;  %v209_v9 = vld [vmem:[#allocation3 + $0x8] sm:$0xff] }
  0x20   :  { %254 = vmatpush.bf16.msra.mxu1 %v327_v58 }
  0x21   :  { %v105_v11 = vsel %vm104_vm1, %v350_v6, %v103_v10  ;;  %v208_v6 = vld [vmem:[#allocation3] sm:$0xff]  ;;  %v348_v10 = vld [vmem:[#allocation9] ss:$0 sm:$0xff] }
  0x88   :  { %v95_v12 = vpop.xlane.xlu0 %94 }
  0x89   :  { %v106_v13 = vmul.f32 %v105_v11, %v95_v12 }
  0x8b   :  { %v108_v14 = vsub.f32 %v518_v1, %v106_v13 }
  0x8d   :  { %v110_v15 = vmul.f32 %v108_v14, %v108_v14 }
  0x8f   :  { %v112_v16 = vsel %vm92_vm0, %v110_v15, 0.0 }
  0x90   :  { %113 = vadd.xlane.f32.xlu1 %v112_v16  ;;  %v98_v17 = vpop.xlane.xlu0 %97 }
  0x91   :  { %v107_v18 = vmul.f32 %v105_v11, %v98_v17 }
  0x93   :  { %v109_v19 = vsub.f32 %v522_v3, %v107_v18 }
  0x95   :  { %v111_v20 = vmul.f32 %v109_v19, %v109_v19 }
  0x97   :  { %v115_v21 = vsel %vm92_vm0, %v111_v20, 0.0 }
  0x98   :  { %116 = vadd.xlane.f32.xlu1 %v115_v21 }
 0x103   :  { %v114_v22 = vpop.xlane.xlu1 %113 }
 0x104   :  { %v118_v23 = vmul.f32 %v114_v22, %v105_v11 }
 0x106   :  { %v120_v24 = vadd.f32 1e-06, %v118_v23 }
 0x108   :  { %351 = vrsqrt.f32 %v120_v24  ;;  %vm128_vm3 = vweird.f32 %v120_v24 }
 0x10b   :  { %v117_v26 = vpop.xlane.xlu1 %116 }
 0x10c   :  { %v119_v27 = vmul.f32 %v117_v26, %v105_v11 }
 0x10e   :  { %v352_v29 = vpop.eup %351  ;;  %v121_v30 = vadd.f32 1e-06, %v119_v27 }
 0x10f   :  { %v123_v31 = vmul.f32 %v352_v29, %v120_v24  ;;  %vm129_vm2 = vweird.f32 %v352_v29 }
 0x110   :  { %353 = vrsqrt.f32 %v121_v30  ;;  %vm130_vm4 = vmor %vm128_vm3, %vm129_vm2  ;;  %vm138_vm7 = vweird.f32 %v121_v30 }
 0x111   :  { %v124_v32 = vmul.f32 %v352_v29, %v123_v31 }
 0x113   :  { %v125_v33 = vmul.f32 0.5, %v124_v32 }
 0x115   :  { %v126_v34 = vsub.f32 1.5, %v125_v33 }
 0x116   :  { %v354_v35 = vpop.eup %353 }
 0x117   :  { %v127_v36 = vmul.f32 %v352_v29, %v126_v34  ;;  %v133_v37 = vmul.f32 %v354_v35, %v121_v30  ;;  %vm139_vm5 = vweird.f32 %v354_v35 }
 0x118   :  { %vm140_vm8 = vmor %vm138_vm7, %vm139_vm5 }
 0x119   :  { %v131_v39 = vsel %vm130_vm4, %v352_v29, %v127_v36  ;;  %v134_v40 = vmul.f32 %v354_v35, %v133_v37 }
 0x11a   :  { %v142_v42 = vmul.f32 %v131_v39, %v108_v14 }
 0x11b   :  { %v135_v43 = vmul.f32 0.5, %v134_v40 }
 0x11c   :  { %v147_v44 = vmul.f32 %v345_v38, %v142_v42 }
 0x11d   :  { %v136_v45 = vsub.f32 1.5, %v135_v43 }
 0x11e   :  { %v152_v46 = vadd.f32 %v346_v41, %v147_v44 }
 0x11f   :  { %v137_v47 = vmul.f32 %v354_v35, %v136_v45 }
 0x120   :  { %v154_v48 = vpack.c.bf16 %v152_v46, %v152_v46 }
 0x121   :  { %v141_v49 = vsel %vm140_vm8, %v354_v35, %v137_v47 }
 0x122   :  { %157 = vst.msk [vmem:[#allocation2] sm:$0xf] %vm156_vm6, %v154_v48  ;;  %v143_v50 = vmul.f32 %v141_v49, %v109_v19 }
 0x124   :  { %v148_v51 = vmul.f32 %v345_v38, %v143_v50 }
 0x126   :  { %v153_v52 = vadd.f32 %v346_v41, %v148_v51 }
 0x128   :  { %v155_v53 = vpack.c.bf16 %v153_v52, %v153_v52 }
 0x12a   :  { %158 = vst.msk [vmem:[#allocation2 + $0x4] sm:$0xf] %vm156_vm6, %v155_v53 }
 0x131   :  { %v324_v54 = vld [vmem:[#allocation2] sm:$0xff] }
 0x132   :  { %306 = vmatmul.msk.bf16.vlgmr.msra.gmra.mxu0 %vm92_vm0, %v324_v54 }
 0x1af   :  { %v201_v60 = vpop.f32.mrf.mxu0 }
 0x1b0   :  { %v202_v62 = vadd.f32 %v347_v61, %v201_v60 }
 0x1b2   :  { %v206_v2 = vmax.f32 %v202_v62, 0.0 }
 0x1b7   :  { %v203_v63 = vpop.f32.mrf.mxu0 }
 0x1b8   :  { %v204_v0 = vadd.f32 %v347_v61, %v203_v63 }
 0x1ba   :  { %v207_v4 = vmax.f32 %v204_v0, 0.0 }
 0x1bc   :  { %v210_v5 = vpack.c.bf16 %v207_v4, %v206_v2 }
 0x1be   :  { %323 = vmatmul.msk.bf16.vlgmr.msra.gmra.mxu1 %vm243_vm9, %v210_v5 }
 0x23b   :  { %v256_v7 = vpop.f32.mrf.mxu1 }
 0x23c   :  { %v261_v8 = vadd.f32 %v256_v7, %v208_v6 }
 0x23e   :  { %263 = vst.msk [vmem:[#allocation3] sm:$0xff] %vm92_vm0, %v261_v8 }
 0x243   :  { %v258_v11 = vpop.f32.mrf.mxu1 }
 0x244   :  { %v262_v12 = vadd.f32 %v258_v11, %v209_v9 }
 0x245   :  { %v268_v13 = vld [vmem:[#allocation3] sm:$0xff] }
 0x246   :  { %v274_v14 = vadd.f32 %v348_v10, %v268_v13  ;;  %264 = vst.msk [vmem:[#allocation3 + $0x8] sm:$0xff] %vm92_vm0, %v262_v12 }
 0x248   :  { %v280_v15 = vadd.f32 %v518_v1, %v274_v14 }
 0x24a   :  { %v282_v16 = vpack.c.bf16 %v280_v15, %v280_v15 }
 0x24c   :  { %285 = vst.msk [vmem:[%s572_s7] sm:$0xf] %vm156_vm6, %v282_v16 }
 0x24d   :  { %v269_v17 = vld [vmem:[#allocation3 + $0x8] sm:$0xff] }
 0x24e   :  { %v275_v18 = vadd.f32 %v348_v10, %v269_v17 }
 0x250   :  { %v281_v19 = vadd.f32 %v522_v3, %v275_v18 }
 0x252   :  { %v283_v20 = vpack.c.bf16 %v281_v19, %v281_v19 }
 0x254   :  { %286 = vst.msk [vmem:[%s572_s7 + $0x4] sm:$0xf] %vm156_vm6, %v283_v20 }
 0x255   :  { %291 = vsyncpa [#allocation5], 1 }
 0x256   :  { %292 = vsyncpa [#allocation7], 1 }
 0x257   :  { %293 = vsyncpa [#allocation10], 1 }

// kernel: seq2seq_transformer_forward.47
= control target key start
LH: loop header
LB: loop body
LE: loop exit
PB: predicated region body
PF: predicated region fallthrough
CT: control target
= control target key end

     0   :  { %8 = vsyncpa [#allocation4], 0  ;;  %s150_s15 = smov [#allocation3]   ;;  %s194_s0 = inlined_call_operand.vmem [shape: bf16[16,32], index: 0, kind: input, shape index: {}]   ;;  %s195_s1 = inlined_call_operand.vmem [shape: bf16[32,64], index: 1, kind: input, shape index: {}]   ;;  %s196_s2 = inlined_call_operand.hbm [shape: f32[1,64], index: 2, kind: input, shape index: {}]   ;;  %s197_s3 = inlined_call_operand.vmem [shape: bf16[16,64], index: 3, kind: output, shape index: {}]  }
   0x1   :  { %s18_s14 = sshll.u32 %s196_s2, 4  ;;  %s20_s16 = sshll.u32 %s150_s15, 4  ;;  %s19_s14 = int_to_ptr.hbm [resolvable:$true] %s18_s14  ;;  %s21_s16 = int_to_ptr.vmem [resolvable:$true] %s20_s16 }
   0x2   :  { %23 = dma.hbm_to_vmem [thread:$0]  %s19_s14, 16, %s21_s16, [#allocation4]  }
   0x3   :  { %148 = dma.done.wait [#allocation4], 16  }
   0x4   :  { %149 = vsyncadd [#allocation4], 4294967280  ;;  %vm33_vm0 = vcmask 523264   ;;  %v151_v0 = vmov 0.0   ;;  %v120_v1 = vld [vmem:[%s195_s1 + $0x8] sm:$0xff]  ;;  %v119_v2 = vld [vmem:[%s195_s1] sm:$0xff] }
   0x5   :  { %34 = vst.msk [vmem:[#allocation2] sm:$0xff] %vm33_vm0, %v151_v0  ;;  %71 = vmatpush.bf16.msra.mxu0 %v120_v1  ;;  %v118_v3 = vld [vmem:[%s194_s0] sm:$0xff]  ;;  %vm61_vm1 = vcmask 261120   ;;  %v123_v8 = vld [vmem:[#allocation3] ss:$0 sm:$0xff]  ;;  %vm97_vm2 = vcmask 519168  }
   0x6   :  { %35 = vst.msk [vmem:[#allocation2 + $0x8] sm:$0xff] %vm33_vm0, %v151_v0 }
   0x9   :  { %72 = vmatpush.bf16.msra.mxu0 %v119_v2 }
   0xc   :  { %117 = vmatmul.msk.bf16.vlgmr.msra.gmra.mxu0 %vm61_vm1, %v118_v3  ;;  %v36_v4 = vld [vmem:[#allocation2] sm:$0xff] }
   0xd   :  { %v37_v7 = vld [vmem:[#allocation2 + $0x8] sm:$0xff] }
  0x89   :  { %v74_v5 = vpop.f32.mrf.mxu0 }
  0x8a   :  { %v79_v6 = vadd.f32 %v74_v5, %v36_v4 }
  0x8c   :  { %82 = vst.msk [vmem:[#allocation2] sm:$0xff] %vm33_vm0, %v79_v6 }
  0x91   :  { %v76_v9 = vpop.f32.mrf.mxu0 }
  0x92   :  { %v80_v10 = vadd.f32 %v76_v9, %v37_v7 }
  0x93   :  { %v87_v11 = vld [vmem:[#allocation2] sm:$0xff] }
  0x94   :  { %v93_v12 = vadd.f32 %v123_v8, %v87_v11  ;;  %83 = vst.msk [vmem:[#allocation2 + $0x8] sm:$0xff] %vm33_vm0, %v80_v10 }
  0x96   :  { %v95_v13 = vpack.c.bf16 %v93_v12, %v93_v12 }
  0x98   :  { %98 = vst.msk [vmem:[%s197_s3] sm:$0xf] %vm97_vm2, %v95_v13 }
  0x9b   :  { %v88_v14 = vld [vmem:[#allocation2 + $0x8] sm:$0xff] }
  0x9c   :  { %v94_v15 = vadd.f32 %v123_v8, %v88_v14 }
  0x9e   :  { %v96_v16 = vpack.c.bf16 %v94_v15, %v94_v15 }
  0xa0   :  { %99 = vst.msk [vmem:[%s197_s3 + $0x4] sm:$0xf] %vm97_vm2, %v96_v16 }
  0xa1   :  { %104 = vsyncpa [#allocation4], 1 }

// kernel: seq2seq_transformer_forward.43
= control target key start
LH: loop header
LB: loop body
LE: loop exit
PB: predicated region body
PF: predicated region fallthrough
CT: control target
= control target key end

     0   :  { %12 = vsyncpa [#allocation3], 0  ;;  %s380_s0 = inlined_call_operand.vmem [shape: bf16[16,32], index: 0, kind: input, shape index: {}]   ;;  %s381_s1 = inlined_call_operand.hbm [shape: f32[1,32], index: 1, kind: input, shape index: {}]   ;;  %s382_s2 = inlined_call_operand.hbm [shape: f32[1,32], index: 2, kind: input, shape index: {}]   ;;  %s383_s3 = inlined_call_operand.vmem [shape: bf16[32,96], index: 3, kind: input, shape index: {}]   ;;  %s384_s4 = inlined_call_operand.hbm [shape: f32[1,96], index: 4, kind: input, shape index: {}]   ;;  %s385_s5 = inlined_call_operand.vmem [shape: bf16[16,32], index: 5, kind: output, shape index: {0}]   ;;  %s386_s6 = inlined_call_operand.vmem [shape: bf16[16,64], index: 6, kind: output, shape index: {1}]  }
   0x1   :  { %13 = vsyncpa [#allocation5], 0  ;;  %s32_s23 = sshll.u32 %s382_s2, 4  ;;  %s305_s24 = smov [#allocation4]   ;;  %s33_s23 = int_to_ptr.hbm [resolvable:$true] %s32_s23 }
   0x2   :  { %s34_s25 = sshll.u32 %s305_s24, 4  ;;  %s21_s28 = sshll.u32 %s381_s1, 4  ;;  %s35_s25 = int_to_ptr.vmem [resolvable:$true] %s34_s25  ;;  %s22_s28 = int_to_ptr.hbm [resolvable:$true] %s21_s28 }
   0x3   :  { %37 = dma.hbm_to_vmem [thread:$0]  %s33_s23, 16, %s35_s25, [#allocation5]  }
   0x4   :  { %s306_s29 = smov [#allocation2]   ;;  %s45_s9 = sshll.u32 %s384_s4, 4  ;;  %s46_s9 = int_to_ptr.hbm [resolvable:$true] %s45_s9 }
   0x5   :  { %s23_s30 = sshll.u32 %s306_s29, 4  ;;  %s307_s2 = smov [#allocation6]   ;;  %s24_s30 = int_to_ptr.vmem [resolvable:$true] %s23_s30 }
   0x6   :  { %26 = dma.hbm_to_vmem [thread:$0]  %s22_s28, 16, %s24_s30, [#allocation3]  }
   0x7   :  { %s47_s10 = sshll.u32 %s307_s2, 4  ;;  %s48_s10 = int_to_ptr.vmem [resolvable:$true] %s47_s10 }
   0x8   :  { %50 = dma.hbm_to_vmem [thread:$0]  %s46_s9, 16, %s48_s10, [#allocation5]  }
   0x9   :  { %301 = dma.done.wait [#allocation3], 16  }
   0xa   :  { %302 = vsyncadd [#allocation3], 4294967280 }
   0xb   :  { %303 = dma.done.wait [#allocation5], 32  }
   0xc   :  { %304 = vsyncadd [#allocation5], 4294967264  ;;  %v212_v0 = vld [vmem:[%s380_s0] sm:$0xff]   ;;  %vm70_vm0 = vcmask 261120   ;;  %v308_v5 = vmov 32.0   ;;  %v210_v22 = vld [vmem:[%s383_s3 + $0x8] sm:$0xff] }
   0xd   :  { %v213_v1 = vunpack.c.l.bf16 %v212_v0  ;;  %v214_v3 = vunpack.c.h.bf16 %v212_v0  ;;  %223 = vrcp.f32 %v308_v5  ;;  %162 = vmatpush.bf16.msra.mxu0 %v210_v22  ;;  %v209_v24 = vld [vmem:[%s383_s3] sm:$0xff]  ;;  %vm174_vm8 = vcmask 257024   ;;  %s309_s3 = smov 96  }
   0xe   :  { %v220_v43 = vld [vmem:[#allocation2] ss:$0 sm:$0xff]  ;;  %v221_v48 = vld [vmem:[#allocation4] ss:$0 sm:$0xff]  ;;  %v222_v53 = vld [vmem:[#allocation6] ss:$0 sm:$0xff] }
   0xf   :  { %v71_v2 = vsel %vm70_vm0, %v213_v1, 0.0  ;;  %v74_v4 = vsel %vm70_vm0, %v214_v3, 0.0  ;;  %vm187_vm9 = vcmask 519168  }
  0x10   :  { %72 = vadd.xlane.f32.xlu0 %v71_v2 }
  0x11   :  { %163 = vmatpush.bf16.msra.mxu0 %v209_v24 }
  0x13   :  { %v224_v6 = vpop.eup %223 }
  0x14   :  { %v78_v7 = vmul.f32 32.0, %v224_v6  ;;  %vm82_vm1 = vweird.f32 %v224_v6 }
  0x16   :  { %v79_v8 = vsub.f32 1.0, %v78_v7 }
  0x18   :  { %75 = vadd.xlane.f32.xlu0 %v74_v4  ;;  %v80_v9 = vmul.f32 %v224_v6, %v79_v8 }
  0x1a   :  { %v81_v10 = vadd.f32 %v224_v6, %v80_v9 }
  0x1c   :  { %v83_v11 = vsel %vm82_vm1, %v224_v6, %v81_v10 }
  0x83   :  { %v73_v12 = vpop.xlane.xlu0 %72 }
  0x84   :  { %v84_v13 = vmul.f32 %v83_v11, %v73_v12 }
  0x86   :  { %v86_v14 = vsub.f32 %v213_v1, %v84_v13 }
  0x88   :  { %v88_v15 = vmul.f32 %v86_v14, %v86_v14 }
  0x8a   :  { %v90_v16 = vsel %vm70_vm0, %v88_v15, 0.0 }
  0x8b   :  { %91 = vadd.xlane.f32.xlu1 %v90_v16  ;;  %v76_v17 = vpop.xlane.xlu0 %75 }
  0x8c   :  { %v85_v18 = vmul.f32 %v83_v11, %v76_v17 }
  0x8e   :  { %v87_v19 = vsub.f32 %v214_v3, %v85_v18 }
  0x90   :  { %v89_v20 = vmul.f32 %v87_v19, %v87_v19 }
  0x92   :  { %v93_v21 = vsel %vm70_vm0, %v89_v20, 0.0 }
  0x93   :  { %94 = vadd.xlane.f32.xlu1 %v93_v21 }
  0xfe   :  { %v92_v23 = vpop.xlane.xlu1 %91 }
  0xff   :  { %v96_v25 = vmul.f32 %v92_v23, %v83_v11 }
 0x101   :  { %v98_v26 = vadd.f32 1e-06, %v96_v25 }
 0x103   :  { %225 = vrsqrt.f32 %v98_v26  ;;  %vm106_vm3 = vweird.f32 %v98_v26 }
 0x106   :  { %v95_v27 = vpop.xlane.xlu1 %94 }
 0x107   :  { %v97_v28 = vmul.f32 %v95_v27, %v83_v11 }
 0x109   :  { %v226_v29 = vpop.eup %225  ;;  %v99_v30 = vadd.f32 1e-06, %v97_v28 }
 0x10a   :  { %v101_v31 = vmul.f32 %v226_v29, %v98_v26  ;;  %vm107_vm2 = vweird.f32 %v226_v29 }
 0x10b   :  { %227 = vrsqrt.f32 %v99_v30  ;;  %vm108_vm4 = vmor %vm106_vm3, %vm107_vm2  ;;  %vm116_vm6 = vweird.f32 %v99_v30 }
 0x10c   :  { %v102_v32 = vmul.f32 %v226_v29, %v101_v31 }
 0x10e   :  { %v103_v33 = vmul.f32 0.5, %v102_v32 }
 0x110   :  { %v104_v34 = vsub.f32 1.5, %v103_v33 }
 0x111   :  { %v228_v35 = vpop.eup %227 }
 0x112   :  { %v105_v36 = vmul.f32 %v226_v29, %v104_v34  ;;  %v111_v37 = vmul.f32 %v228_v35, %v99_v30  ;;  %vm117_vm5 = vweird.f32 %v228_v35 }
 0x113   :  { %vm118_vm7 = vmor %vm116_vm6, %vm117_vm5 }
 0x114   :  { %v112_v38 = vmul.f32 %v228_v35, %v111_v37  ;;  %v109_v39 = vsel %vm108_vm4, %v226_v29, %v105_v36 }
 0x115   :  { %v120_v42 = vmul.f32 %v109_v39, %v86_v14 }
 0x116   :  { %v113_v40 = vmul.f32 0.5, %v112_v38 }
 0x117   :  { %v125_v47 = vmul.f32 %v220_v43, %v120_v42 }
 0x118   :  { %v114_v41 = vsub.f32 1.5, %v113_v40 }
 0x119   :  { %v130_v50 = vadd.f32 %v221_v48, %v125_v47 }
 0x11a   :  { %v115_v44 = vmul.f32 %v228_v35, %v114_v41 }
 0x11c   :  { %v119_v45 = vsel %vm118_vm7, %v228_v35, %v115_v44 }
 0x11d   :  { %v121_v46 = vmul.f32 %v119_v45, %v87_v19 }
 0x11f   :  { %v126_v49 = vmul.f32 %v220_v43, %v121_v46 }
 0x121   :  { %v131_v51 = vadd.f32 %v221_v48, %v126_v49 }
 0x123   :  { %v132_v52 = vpack.c.bf16 %v131_v51, %v130_v50 }
 0x125   :  { %208 = vmatmul.msk.bf16.vlgmr.msra.gmra.mxu0 %vm70_vm0, %v132_v52 }
 0x1a2   :  { %v165_v54 = vpop.f32.mrf.mxu0 }
 0x1a3   :  { %v166_v55 = vadd.f32 %v222_v53, %v165_v54 }
 0x1a5   :  { %v170_v56 = vmul.f32 0.35355338, %v166_v55  ;;  %v177_v57 = vpack.c.bf16 %v166_v55, %v166_v55 }
 0x1a7   :  { %v172_v58 = vpack.c.bf16 %v170_v56, %v170_v56  ;;  %181 = vrot.lane.b32.xlu2 %v177_v57, %s309_s3 }
 0x1a9   :  { %175 = vst.msk [vmem:[%s385_s5] sm:$0xf] %vm174_vm8, %v172_v58 }
 0x1aa   :  { %v167_v59 = vpop.f32.mrf.mxu0 }
 0x1ab   :  { %v168_v60 = vadd.f32 %v222_v53, %v167_v59 }
 0x1ad   :  { %v171_v61 = vmul.f32 0.35355338, %v168_v60  ;;  %v178_v62 = vpack.c.bf16 %v168_v60, %v168_v60 }
 0x1af   :  { %v173_v63 = vpack.c.bf16 %v171_v61, %v171_v61  ;;  %183 = vrot.lane.b32.xlu2 %v178_v62, %s309_s3 }
 0x1b1   :  { %176 = vst.msk [vmem:[%s385_s5 + $0x4] sm:$0xf] %vm174_vm8, %v173_v63 }
 0x201   :  { %v182_v0 = vpop.permute.xlu2 %181 }
 0x202   :  { %188 = vst.msk [vmem:[%s386_s6] sm:$0xf] %vm187_vm9, %v182_v0 }
 0x209   :  { %v184_v1 = vpop.permute.xlu2 %183 }
 0x20a   :  { %189 = vst.msk [vmem:[%s386_s6 + $0x4] sm:$0xf] %vm187_vm9, %v184_v1 }
 0x20b   :  { %198 = vsyncpa [#allocation3], 1 }
 0x20c   :  { %199 = vsyncpa [#allocation5], 1 }

// kernel: seq2seq_transformer_forward.51
= control target key start
LH: loop header
LB: loop body
LE: loop exit
PB: predicated region body
PF: predicated region fallthrough
CT: control target
= control target key end

     0   :  { %vm25_vm0 = vcmask 261120   ;;  %s247_s0 = inlined_call_operand.vmem [shape: bf16[16,32], index: 0, kind: input, shape index: {}]   ;;  %s248_s1 = inlined_call_operand.vmem [shape: f32[1,32], index: 1, kind: input, shape index: {}]   ;;  %s249_s2 = inlined_call_operand.vmem [shape: f32[1,32], index: 2, kind: input, shape index: {}]   ;;  %s250_s3 = inlined_call_operand.vmem [shape: bf16[32,60], index: 3, kind: input, shape index: {}]   ;;  %s251_s4 = inlined_call_operand.hbm [shape: f32[16,60], index: 4, kind: output, shape index: {}]  }
   0x1   :  { %v154_v0 = vld [vmem:[%s247_s0] sm:$0xff]  }
   0x2   :  { %v155_v1 = vunpack.c.l.bf16 %v154_v0 }
   0x3   :  { %9 = vsyncpa [#allocation3], 0  ;;  %v156_v3 = vunpack.c.h.bf16 %v154_v0  ;;  %v195_v5 = vmov 32.0   ;;  %v152_v22 = vld [vmem:[%s250_s3 + $0x8] sm:$0xff]  ;;  %v151_v24 = vld [vmem:[%s250_s3] sm:$0xff]  ;;  %vm121_vm8 = vcmask 490496  }
   0x4   :  { %v26_v2 = vsel %vm25_vm0, %v155_v1, 0.0  ;;  %163 = vrcp.f32 %v195_v5  ;;  %113 = vmatpush.bf16.msra.mxu0 %v152_v22  ;;  %v161_v43 = vld [vmem:[%s248_s1] ss:$0 sm:$0xff]  ;;  %s196_s1 = smov [#allocation2]   ;;  %s130_s26 = sshll.u32 %s251_s4, 4  ;;  %s131_s26 = int_to_ptr.hbm [resolvable:$true] %s130_s26 }
   0x5   :  { %27 = vadd.xlane.f32.xlu0 %v26_v2  ;;  %v29_v4 = vsel %vm25_vm0, %v156_v3, 0.0  ;;  %v162_v48 = vld [vmem:[%s249_s2] ss:$0 sm:$0xff]  ;;  %s128_s23 = sshll.u32 %s196_s1, 4  ;;  %s197_s2 = smov 128   ;;  %s129_s23 = int_to_ptr.vmem [resolvable:$true] %s128_s23 }
   0x6   :  { %s198_s27 = smov 8  }
   0x8   :  { %114 = vmatpush.bf16.msra.mxu0 %v151_v24 }
   0xa   :  { %v164_v6 = vpop.eup %163 }
   0xb   :  { %v33_v7 = vmul.f32 32.0, %v164_v6  ;;  %vm37_vm1 = vweird.f32 %v164_v6 }
   0xd   :  { %30 = vadd.xlane.f32.xlu0 %v29_v4  ;;  %v34_v8 = vsub.f32 1.0, %v33_v7 }
   0xf   :  { %v35_v9 = vmul.f32 %v164_v6, %v34_v8 }
  0x11   :  { %v36_v10 = vadd.f32 %v164_v6, %v35_v9 }
  0x13   :  { %v38_v11 = vsel %vm37_vm1, %v164_v6, %v36_v10 }
  0x78   :  { %v28_v12 = vpop.xlane.xlu0 %27 }
  0x79   :  { %v39_v13 = vmul.f32 %v38_v11, %v28_v12 }
  0x7b   :  { %v41_v14 = vsub.f32 %v155_v1, %v39_v13 }
  0x7d   :  { %v43_v15 = vmul.f32 %v41_v14, %v41_v14 }
  0x7f   :  { %v45_v16 = vsel %vm25_vm0, %v43_v15, 0.0 }
  0x80   :  { %46 = vadd.xlane.f32.xlu1 %v45_v16  ;;  %v31_v17 = vpop.xlane.xlu0 %30 }
  0x81   :  { %v40_v18 = vmul.f32 %v38_v11, %v31_v17 }
  0x83   :  { %v42_v19 = vsub.f32 %v156_v3, %v40_v18 }
  0x85   :  { %v44_v20 = vmul.f32 %v42_v19, %v42_v19 }
  0x87   :  { %v48_v21 = vsel %vm25_vm0, %v44_v20, 0.0 }
  0x88   :  { %49 = vadd.xlane.f32.xlu1 %v48_v21 }
  0xf3   :  { %v47_v23 = vpop.xlane.xlu1 %46 }
  0xf4   :  { %v51_v25 = vmul.f32 %v47_v23, %v38_v11 }
  0xf6   :  { %v53_v26 = vadd.f32 1e-06, %v51_v25 }
  0xf8   :  { %165 = vrsqrt.f32 %v53_v26  ;;  %vm61_vm3 = vweird.f32 %v53_v26 }
  0xfb   :  { %v50_v27 = vpop.xlane.xlu1 %49 }
  0xfc   :  { %v52_v28 = vmul.f32 %v50_v27, %v38_v11 }
  0xfe   :  { %v166_v29 = vpop.eup %165  ;;  %v54_v30 = vadd.f32 1e-06, %v52_v28 }
  0xff   :  { %v56_v31 = vmul.f32 %v166_v29, %v53_v26  ;;  %vm62_vm2 = vweird.f32 %v166_v29 }
 0x100   :  { %167 = vrsqrt.f32 %v54_v30  ;;  %vm63_vm4 = vmor %vm61_vm3, %vm62_vm2  ;;  %vm71_vm6 = vweird.f32 %v54_v30 }
 0x101   :  { %v57_v32 = vmul.f32 %v166_v29, %v56_v31 }
 0x103   :  { %v58_v33 = vmul.f32 0.5, %v57_v32 }
 0x105   :  { %v59_v34 = vsub.f32 1.5, %v58_v33 }
 0x106   :  { %v168_v35 = vpop.eup %167 }
 0x107   :  { %v60_v36 = vmul.f32 %v166_v29, %v59_v34  ;;  %v66_v37 = vmul.f32 %v168_v35, %v54_v30  ;;  %vm72_vm5 = vweird.f32 %v168_v35 }
 0x108   :  { %vm73_vm7 = vmor %vm71_vm6, %vm72_vm5 }
 0x109   :  { %v67_v38 = vmul.f32 %v168_v35, %v66_v37  ;;  %v64_v39 = vsel %vm63_vm4, %v166_v29, %v60_v36 }
 0x10a   :  { %v75_v42 = vmul.f32 %v64_v39, %v41_v14 }
 0x10b   :  { %v68_v40 = vmul.f32 0.5, %v67_v38 }
 0x10c   :  { %v80_v47 = vmul.f32 %v161_v43, %v75_v42 }
 0x10d   :  { %v69_v41 = vsub.f32 1.5, %v68_v40 }
 0x10e   :  { %v85_v50 = vadd.f32 %v162_v48, %v80_v47 }
 0x10f   :  { %v70_v44 = vmul.f32 %v168_v35, %v69_v41 }
 0x111   :  { %v74_v45 = vsel %vm73_vm7, %v168_v35, %v70_v44 }
 0x112   :  { %v76_v46 = vmul.f32 %v74_v45, %v42_v19 }
 0x114   :  { %v81_v49 = vmul.f32 %v161_v43, %v76_v46 }
 0x116   :  { %v86_v51 = vadd.f32 %v162_v48, %v81_v49 }
 0x118   :  { %v87_v52 = vpack.c.bf16 %v86_v51, %v85_v50 }
 0x11a   :  { %150 = vmatmul.msk.bf16.vlgmr.msra.gmra.mxu0 %vm25_vm0, %v87_v52 }
 0x197   :  { %v116_v53 = vpop.f32.mrf.mxu0 }
 0x198   :  { %122 = vst.msk [vmem:[#allocation2] sm:$0xff] %vm121_vm8, %v116_v53 }
 0x19f   :  { %v118_v54 = vpop.f32.mrf.mxu0 }
 0x1a0   :  { %123 = vst.msk [vmem:[#allocation2 + $0x8] sm:$0xff] %vm121_vm8, %v118_v54 }
 0x1a1   :  { %136 = dma.vmem_to_hbm [thread:$0]  %s129_s23, 256, %s131_s26, [#allocation3], %s197_s2, %s197_s2, %s198_s27  }
 0x1a2   :  { %193 = dma.done.wait [#allocation3], 256  }
 0x1a3   :  { %194 = vsyncadd [#allocation3], 4294967040 }
 0x1a4   :  { %141 = vsyncpa [#allocation3], 1 }

</bundles_post_ra>
